<compile_context>
chip_gen: v5e
topology: v5e:2x2
jax: 0.10.0
libtpu: 0.0.40
codegen_flags: <defaults>
</compile_context>

<pallas_src>
import jax
import jax.numpy as jnp
from jax.experimental import pallas as pl
from jax.experimental.pallas import tpu as pltpu


def resblock_kernel(x_ref, w1s_ref, b1s_ref, a1_ref, w2_ref, b2_ref, a2_ref,
                    o_ref, slabx_ref, padh_ref, slabh_ref):
    # x_ref:    (1, H+2, W+2, Cin)   pre-padded input image (NHWC)
    # w1s_ref:  (9*Cin, 2*Cout)      [conv1*BN1 | shortcut] fused weight (bf16)
    # b1s_ref:  (1, 2*Cout)          fused bias [conv1+BN1 | shortcut]
    # a1_ref:   (1, Cout)            PReLU1 alpha
    # w2_ref:   (9*Cout, Cout)       conv2*BN2 folded weight (bf16)
    # b2_ref:   (1, Cout)            conv2+BN2 folded bias
    # a2_ref:   (1, Cout)            final PReLU alpha
    # o_ref:    (1, H, W, Cout)
    # slabx_ref: VMEM (H*W, 9*Cin)   im2col slab of x (shared by conv1/shortcut)
    # padh_ref:  VMEM (H+2, W+2, Cout) zero-padded conv1 activation
    # slabh_ref: VMEM (H*W, 9*Cout)  im2col slab of padded h1
    H = o_ref.shape[1]
    W = o_ref.shape[2]
    Cin = x_ref.shape[3]
    Cout = o_ref.shape[3]
    HW = H * W
    mm_dtype = w1s_ref.dtype

    # ---- im2col slab for the input: 9 strided tap copies, built once ----
    for k in range(9):
        kh, kw = divmod(k, 3)
        tap = x_ref[0, kh:kh + H, kw:kw + W, :].reshape(HW, Cin)
        slabx_ref[:, k * Cin:(k + 1) * Cin] = tap

    # ---- fused conv1(+BN1 folded) and shortcut conv: ONE MXU matmul, K=9*Cin ----
    y = jnp.dot(slabx_ref[...].astype(mm_dtype), w1s_ref[...],
                preferred_element_type=jnp.float32) + b1s_ref[...]
    h1 = y[:, :Cout]          # conv1 + BN1 (folded)
    ident = y[:, Cout:]       # shortcut conv
    h1 = jnp.where(h1 > 0, h1, a1_ref[...] * h1)        # PReLU1 (f32)

    # ---- zero-pad h1 for the second 3x3 conv: only the 1-px border is zeroed,
    #      the interior is fully overwritten every grid step ----
    padh_ref[0:1, :, :] = jnp.zeros((1, W + 2, Cout), padh_ref.dtype)
    padh_ref[H + 1:H + 2, :, :] = jnp.zeros((1, W + 2, Cout), padh_ref.dtype)
    padh_ref[:, 0:1, :] = jnp.zeros((H + 2, 1, Cout), padh_ref.dtype)
    padh_ref[:, W + 1:W + 2, :] = jnp.zeros((H + 2, 1, Cout), padh_ref.dtype)
    padh_ref[1:H + 1, 1:W + 1, :] = h1.reshape(H, W, Cout)

    # ---- im2col slab for conv2 ----
    for k in range(9):
        kh, kw = divmod(k, 3)
        tap = padh_ref[kh:kh + H, kw:kw + W, :].reshape(HW, Cout)
        slabh_ref[:, k * Cout:(k + 1) * Cout] = tap

    # ---- conv2(+BN2 folded): ONE MXU matmul, K=9*Cout; residual add + PReLU ----
    h2 = jnp.dot(slabh_ref[...].astype(mm_dtype), w2_ref[...],
                 preferred_element_type=jnp.float32) + b2_ref[...]
    out = h2 + ident
    out = jnp.where(out > 0, out, a2_ref[...] * out)    # final PReLU (f32)

    # TODO(synk): a fully lane-dense (H, W*Cout) output layout would need a
    # sublane->lane relayout of the (H*W, Cout) result; keeping the proven
    # (H, W, Cout) store here for lowering robustness.
    o_ref[0] = out.reshape(H, W, Cout).astype(o_ref.dtype)


def _fold_bn(w, b, gamma, beta, mean, var, eps=1e-5):
    """Fold eval-mode BatchNorm into the preceding conv's weight/bias."""
    s = gamma / jnp.sqrt(var + eps)                      # (Cout,)
    return w * s, b * s + (beta - mean * s)


def residual_block(x_nhwc, params, *, matmul_dtype=jnp.bfloat16):
    """x_nhwc: (N, H, W, Cin) float32 -> (N, H, W, Cout) float32."""
    N, H, W, Cin = x_nhwc.shape
    Cout = params["w1"].shape[-1]

    # ---- parameter folding (plain JAX, outside the kernel) ----
    w1f, b1f = _fold_bn(params["w1"], params["b1"], params["bn1_gamma"],
                        params["bn1_beta"], params["bn1_mean"], params["bn1_var"])
    w2f, b2f = _fold_bn(params["w2"], params["b2"], params["bn2_gamma"],
                        params["bn2_beta"], params["bn2_mean"], params["bn2_var"])
    # conv1 and the shortcut conv read the same im2col slab -> fuse along Cout.
    w1s = jnp.concatenate([w1f, params["wsc"]], axis=-1)          # (9, Cin, 2*Cout)
    w1s = w1s.reshape(9 * Cin, 2 * Cout).astype(matmul_dtype)
    b1s = jnp.concatenate([b1f, params["bsc"]])[None, :].astype(jnp.float32)
    w2m = w2f.reshape(9 * Cout, Cout).astype(matmul_dtype)
    b2m = b2f[None, :].astype(jnp.float32)
    a1 = params["alpha1"][None, :].astype(jnp.float32)
    a2 = params["alpha2"][None, :].astype(jnp.float32)

    # "same" padding of the input happens once in plain JAX (glue).
    x_pad = jnp.pad(x_nhwc, ((0, 0), (1, 1), (1, 1), (0, 0)))

    def full(shp):
        return pl.BlockSpec(shp, lambda n: (0,) * len(shp))

    grid_spec = pltpu.PrefetchScalarGridSpec(
        num_scalar_prefetch=0,
        grid=(N,),
        in_specs=[
            pl.BlockSpec((1, H + 2, W + 2, Cin), lambda n: (n, 0, 0, 0)),  # x_pad
            full((9 * Cin, 2 * Cout)),   # [conv1|shortcut] fused weight
            full((1, 2 * Cout)),         # fused bias
            full((1, Cout)),             # PReLU1 alpha
            full((9 * Cout, Cout)),      # conv2 weight (BN folded)
            full((1, Cout)),             # conv2 bias (BN folded)
            full((1, Cout)),             # final PReLU alpha
        ],
        out_specs=pl.BlockSpec((1, H, W, Cout), lambda n: (n, 0, 0, 0)),
        scratch_shapes=[
            pltpu.VMEM((H * W, 9 * Cin), jnp.float32),
            pltpu.VMEM((H + 2, W + 2, Cout), jnp.float32),
            pltpu.VMEM((H * W, 9 * Cout), jnp.float32),
        ],
    )

    itemsize = jnp.dtype(matmul_dtype).itemsize
    cost = pl.CostEstimate(
        flops=int(2 * N * H * W * 9 * (Cin * 2 * Cout + Cout * Cout)),
        transcendentals=0,
        bytes_accessed=int(N * (H + 2) * (W + 2) * Cin * 4
                           + (9 * Cin * 2 * Cout + 9 * Cout * Cout) * itemsize
                           + 6 * Cout * 4
                           + N * H * W * Cout * 4),
    )

    # TODO(synk): for production H/W (e.g. 256x256x64) add an H-tiling grid axis
    # with a 1-row halo so the per-step resident set fits v7x's 64 MiB VMEM.
    return pl.pallas_call(
        resblock_kernel,
        out_shape=jax.ShapeDtypeStruct((N, H, W, Cout), x_nhwc.dtype),
        grid_spec=grid_spec,
        compiler_params=pltpu.CompilerParams(
            dimension_semantics=("parallel",)),   # images are independent (v7x 2 TCs)
        cost_estimate=cost,
    )(x_pad, w1s, b1s, a1, w2m, b2m, a2)


def residual_block_reference(x, params, eps=1e-5):
    """Pure-JAX reference with unfolded BN (eval mode), NHWC."""
    def conv3x3(inp, w, b):
        Hh, Ww = inp.shape[1], inp.shape[2]
        xp = jnp.pad(inp, ((0, 0), (1, 1), (1, 1), (0, 0)))
        acc = jnp.zeros(inp.shape[:3] + (w.shape[-1],), jnp.float32)
        for kh in range(3):
            for kw in range(3):
                acc = acc + xp[:, kh:kh + Hh, kw:kw + Ww, :] @ w[kh * 3 + kw]
        return acc + b

    def bn(h, g, be, m, v):
        return (h - m) * (g / jnp.sqrt(v + eps)) + be

    def prelu(h, a):
        return jnp.where(h > 0, h, a * h)

    p = params
    h = prelu(bn(conv3x3(x, p["w1"], p["b1"]),
                 p["bn1_gamma"], p["bn1_beta"], p["bn1_mean"], p["bn1_var"]),
              p["alpha1"])
    h = bn(conv3x3(h, p["w2"], p["b2"]),
           p["bn2_gamma"], p["bn2_beta"], p["bn2_mean"], p["bn2_var"])
    ident = conv3x3(x, p["wsc"], p["bsc"])
    return prelu(h + ident, p["alpha2"])


def make_params(key, in_chn, out_chn):
    # A fresh PyTorch module has BN gamma=1, beta=0, mean=0, var=1; random
    # eval-mode stats are used here so the BN-fold path is actually exercised.
    ks = jax.random.split(key, 8)
    n = jax.random.normal

    def bn_params(k):
        kg, kb, km, kv = jax.random.split(k, 4)
        return (1.0 + 0.1 * n(kg, (out_chn,), jnp.float32),
                0.1 * n(kb, (out_chn,), jnp.float32),
                0.1 * n(km, (out_chn,), jnp.float32),
                jax.random.uniform(kv, (out_chn,), jnp.float32, 0.5, 1.5))

    g1, be1, m1, v1 = bn_params(ks[6])
    g2, be2, m2, v2 = bn_params(ks[7])
    return {
        "w1": 0.1 * n(ks[0], (9, in_chn, out_chn), jnp.float32),
        "b1": 0.1 * n(ks[1], (out_chn,), jnp.float32),
        "bn1_gamma": g1, "bn1_beta": be1, "bn1_mean": m1, "bn1_var": v1,
        "alpha1": jnp.full((out_chn,), 0.25, jnp.float32),   # PReLU(out_chn) init
        "w2": 0.1 * n(ks[2], (9, out_chn, out_chn), jnp.float32),
        "b2": 0.1 * n(ks[3], (out_chn,), jnp.float32),
        "bn2_gamma": g2, "bn2_beta": be2, "bn2_mean": m2, "bn2_var": v2,
        "alpha2": jnp.full((out_chn,), 0.25, jnp.float32),
        "wsc": 0.1 * n(ks[4], (9, in_chn, out_chn), jnp.float32),
        "bsc": 0.1 * n(ks[5], (out_chn,), jnp.float32),
    }


if __name__ == "__main__":
    key = jax.random.PRNGKey(0)
    k_x, k_p = jax.random.split(key)

    N, H, W = 2, 16, 16
    in_chn, out_chn = 4, 8            # in_chn != out_chn -> shortcut conv path

    x = jax.random.normal(k_x, (N, H, W, in_chn), jnp.float32)   # NHWC layout
    params = make_params(k_p, in_chn, out_chn)

    out = residual_block(x, params)
    out = jax.block_until_ready(out)
    assert out.shape == (N, H, W, out_chn)
    assert jnp.all(jnp.isfinite(out))

    # Correctness vs. pure-JAX reference (bf16 MXU operands -> loose tolerance).
    ref = residual_block_reference(x, params)
    err = float(jnp.max(jnp.abs(out - ref)))
    assert err < 1e-1, f"max abs err {err}"
    print("KERNEL_OK")
</pallas_src>

<mosaic_0001>
module attributes {stable_mosaic.version = 11 : i64} {
  func.func @resblock_kernel(%arg0: i32, %arg1: memref<1x18x18x4xf32, #tpu.memory_space<vmem>>, %arg2: memref<36x16xbf16, #tpu.memory_space<vmem>>, %arg3: memref<1x16xf32, #tpu.memory_space<vmem>>, %arg4: memref<1x8xf32, #tpu.memory_space<vmem>>, %arg5: memref<72x8xbf16, #tpu.memory_space<vmem>>, %arg6: memref<1x8xf32, #tpu.memory_space<vmem>>, %arg7: memref<1x8xf32, #tpu.memory_space<vmem>>, %arg8: memref<1x16x16x8xf32, #tpu.memory_space<vmem>>, %arg9: memref<256x36xf32, #tpu.memory_space<vmem>>, %arg10: memref<18x18x8xf32, #tpu.memory_space<vmem>>, %arg11: memref<256x72xf32, #tpu.memory_space<vmem>>) attributes {dimension_semantics = [#tpu.dimension_semantics<parallel>], iteration_bounds = array<i64: 2>, scalar_prefetch = 0 : i64, scratch_operands = 3 : i64, tpu.core_type = #tpu.core_type<tc>, window_params = [{transform_indices = @transform_0, window_bounds = array<i64: 1, 18, 18, 4>}, {pipeline_mode = #tpu.pipeline_mode<synchronous>, transform_indices = @transform_1, window_bounds = array<i64: 36, 16>}, {pipeline_mode = #tpu.pipeline_mode<synchronous>, transform_indices = @transform_2, window_bounds = array<i64: 1, 16>}, {pipeline_mode = #tpu.pipeline_mode<synchronous>, transform_indices = @transform_3, window_bounds = array<i64: 1, 8>}, {pipeline_mode = #tpu.pipeline_mode<synchronous>, transform_indices = @transform_4, window_bounds = array<i64: 72, 8>}, {pipeline_mode = #tpu.pipeline_mode<synchronous>, transform_indices = @transform_5, window_bounds = array<i64: 1, 8>}, {pipeline_mode = #tpu.pipeline_mode<synchronous>, transform_indices = @transform_6, window_bounds = array<i64: 1, 8>}, {transform_indices = @transform_7, window_bounds = array<i64: 1, 16, 16, 8>}]} {
    %c0 = arith.constant 0 : index
    %c0_0 = arith.constant 0 : index
    %c0_1 = arith.constant 0 : index
    %c0_2 = arith.constant 0 : index
    %0 = vector.load %arg1[%c0, %c0_0, %c0_1, %c0_2] : memref<1x18x18x4xf32, #tpu.memory_space<vmem>>, vector<1x16x16x4xf32>
    %1 = vector.shape_cast %0 : vector<1x16x16x4xf32> to vector<16x16x4xf32>
    %2 = vector.shape_cast %1 : vector<16x16x4xf32> to vector<256x4xf32>
    %c0_3 = arith.constant 0 : index
    %c0_4 = arith.constant 0 : index
    %3 = vector.load %arg9[%c0_3, %c0_4] : memref<256x36xf32, #tpu.memory_space<vmem>>, vector<256x4xf32>
    tpu.vector_store %arg9[%c0_3, %c0_4], %2 {strides = array<i32>} : memref<256x36xf32, #tpu.memory_space<vmem>>, vector<256x4xf32>,
    %c0_5 = arith.constant 0 : index
    %c0_6 = arith.constant 0 : index
    %c1 = arith.constant 1 : index
    %c0_7 = arith.constant 0 : index
    %4 = vector.load %arg1[%c0_5, %c0_6, %c1, %c0_7] : memref<1x18x18x4xf32, #tpu.memory_space<vmem>>, vector<1x16x16x4xf32>
    %5 = vector.shape_cast %4 : vector<1x16x16x4xf32> to vector<16x16x4xf32>
    %6 = vector.shape_cast %5 : vector<16x16x4xf32> to vector<256x4xf32>
    %c0_8 = arith.constant 0 : index
    %c4 = arith.constant 4 : index
    %7 = vector.load %arg9[%c0_8, %c4] : memref<256x36xf32, #tpu.memory_space<vmem>>, vector<256x4xf32>
    tpu.vector_store %arg9[%c0_8, %c4], %6 {strides = array<i32>} : memref<256x36xf32, #tpu.memory_space<vmem>>, vector<256x4xf32>,
    %c0_9 = arith.constant 0 : index
    %c0_10 = arith.constant 0 : index
    %c2 = arith.constant 2 : index
    %c0_11 = arith.constant 0 : index
    %8 = vector.load %arg1[%c0_9, %c0_10, %c2, %c0_11] : memref<1x18x18x4xf32, #tpu.memory_space<vmem>>, vector<1x16x16x4xf32>
    %9 = vector.shape_cast %8 : vector<1x16x16x4xf32> to vector<16x16x4xf32>
    %10 = vector.shape_cast %9 : vector<16x16x4xf32> to vector<256x4xf32>
    %c0_12 = arith.constant 0 : index
    %c8 = arith.constant 8 : index
    %11 = vector.load %arg9[%c0_12, %c8] : memref<256x36xf32, #tpu.memory_space<vmem>>, vector<256x4xf32>
    tpu.vector_store %arg9[%c0_12, %c8], %10 {strides = array<i32>} : memref<256x36xf32, #tpu.memory_space<vmem>>, vector<256x4xf32>,
    %c0_13 = arith.constant 0 : index
    %c1_14 = arith.constant 1 : index
    %c0_15 = arith.constant 0 : index
    %c0_16 = arith.constant 0 : index
    %12 = vector.load %arg1[%c0_13, %c1_14, %c0_15, %c0_16] : memref<1x18x18x4xf32, #tpu.memory_space<vmem>>, vector<1x16x16x4xf32>
    %13 = vector.shape_cast %12 : vector<1x16x16x4xf32> to vector<16x16x4xf32>
    %14 = vector.shape_cast %13 : vector<16x16x4xf32> to vector<256x4xf32>
    %c0_17 = arith.constant 0 : index
    %c12 = arith.constant 12 : index
    %15 = vector.load %arg9[%c0_17, %c12] : memref<256x36xf32, #tpu.memory_space<vmem>>, vector<256x4xf32>
    tpu.vector_store %arg9[%c0_17, %c12], %14 {strides = array<i32>} : memref<256x36xf32, #tpu.memory_space<vmem>>, vector<256x4xf32>,
    %c0_18 = arith.constant 0 : index
    %c1_19 = arith.constant 1 : index
    %c1_20 = arith.constant 1 : index
    %c0_21 = arith.constant 0 : index
    %16 = vector.load %arg1[%c0_18, %c1_19, %c1_20, %c0_21] : memref<1x18x18x4xf32, #tpu.memory_space<vmem>>, vector<1x16x16x4xf32>
    %17 = vector.shape_cast %16 : vector<1x16x16x4xf32> to vector<16x16x4xf32>
    %18 = vector.shape_cast %17 : vector<16x16x4xf32> to vector<256x4xf32>
    %c0_22 = arith.constant 0 : index
    %c16 = arith.constant 16 : index
    %19 = vector.load %arg9[%c0_22, %c16] : memref<256x36xf32, #tpu.memory_space<vmem>>, vector<256x4xf32>
    tpu.vector_store %arg9[%c0_22, %c16], %18 {strides = array<i32>} : memref<256x36xf32, #tpu.memory_space<vmem>>, vector<256x4xf32>,
    %c0_23 = arith.constant 0 : index
    %c1_24 = arith.constant 1 : index
    %c2_25 = arith.constant 2 : index
    %c0_26 = arith.constant 0 : index
    %20 = vector.load %arg1[%c0_23, %c1_24, %c2_25, %c0_26] : memref<1x18x18x4xf32, #tpu.memory_space<vmem>>, vector<1x16x16x4xf32>
    %21 = vector.shape_cast %20 : vector<1x16x16x4xf32> to vector<16x16x4xf32>
    %22 = vector.shape_cast %21 : vector<16x16x4xf32> to vector<256x4xf32>
    %c0_27 = arith.constant 0 : index
    %c20 = arith.constant 20 : index
    %23 = vector.load %arg9[%c0_27, %c20] : memref<256x36xf32, #tpu.memory_space<vmem>>, vector<256x4xf32>
    tpu.vector_store %arg9[%c0_27, %c20], %22 {strides = array<i32>} : memref<256x36xf32, #tpu.memory_space<vmem>>, vector<256x4xf32>,
    %c0_28 = arith.constant 0 : index
    %c2_29 = arith.constant 2 : index
    %c0_30 = arith.constant 0 : index
    %c0_31 = arith.constant 0 : index
    %24 = vector.load %arg1[%c0_28, %c2_29, %c0_30, %c0_31] : memref<1x18x18x4xf32, #tpu.memory_space<vmem>>, vector<1x16x16x4xf32>
    %25 = vector.shape_cast %24 : vector<1x16x16x4xf32> to vector<16x16x4xf32>
    %26 = vector.shape_cast %25 : vector<16x16x4xf32> to vector<256x4xf32>
    %c0_32 = arith.constant 0 : index
    %c24 = arith.constant 24 : index
    %27 = vector.load %arg9[%c0_32, %c24] : memref<256x36xf32, #tpu.memory_space<vmem>>, vector<256x4xf32>
    tpu.vector_store %arg9[%c0_32, %c24], %26 {strides = array<i32>} : memref<256x36xf32, #tpu.memory_space<vmem>>, vector<256x4xf32>,
    %c0_33 = arith.constant 0 : index
    %c2_34 = arith.constant 2 : index
    %c1_35 = arith.constant 1 : index
    %c0_36 = arith.constant 0 : index
    %28 = vector.load %arg1[%c0_33, %c2_34, %c1_35, %c0_36] : memref<1x18x18x4xf32, #tpu.memory_space<vmem>>, vector<1x16x16x4xf32>
    %29 = vector.shape_cast %28 : vector<1x16x16x4xf32> to vector<16x16x4xf32>
    %30 = vector.shape_cast %29 : vector<16x16x4xf32> to vector<256x4xf32>
    %c0_37 = arith.constant 0 : index
    %c28 = arith.constant 28 : index
    %31 = vector.load %arg9[%c0_37, %c28] : memref<256x36xf32, #tpu.memory_space<vmem>>, vector<256x4xf32>
    tpu.vector_store %arg9[%c0_37, %c28], %30 {strides = array<i32>} : memref<256x36xf32, #tpu.memory_space<vmem>>, vector<256x4xf32>,
    %c0_38 = arith.constant 0 : index
    %c2_39 = arith.constant 2 : index
    %c2_40 = arith.constant 2 : index
    %c0_41 = arith.constant 0 : index
    %32 = vector.load %arg1[%c0_38, %c2_39, %c2_40, %c0_41] : memref<1x18x18x4xf32, #tpu.memory_space<vmem>>, vector<1x16x16x4xf32>
    %33 = vector.shape_cast %32 : vector<1x16x16x4xf32> to vector<16x16x4xf32>
    %34 = vector.shape_cast %33 : vector<16x16x4xf32> to vector<256x4xf32>
    %c0_42 = arith.constant 0 : index
    %c32 = arith.constant 32 : index
    %35 = vector.load %arg9[%c0_42, %c32] : memref<256x36xf32, #tpu.memory_space<vmem>>, vector<256x4xf32>
    tpu.vector_store %arg9[%c0_42, %c32], %34 {strides = array<i32>} : memref<256x36xf32, #tpu.memory_space<vmem>>, vector<256x4xf32>,
    %c0_43 = arith.constant 0 : index
    %c0_44 = arith.constant 0 : index
    %36 = vector.load %arg9[%c0_43, %c0_44] : memref<256x36xf32, #tpu.memory_space<vmem>>, vector<256x36xf32>
    %37 = arith.truncf %36 : vector<256x36xf32> to vector<256x36xbf16>
    %c0_45 = arith.constant 0 : index
    %c0_46 = arith.constant 0 : index
    %38 = vector.load %arg2[%c0_45, %c0_46] : memref<36x16xbf16, #tpu.memory_space<vmem>>, vector<36x16xbf16>
    %cst = arith.constant dense<0.000000e+00> : vector<256x16xf32>
    %39 = tpu.matmul %37, %38, %cst {dimension_numbers = #tpu.dot_dimension_numbers<[1], [0], [0], [1], [0, 0, 1, 1], [], []>} : vector<256x36xbf16>, vector<36x16xbf16>, vector<256x16xf32> -> vector<256x16xf32>
    %c0_47 = arith.constant 0 : index
    %c0_48 = arith.constant 0 : index
    %40 = vector.load %arg3[%c0_47, %c0_48] : memref<1x16xf32, #tpu.memory_space<vmem>>, vector<1x16xf32>
    %41 = vector.broadcast %40 : vector<1x16xf32> to vector<256x16xf32>
    %42 = arith.addf %39, %41 : vector<256x16xf32>
    %43 = vector.extract_strided_slice %42 {offsets = [0, 0], sizes = [256, 8], strides = [1, 1]} : vector<256x16xf32> to vector<256x8xf32>
    %44 = vector.extract_strided_slice %42 {offsets = [0, 8], sizes = [256, 8], strides = [1, 1]} : vector<256x16xf32> to vector<256x8xf32>
    %cst_49 = arith.constant 0.000000e+00 : f32
    %45 = vector.broadcast %cst_49 : f32 to vector<256x8xf32>
    %46 = arith.cmpf ogt, %43, %45 : vector<256x8xf32>
    %c0_50 = arith.constant 0 : index
    %c0_51 = arith.constant 0 : index
    %47 = vector.load %arg4[%c0_50, %c0_51] : memref<1x8xf32, #tpu.memory_space<vmem>>, vector<1x8xf32>
    %48 = vector.broadcast %47 : vector<1x8xf32> to vector<256x8xf32>
    %49 = arith.mulf %48, %43 : vector<256x8xf32>
    %50 = arith.select %46, %43, %49 : vector<256x8xi1>, vector<256x8xf32>
    %cst_52 = arith.constant 0.000000e+00 : f32
    %51 = vector.broadcast %cst_52 : f32 to vector<1x18x8xf32>
    %c0_53 = arith.constant 0 : index
    %c0_54 = arith.constant 0 : index
    %c0_55 = arith.constant 0 : index
    %52 = vector.load %arg10[%c0_53, %c0_54, %c0_55] : memref<18x18x8xf32, #tpu.memory_space<vmem>>, vector<1x18x8xf32>
    tpu.vector_store %arg10[%c0_53, %c0_54, %c0_55], %51 {strides = array<i32>} : memref<18x18x8xf32, #tpu.memory_space<vmem>>, vector<1x18x8xf32>,
    %cst_56 = arith.constant 0.000000e+00 : f32
    %53 = vector.broadcast %cst_56 : f32 to vector<1x18x8xf32>
    %c17 = arith.constant 17 : index
    %c0_57 = arith.constant 0 : index
    %c0_58 = arith.constant 0 : index
    %54 = vector.load %arg10[%c17, %c0_57, %c0_58] : memref<18x18x8xf32, #tpu.memory_space<vmem>>, vector<1x18x8xf32>
    tpu.vector_store %arg10[%c17, %c0_57, %c0_58], %53 {strides = array<i32>} : memref<18x18x8xf32, #tpu.memory_space<vmem>>, vector<1x18x8xf32>,
    %cst_59 = arith.constant 0.000000e+00 : f32
    %55 = vector.broadcast %cst_59 : f32 to vector<18x1x8xf32>
    %c0_60 = arith.constant 0 : index
    %c0_61 = arith.constant 0 : index
    %c0_62 = arith.constant 0 : index
    %56 = vector.load %arg10[%c0_60, %c0_61, %c0_62] : memref<18x18x8xf32, #tpu.memory_space<vmem>>, vector<18x1x8xf32>
    tpu.vector_store %arg10[%c0_60, %c0_61, %c0_62], %55 {strides = array<i32>} : memref<18x18x8xf32, #tpu.memory_space<vmem>>, vector<18x1x8xf32>,
    %cst_63 = arith.constant 0.000000e+00 : f32
    %57 = vector.broadcast %cst_63 : f32 to vector<18x1x8xf32>
    %c0_64 = arith.constant 0 : index
    %c17_65 = arith.constant 17 : index
    %c0_66 = arith.constant 0 : index
    %58 = vector.load %arg10[%c0_64, %c17_65, %c0_66] : memref<18x18x8xf32, #tpu.memory_space<vmem>>, vector<18x1x8xf32>
    tpu.vector_store %arg10[%c0_64, %c17_65, %c0_66], %57 {strides = array<i32>} : memref<18x18x8xf32, #tpu.memory_space<vmem>>, vector<18x1x8xf32>,
    %59 = vector.shape_cast %50 : vector<256x8xf32> to vector<16x16x8xf32>
    %c1_67 = arith.constant 1 : index
    %c1_68 = arith.constant 1 : index
    %c0_69 = arith.constant 0 : index
    %60 = vector.load %arg10[%c1_67, %c1_68, %c0_69] : memref<18x18x8xf32, #tpu.memory_space<vmem>>, vector<16x16x8xf32>
    tpu.vector_store %arg10[%c1_67, %c1_68, %c0_69], %59 {strides = array<i32>} : memref<18x18x8xf32, #tpu.memory_space<vmem>>, vector<16x16x8xf32>,
    %c0_70 = arith.constant 0 : index
    %c0_71 = arith.constant 0 : index
    %c0_72 = arith.constant 0 : index
    %61 = vector.load %arg10[%c0_70, %c0_71, %c0_72] : memref<18x18x8xf32, #tpu.memory_space<vmem>>, vector<16x16x8xf32>
    %62 = vector.shape_cast %61 : vector<16x16x8xf32> to vector<256x8xf32>
    %c0_73 = arith.constant 0 : index
    %c0_74 = arith.constant 0 : index
    %63 = vector.load %arg11[%c0_73, %c0_74] : memref<256x72xf32, #tpu.memory_space<vmem>>, vector<256x8xf32>
    tpu.vector_store %arg11[%c0_73, %c0_74], %62 {strides = array<i32>} : memref<256x72xf32, #tpu.memory_space<vmem>>, vector<256x8xf32>,
    %c0_75 = arith.constant 0 : index
    %c1_76 = arith.constant 1 : index
    %c0_77 = arith.constant 0 : index
    %64 = vector.load %arg10[%c0_75, %c1_76, %c0_77] : memref<18x18x8xf32, #tpu.memory_space<vmem>>, vector<16x16x8xf32>
    %65 = vector.shape_cast %64 : vector<16x16x8xf32> to vector<256x8xf32>
    %c0_78 = arith.constant 0 : index
    %c8_79 = arith.constant 8 : index
    %66 = vector.load %arg11[%c0_78, %c8_79] : memref<256x72xf32, #tpu.memory_space<vmem>>, vector<256x8xf32>
    tpu.vector_store %arg11[%c0_78, %c8_79], %65 {strides = array<i32>} : memref<256x72xf32, #tpu.memory_space<vmem>>, vector<256x8xf32>,
    %c0_80 = arith.constant 0 : index
    %c2_81 = arith.constant 2 : index
    %c0_82 = arith.constant 0 : index
    %67 = vector.load %arg10[%c0_80, %c2_81, %c0_82] : memref<18x18x8xf32, #tpu.memory_space<vmem>>, vector<16x16x8xf32>
    %68 = vector.shape_cast %67 : vector<16x16x8xf32> to vector<256x8xf32>
    %c0_83 = arith.constant 0 : index
    %c16_84 = arith.constant 16 : index
    %69 = vector.load %arg11[%c0_83, %c16_84] : memref<256x72xf32, #tpu.memory_space<vmem>>, vector<256x8xf32>
    tpu.vector_store %arg11[%c0_83, %c16_84], %68 {strides = array<i32>} : memref<256x72xf32, #tpu.memory_space<vmem>>, vector<256x8xf32>,
    %c1_85 = arith.constant 1 : index
    %c0_86 = arith.constant 0 : index
    %c0_87 = arith.constant 0 : index
    %70 = vector.load %arg10[%c1_85, %c0_86, %c0_87] : memref<18x18x8xf32, #tpu.memory_space<vmem>>, vector<16x16x8xf32>
    %71 = vector.shape_cast %70 : vector<16x16x8xf32> to vector<256x8xf32>
    %c0_88 = arith.constant 0 : index
    %c24_89 = arith.constant 24 : index
    %72 = vector.load %arg11[%c0_88, %c24_89] : memref<256x72xf32, #tpu.memory_space<vmem>>, vector<256x8xf32>
    tpu.vector_store %arg11[%c0_88, %c24_89], %71 {strides = array<i32>} : memref<256x72xf32, #tpu.memory_space<vmem>>, vector<256x8xf32>,
    %c1_90 = arith.constant 1 : index
    %c1_91 = arith.constant 1 : index
    %c0_92 = arith.constant 0 : index
    %73 = vector.load %arg10[%c1_90, %c1_91, %c0_92] : memref<18x18x8xf32, #tpu.memory_space<vmem>>, vector<16x16x8xf32>
    %74 = vector.shape_cast %73 : vector<16x16x8xf32> to vector<256x8xf32>
    %c0_93 = arith.constant 0 : index
    %c32_94 = arith.constant 32 : index
    %75 = vector.load %arg11[%c0_93, %c32_94] : memref<256x72xf32, #tpu.memory_space<vmem>>, vector<256x8xf32>
    tpu.vector_store %arg11[%c0_93, %c32_94], %74 {strides = array<i32>} : memref<256x72xf32, #tpu.memory_space<vmem>>, vector<256x8xf32>,
    %c1_95 = arith.constant 1 : index
    %c2_96 = arith.constant 2 : index
    %c0_97 = arith.constant 0 : index
    %76 = vector.load %arg10[%c1_95, %c2_96, %c0_97] : memref<18x18x8xf32, #tpu.memory_space<vmem>>, vector<16x16x8xf32>
    %77 = vector.shape_cast %76 : vector<16x16x8xf32> to vector<256x8xf32>
    %c0_98 = arith.constant 0 : index
    %c40 = arith.constant 40 : index
    %78 = vector.load %arg11[%c0_98, %c40] : memref<256x72xf32, #tpu.memory_space<vmem>>, vector<256x8xf32>
    tpu.vector_store %arg11[%c0_98, %c40], %77 {strides = array<i32>} : memref<256x72xf32, #tpu.memory_space<vmem>>, vector<256x8xf32>,
    %c2_99 = arith.constant 2 : index
    %c0_100 = arith.constant 0 : index
    %c0_101 = arith.constant 0 : index
    %79 = vector.load %arg10[%c2_99, %c0_100, %c0_101] : memref<18x18x8xf32, #tpu.memory_space<vmem>>, vector<16x16x8xf32>
    %80 = vector.shape_cast %79 : vector<16x16x8xf32> to vector<256x8xf32>
    %c0_102 = arith.constant 0 : index
    %c48 = arith.constant 48 : index
    %81 = vector.load %arg11[%c0_102, %c48] : memref<256x72xf32, #tpu.memory_space<vmem>>, vector<256x8xf32>
    tpu.vector_store %arg11[%c0_102, %c48], %80 {strides = array<i32>} : memref<256x72xf32, #tpu.memory_space<vmem>>, vector<256x8xf32>,
    %c2_103 = arith.constant 2 : index
    %c1_104 = arith.constant 1 : index
    %c0_105 = arith.constant 0 : index
    %82 = vector.load %arg10[%c2_103, %c1_104, %c0_105] : memref<18x18x8xf32, #tpu.memory_space<vmem>>, vector<16x16x8xf32>
    %83 = vector.shape_cast %82 : vector<16x16x8xf32> to vector<256x8xf32>
    %c0_106 = arith.constant 0 : index
    %c56 = arith.constant 56 : index
    %84 = vector.load %arg11[%c0_106, %c56] : memref<256x72xf32, #tpu.memory_space<vmem>>, vector<256x8xf32>
    tpu.vector_store %arg11[%c0_106, %c56], %83 {strides = array<i32>} : memref<256x72xf32, #tpu.memory_space<vmem>>, vector<256x8xf32>,
    %c2_107 = arith.constant 2 : index
    %c2_108 = arith.constant 2 : index
    %c0_109 = arith.constant 0 : index
    %85 = vector.load %arg10[%c2_107, %c2_108, %c0_109] : memref<18x18x8xf32, #tpu.memory_space<vmem>>, vector<16x16x8xf32>
    %86 = vector.shape_cast %85 : vector<16x16x8xf32> to vector<256x8xf32>
    %c0_110 = arith.constant 0 : index
    %c64 = arith.constant 64 : index
    %87 = vector.load %arg11[%c0_110, %c64] : memref<256x72xf32, #tpu.memory_space<vmem>>, vector<256x8xf32>
    tpu.vector_store %arg11[%c0_110, %c64], %86 {strides = array<i32>} : memref<256x72xf32, #tpu.memory_space<vmem>>, vector<256x8xf32>,
    %c0_111 = arith.constant 0 : index
    %c0_112 = arith.constant 0 : index
    %88 = vector.load %arg11[%c0_111, %c0_112] : memref<256x72xf32, #tpu.memory_space<vmem>>, vector<256x72xf32>
    %89 = arith.truncf %88 : vector<256x72xf32> to vector<256x72xbf16>
    %c0_113 = arith.constant 0 : index
    %c0_114 = arith.constant 0 : index
    %90 = vector.load %arg5[%c0_113, %c0_114] : memref<72x8xbf16, #tpu.memory_space<vmem>>, vector<72x8xbf16>
    %cst_115 = arith.constant dense<0.000000e+00> : vector<256x8xf32>
    %91 = tpu.matmul %89, %90, %cst_115 {dimension_numbers = #tpu.dot_dimension_numbers<[1], [0], [0], [1], [0, 0, 1, 1], [], []>} : vector<256x72xbf16>, vector<72x8xbf16>, vector<256x8xf32> -> vector<256x8xf32>
    %c0_116 = arith.constant 0 : index
    %c0_117 = arith.constant 0 : index
    %92 = vector.load %arg6[%c0_116, %c0_117] : memref<1x8xf32, #tpu.memory_space<vmem>>, vector<1x8xf32>
    %93 = vector.broadcast %92 : vector<1x8xf32> to vector<256x8xf32>
    %94 = arith.addf %91, %93 : vector<256x8xf32>
    %95 = arith.addf %94, %44 : vector<256x8xf32>
    %cst_118 = arith.constant 0.000000e+00 : f32
    %96 = vector.broadcast %cst_118 : f32 to vector<256x8xf32>
    %97 = arith.cmpf ogt, %95, %96 : vector<256x8xf32>
    %c0_119 = arith.constant 0 : index
    %c0_120 = arith.constant 0 : index
    %98 = vector.load %arg7[%c0_119, %c0_120] : memref<1x8xf32, #tpu.memory_space<vmem>>, vector<1x8xf32>
    %99 = vector.broadcast %98 : vector<1x8xf32> to vector<256x8xf32>
    %100 = arith.mulf %99, %95 : vector<256x8xf32>
    %101 = arith.select %97, %95, %100 : vector<256x8xi1>, vector<256x8xf32>
    %102 = vector.shape_cast %101 : vector<256x8xf32> to vector<16x16x8xf32>
    %c0_121 = arith.constant 0 : index
    %c0_122 = arith.constant 0 : index
    %c0_123 = arith.constant 0 : index
    %c0_124 = arith.constant 0 : index
    %103 = vector.load %arg8[%c0_121, %c0_122, %c0_123, %c0_124] : memref<1x16x16x8xf32, #tpu.memory_space<vmem>>, vector<1x16x16x8xf32>
    %104 = vector.shape_cast %103 : vector<1x16x16x8xf32> to vector<16x16x8xf32>
    %105 = vector.shape_cast %102 : vector<16x16x8xf32> to vector<1x16x16x8xf32>
    tpu.vector_store %arg8[%c0_121, %c0_122, %c0_123, %c0_124], %105 {strides = array<i32>} : memref<1x16x16x8xf32, #tpu.memory_space<vmem>>, vector<1x16x16x8xf32>,
    return
  }
  func.func @transform_0(%arg0: i32) -> (i32, i32, i32, i32) {
    %c0_i32 = arith.constant 0 : i32
    %c0_i32_0 = arith.constant 0 : i32
    %c0_i32_1 = arith.constant 0 : i32
    %c0_i32_2 = arith.constant 0 : i32
    return %arg0, %c0_i32, %c0_i32_0, %c0_i32_1 : i32, i32, i32, i32
  }
  func.func @transform_1(%arg0: i32) -> (i32, i32) {
    %c0_i32 = arith.constant 0 : i32
    %c0_i32_0 = arith.constant 0 : i32
    %c0_i32_1 = arith.constant 0 : i32
    return %c0_i32, %c0_i32_0 : i32, i32
  }
  func.func @transform_2(%arg0: i32) -> (i32, i32) {
    %c0_i32 = arith.constant 0 : i32
    %c0_i32_0 = arith.constant 0 : i32
    %c0_i32_1 = arith.constant 0 : i32
    return %c0_i32, %c0_i32_0 : i32, i32
  }
  func.func @transform_3(%arg0: i32) -> (i32, i32) {
    %c0_i32 = arith.constant 0 : i32
    %c0_i32_0 = arith.constant 0 : i32
    %c0_i32_1 = arith.constant 0 : i32
    return %c0_i32, %c0_i32_0 : i32, i32
  }
  func.func @transform_4(%arg0: i32) -> (i32, i32) {
    %c0_i32 = arith.constant 0 : i32
    %c0_i32_0 = arith.constant 0 : i32
    %c0_i32_1 = arith.constant 0 : i32
    return %c0_i32, %c0_i32_0 : i32, i32
  }
  func.func @transform_5(%arg0: i32) -> (i32, i32) {
    %c0_i32 = arith.constant 0 : i32
    %c0_i32_0 = arith.constant 0 : i32
    %c0_i32_1 = arith.constant 0 : i32
    return %c0_i32, %c0_i32_0 : i32, i32
  }
  func.func @transform_6(%arg0: i32) -> (i32, i32) {
    %c0_i32 = arith.constant 0 : i32
    %c0_i32_0 = arith.constant 0 : i32
    %c0_i32_1 = arith.constant 0 : i32
    return %c0_i32, %c0_i32_0 : i32, i32
  }
  func.func @transform_7(%arg0: i32) -> (i32, i32, i32, i32) {
    %c0_i32 = arith.constant 0 : i32
    %c0_i32_0 = arith.constant 0 : i32
    %c0_i32_1 = arith.constant 0 : i32
    %c0_i32_2 = arith.constant 0 : i32
    return %arg0, %c0_i32, %c0_i32_0, %c0_i32_1 : i32, i32, i32, i32
  }
}

</mosaic_0001>

<bundles_post_ra>
// kernel: tpu_custom_call.1
= control target key start
LH: loop header
LB: loop body
LE: loop exit
PB: predicated region body
PF: predicated region fallthrough
CT: control target
= control target key end

     0   :  { %s4832_s24 = smov 0   ;;  %s7548_s0 = inlined_call_operand.vmem [shape: f32[2,18,18,4], index: 0, kind: input, shape index: {}]   ;;  %s7549_s1 = inlined_call_operand.vmem [shape: bf16[36,16], index: 1, kind: input, shape index: {}]   ;;  %s7550_s2 = inlined_call_operand.vmem [shape: f32[1,16], index: 2, kind: input, shape index: {}]   ;;  %s7551_s3 = inlined_call_operand.vmem [shape: f32[1,8], index: 3, kind: input, shape index: {}]   ;;  %s7552_s4 = inlined_call_operand.vmem [shape: bf16[72,8], index: 4, kind: input, shape index: {}]   ;;  %s7553_s5 = inlined_call_operand.vmem [shape: f32[1,8], index: 5, kind: input, shape index: {}]   ;;  %s7554_s6 = inlined_call_operand.vmem [shape: f32[1,8], index: 6, kind: input, shape index: {}]   ;;  %s7555_s7 = inlined_call_operand.vmem [shape: f32[2,16,16,8], index: 7, kind: output, shape index: {}]  }
   0x1 LB: > { %s4470_s25 = sadd.s32 4294967295, %s4776_s24   ;;  %p4474_p0 = scmp.ge.s32.totalorder %s4776_s24, 1  ;;  %s4776_s24 = sphi %s4832_s24, %s17_s24  }
   0x2   : > { %p237_p1 = scmp.lt.s32.totalorder %s4776_s24, 3 }
   0x4   : > { %p238_p2 = pnand %p4474_p0, %p237_p1 }
   0x6   : > { %241 = sbr.rel (%p238_p2) target bundleno = 1909 (0x775), region = 48 }
   0xb   : > { %p269_p3 = scmp.lt.s32.totalorder %s4470_s25, 1  ;;  %s4778_s30 = smov 4   ;;  %vm312_vm0 = vcmask 31744   ;;  %vm505_vm1 = vcmask 64544   ;;  %vm698_vm2 = vcmask 97344   ;;  %vm892_vm3 = vcmask 130144  }
   0xc   : > { %s4779_s8 = smov 8   ;;  %s4780_s9 = smov 12   ;;  %vm1085_vm4 = vcmask 162944   ;;  %vm1278_vm5 = vcmask 195744   ;;  %vm1472_vm6 = vcmask 228544   ;;  %vm1665_vm7 = vcmask 261344  }
   0xd   : > { %s7800_s25 = smov (!%p269_p3, %s4470_s25), 1  ;;  %s4781_s10 = smov 16   ;;  %vm2012_vm8 = vcmask 1041408   ;;  %vm1858_vm9 = vcmask 294144   ;;  %vm1963_vm10 = vcmask 293888   ;;  %vm2205_vm11 = vcmask 64512  }
   0xe   : > { %s4743_s26 = smul.u32 432, %s7800_s25  ;;  %s4782_s11 = smov 20   ;;  %vm2214_vm12 = vcmask 57344   ;;  %vm2208_vm13 = vcmask 58368  }
   0xf   : > { %s4783_s12 = smov 24   ;;  %s4784_s13 = smov 28  }
  0x10   : > { %s4846_s29 = scalar_lea.vmem %s7548_s0, %s4743_s26  ;;  %s4785_s14 = smov 32  }
  0x11   : > { %v345_v0 = vld [vmem:[%s4846_s29 + $0x1] sm:$0xff]  ;;  %v4850_v1 = vld [vmem:[%s4846_s29 + $0x19] sm:$0xff]  ;;  %v4856_v2 = vld [vmem:[%s4846_s29 + $0x31] sm:$0xff]  ;;  %s4787_s27 = smov 40   ;;  %s4788_s28 = smov 48  }
  0x12   : > { %409 = vrot.lane.b32.xlu0 %v345_v0, %s4778_s30  ;;  %413 = vrot.lane.b32.xlu1 %v4850_v1, %s4778_s30  ;;  %v346_v3 = vld [vmem:[%s4846_s29 + $0x9] sm:$0xff]  ;;  %v4862_v4 = vld [vmem:[%s4846_s29 + $0x21] sm:$0xff]  ;;  %s4791_s18 = smov 120   ;;  %s4728_s23 = sshll.u32 %s7800_s25, 8 }
  0x13   : > { %417 = vrot.lane.b32.xlu2 %v4856_v2, %s4778_s30  ;;  %v4865_v5 = vld [vmem:[%s4846_s29 + $0x39] sm:$0xff]  ;;  %v4873_v6 = vld [vmem:[%s4846_s29 + $0x49] sm:$0xff]  ;;  %v4876_v7 = vld [vmem:[%s4846_s29 + $0x51] sm:$0xff] }
  0x14   : > { %v4879_v8 = vld [vmem:[%s4846_s29 + $0x61] sm:$0xff]  ;;  %v4888_v9 = vld [vmem:[%s4846_s29 + $0x69] sm:$0xff]  ;;  %v4891_v10 = vld [vmem:[%s4846_s29 + $0x79] sm:$0xff] }
  0x15   : > { %v4894_v11 = vld [vmem:[%s4846_s29 + $0x81] sm:$0xff]  ;;  %v4903_v12 = vld [vmem:[%s4846_s29 + $0x91] sm:$0xff]  ;;  %v4906_v13 = vld [vmem:[%s4846_s29 + $0x99] sm:$0xff] }
  0x16   : > { %v4909_v14 = vld [vmem:[%s4846_s29 + $0xa9] sm:$0xff]  ;;  %v4918_v15 = vld [vmem:[%s4846_s29 + $0xb1] sm:$0xff]  ;;  %v4921_v16 = vld [vmem:[%s4846_s29 + $0xc1] sm:$0xff] }
  0x17   : > { %v4924_v17 = vld [vmem:[%s4846_s29 + $0xc9] sm:$0xff]  ;;  %v4933_v18 = vld [vmem:[%s4846_s29 + $0xd9] sm:$0xff]  ;;  %v4936_v19 = vld [vmem:[%s4846_s29 + $0xe1] sm:$0xff] }
  0x18   : > { %v4939_v20 = vld [vmem:[%s4846_s29 + $0xf1] sm:$0xff]  ;;  %v4948_v21 = vld [vmem:[%s4846_s29 + $0xf9] sm:$0xff]  ;;  %v4951_v22 = vld [vmem:[%s4846_s29 + $0x109] sm:$0xff] }
  0x19   : > { %v4954_v23 = vld [vmem:[%s4846_s29 + $0x111] sm:$0xff]  ;;  %v4963_v24 = vld [vmem:[%s4846_s29 + $0x121] sm:$0xff]  ;;  %v4966_v25 = vld [vmem:[%s4846_s29 + $0x129] sm:$0xff] }
  0x1a   : > { %411 = vrot.lane.b32.xlu0 %v346_v3, %s4778_s30  ;;  %415 = vrot.lane.b32.xlu1 %v4862_v4, %s4778_s30  ;;  %v4969_v26 = vld [vmem:[%s4846_s29 + $0x139] sm:$0xff]  ;;  %v4978_v27 = vld [vmem:[%s4846_s29 + $0x141] sm:$0xff] }
  0x1b   : > { %419 = vrot.lane.b32.xlu2 %v4865_v5, %s4778_s30  ;;  %v4981_v28 = vld [vmem:[%s4846_s29 + $0x151] sm:$0xff]  ;;  %v4984_v29 = vld [vmem:[%s4846_s29 + $0x159] sm:$0xff]  ;;  %v4993_v30 = vld [vmem:[%s4846_s29 + $0x169] sm:$0xff] }
  0x1c   : > { %v4996_v31 = vld [vmem:[%s4846_s29 + $0x171] sm:$0xff]  ;;  %v538_v32 = vld [vmem:[%s4846_s29 + $0x2] sm:$0xff]  ;;  %v5008_v35 = vld [vmem:[%s4846_s29 + $0x1a] sm:$0xff] }
  0x1d   : > { %v280_v33 = vld [vmem:[%s4846_s29] sm:$0xff]  ;;  %v539_v34 = vld [vmem:[%s4846_s29 + $0xa] sm:$0xff]  ;;  %v5026_v40 = vld [vmem:[%s4846_s29 + $0x32] sm:$0xff] }
  0x1e   : > { %313 = vst.msk [vmem:[#allocation2] sm:$0xff] %vm312_vm0, %v280_v33  ;;  %v5011_v36 = vld [vmem:[%s4846_s29 + $0x22] sm:$0xff]  ;;  %v5017_v37 = vld [vmem:[%s4846_s29 + $0x30] sm:$0xff]  ;;  %v5029_v41 = vld [vmem:[%s4846_s29 + $0x3a] sm:$0xff] }
  0x1f   : > { %7637 = vst [vmem:[#allocation5_spill] sm:$0xff] %v5011_v36  ;;  %v281_v38 = vld [vmem:[%s4846_s29 + $0x8] sm:$0xff]  ;;  %v5040_v43 = vld [vmem:[%s4846_s29 + $0x38] sm:$0xff]  ;;  %v5071_v50 = vld [vmem:[%s4846_s29 + $0x60] sm:$0xff] }
  0x20   : > { %317 = vst.msk [vmem:[#allocation2 + $0x20] sm:$0xff] %vm312_vm0, %v5017_v37  ;;  %v5033_v42 = vld [vmem:[%s4846_s29 + $0x4a] sm:$0xff]  ;;  %v5043_v44 = vld [vmem:[%s4846_s29 + $0x18] sm:$0xff]  ;;  %v5060_v48 = vld [vmem:[%s4846_s29 + $0x62] sm:$0xff] }
  0x21   : > { %314 = vst.msk [vmem:[#allocation2 + $0x8] sm:$0xff] %vm312_vm0, %v281_v38  ;;  %v5048_v45 = vld [vmem:[%s4846_s29 + $0x48] sm:$0xff]  ;;  %v5057_v47 = vld [vmem:[%s4846_s29 + $0x52] sm:$0xff]  ;;  %v5074_v51 = vld [vmem:[%s4846_s29 + $0x20] sm:$0xff] }
  0x22   : > { %421 = vrot.lane.b32.xlu0 %v4873_v6, %s4778_s30  ;;  %423 = vrot.lane.b32.xlu1 %v4876_v7, %s4778_s30  ;;  %7638 = vst [vmem:[#allocation6_spill] sm:$0xff] %v5026_v40  ;;  %v5064_v49 = vld [vmem:[%s4846_s29 + $0x6a] sm:$0xff]  ;;  %v5088_v54 = vld [vmem:[%s4846_s29 + $0x7a] sm:$0xff] }
  0x23   : > { %425 = vrot.lane.b32.xlu2 %v4879_v8, %s4778_s30  ;;  %7639 = vst [vmem:[#allocation7_spill] sm:$0xff] %v5029_v41  ;;  %v5079_v52 = vld [vmem:[%s4846_s29 + $0x68] sm:$0xff]  ;;  %v5095_v56 = vld [vmem:[%s4846_s29 + $0x92] sm:$0xff]  ;;  %v5102_v57 = vld [vmem:[%s4846_s29 + $0x80] sm:$0xff] }
  0x24   : > { %7640 = vst [vmem:[#allocation8_spill] sm:$0xff] %v5033_v42  ;;  %v5091_v55 = vld [vmem:[%s4846_s29 + $0x82] sm:$0xff]  ;;  %v5105_v58 = vld [vmem:[%s4846_s29 + $0x50] sm:$0xff]  ;;  %v5119_v63 = vld [vmem:[%s4846_s29 + $0x9a] sm:$0xff] }
  0x25   : > { %318 = vst.msk [vmem:[#allocation2 + $0x28] sm:$0xff] %vm312_vm0, %v5040_v43  ;;  %v5115_v61 = vld [vmem:[%s4846_s29 + $0x90] sm:$0xff]  ;;  %v5138_v33 = vld [vmem:[%s4846_s29 + $0x78] sm:$0xff] }
  0x26   : > { %315 = vst.msk [vmem:[#allocation2 + $0x10] sm:$0xff] %vm312_vm0, %v5043_v44  ;;  %v5122_v0 = vld [vmem:[%s4846_s29 + $0xaa] sm:$0xff]  ;;  %v5128_v3 = vld [vmem:[%s4846_s29 + $0xb2] sm:$0xff] }
  0x27   : > { %319 = vst.msk [vmem:[#allocation2 + $0x30] sm:$0xff] %vm312_vm0, %v5048_v45 }
  0x28   : > { %7641 = vst [vmem:[#allocation9_spill] sm:$0xff] %v5057_v47 }
  0x29   : > { %7642 = vst [vmem:[#allocation10_spill] sm:$0xff] %v5060_v48 }
  0x2a   : > { %427 = vrot.lane.b32.xlu0 %v4888_v9, %s4778_s30  ;;  %429 = vrot.lane.b32.xlu1 %v4891_v10, %s4778_s30  ;;  %7643 = vst [vmem:[#allocation11_spill] sm:$0xff] %v5064_v49 }
  0x2b   : > { %431 = vrot.lane.b32.xlu2 %v4894_v11, %s4778_s30  ;;  %321 = vst.msk [vmem:[#allocation2 + $0x40] sm:$0xff] %vm312_vm0, %v5071_v50 }
  0x2c   : > { %316 = vst.msk [vmem:[#allocation2 + $0x18] sm:$0xff] %vm312_vm0, %v5074_v51 }
  0x2d   : > { %322 = vst.msk [vmem:[#allocation2 + $0x48] sm:$0xff] %vm312_vm0, %v5079_v52 }
  0x2e   : > { %7644 = vst [vmem:[#allocation12_spill] sm:$0xff] %v5088_v54 }
  0x2f   : > { %7645 = vst [vmem:[#allocation13_spill] sm:$0xff] %v5091_v55 }
  0x30   : > { %7646 = vst [vmem:[#allocation14_spill] sm:$0xff] %v5095_v56 }
  0x31   : > { %324 = vst.msk [vmem:[#allocation2 + $0x58] sm:$0xff] %vm312_vm0, %v5102_v57 }
  0x32   : > { %433 = vrot.lane.b32.xlu0 %v4903_v12, %s4778_s30  ;;  %435 = vrot.lane.b32.xlu1 %v4906_v13, %s4778_s30  ;;  %320 = vst.msk [vmem:[#allocation2 + $0x38] sm:$0xff] %vm312_vm0, %v5105_v58 }
  0x33   : > { %437 = vrot.lane.b32.xlu2 %v4909_v14, %s4778_s30  ;;  %7647 = vst [vmem:[#allocation15_spill] sm:$0xff] %v5119_v63 }
  0x34   : > { %7648 = vst [vmem:[#allocation16_spill] sm:$0xff] %v5122_v0 }
  0x35   : > { %325 = vst.msk [vmem:[#allocation2 + $0x60] sm:$0xff] %vm312_vm0, %v5115_v61 }
  0x36   : > { %7649 = vst [vmem:[#allocation17_spill] sm:$0xff] %v5128_v3 }
  0x37   : > { %323 = vst.msk [vmem:[#allocation2 + $0x50] sm:$0xff] %vm312_vm0, %v5138_v33 }
  0x3a   : > { %439 = vrot.lane.b32.xlu0 %v4918_v15, %s4778_s30  ;;  %441 = vrot.lane.b32.xlu1 %v4921_v16, %s4778_s30 }
  0x3b   : > { %443 = vrot.lane.b32.xlu2 %v4924_v17, %s4778_s30 }
  0x42   : > { %445 = vrot.lane.b32.xlu0 %v4933_v18, %s4778_s30  ;;  %447 = vrot.lane.b32.xlu1 %v4936_v19, %s4778_s30 }
  0x43   : > { %449 = vrot.lane.b32.xlu2 %v4939_v20, %s4778_s30 }
  0x4a   : > { %451 = vrot.lane.b32.xlu0 %v4948_v21, %s4778_s30  ;;  %453 = vrot.lane.b32.xlu1 %v4951_v22, %s4778_s30 }
  0x4b   : > { %455 = vrot.lane.b32.xlu2 %v4954_v23, %s4778_s30 }
  0x52   : > { %457 = vrot.lane.b32.xlu0 %v4963_v24, %s4778_s30  ;;  %459 = vrot.lane.b32.xlu1 %v4966_v25, %s4778_s30 }
  0x53   : > { %461 = vrot.lane.b32.xlu2 %v4969_v26, %s4778_s30 }
  0x5a   : > { %463 = vrot.lane.b32.xlu0 %v4978_v27, %s4778_s30  ;;  %465 = vrot.lane.b32.xlu1 %v4981_v28, %s4778_s30 }
  0x5b   : > { %467 = vrot.lane.b32.xlu2 %v4984_v29, %s4778_s30 }
  0x62   : > { %469 = vrot.lane.b32.xlu0 %v4993_v30, %s4778_s30  ;;  %471 = vrot.lane.b32.xlu1 %v4996_v31, %s4778_s30  ;;  %s4790_s30 = smov 64  }
  0x63   : > { %602 = vrot.lane.b32.xlu2 %v538_v32, %s4779_s8  ;;  %v5135_v32 = vld [vmem:[%s4846_s29 + $0xa8] sm:$0xff] }
  0x64   : > { %327 = vst.msk [vmem:[#allocation2 + $0x70] sm:$0xff] %vm312_vm0, %v5135_v32 }
  0x6a   : > { %604 = vrot.lane.b32.xlu0 %v539_v34, %s4779_s8  ;;  %606 = vrot.lane.b32.xlu1 %v5008_v35, %s4779_s8 }
  0x6b   : > { %608 = vrot.lane.b32.xlu2 %v5011_v36, %s4779_s8  ;;  %v5317_v36 = vld [vmem:[%s4846_s29 + $0x172] sm:$0xff] }
  0x6c   : > { %7665 = vst [vmem:[#allocation33_spill] sm:$0xff] %v5317_v36 }
  0x6d   : > { %v418_v39 = vpop.permute.xlu2 %417 }
  0x6e   : > { %510 = vst.msk [vmem:[#allocation2 + $0x20] sm:$0xff] %vm505_vm1, %v418_v39  ;;  %v5148_v39 = vld [vmem:[%s4846_s29 + $0xb0] sm:$0xff] }
  0x6f   : > { %328 = vst.msk [vmem:[#allocation2 + $0x78] sm:$0xff] %vm312_vm0, %v5148_v39 }
  0x72   : > { %610 = vrot.lane.b32.xlu0 %v5026_v40, %s4779_s8  ;;  %612 = vrot.lane.b32.xlu1 %v5029_v41, %s4779_s8  ;;  %v5287_v41 = vld [vmem:[%s4846_s29 + $0x15a] sm:$0xff] }
  0x73   : > { %614 = vrot.lane.b32.xlu2 %v5033_v42, %s4779_s8  ;;  %v5284_v42 = vld [vmem:[%s4846_s29 + $0x152] sm:$0xff]  ;;  %7663 = vst [vmem:[#allocation31_spill] sm:$0xff] %v5287_v41 }
  0x74   : > { %7662 = vst [vmem:[#allocation30_spill] sm:$0xff] %v5284_v42 }
  0x75   : > { %v420_v46 = vpop.permute.xlu2 %419 }
  0x76   : > { %511 = vst.msk [vmem:[#allocation2 + $0x28] sm:$0xff] %vm505_vm1, %v420_v46 }
  0x7a   : > { %616 = vrot.lane.b32.xlu0 %v5057_v47, %s4779_s8  ;;  %618 = vrot.lane.b32.xlu1 %v5060_v48, %s4779_s8  ;;  %v5254_v48 = vld [vmem:[%s4846_s29 + $0x13a] sm:$0xff] }
  0x7b   : > { %620 = vrot.lane.b32.xlu2 %v5064_v49, %s4779_s8  ;;  %v5251_v49 = vld [vmem:[%s4846_s29 + $0x12a] sm:$0xff]  ;;  %7660 = vst [vmem:[#allocation28_spill] sm:$0xff] %v5254_v48 }
  0x7c   : > { %7659 = vst [vmem:[#allocation27_spill] sm:$0xff] %v5251_v49 }
  0x7d   : > { %v426_v53 = vpop.permute.xlu2 %425 }
  0x7e   : > { %514 = vst.msk [vmem:[#allocation2 + $0x40] sm:$0xff] %vm505_vm1, %v426_v53  ;;  %v5152_v53 = vld [vmem:[%s4846_s29 + $0xc2] sm:$0xff] }
  0x7f   : > { %7650 = vst [vmem:[#allocation18_spill] sm:$0xff] %v5152_v53 }
  0x82   : > { %622 = vrot.lane.b32.xlu0 %v5088_v54, %s4779_s8  ;;  %624 = vrot.lane.b32.xlu1 %v5091_v55, %s4779_s8  ;;  %v5221_v55 = vld [vmem:[%s4846_s29 + $0x112] sm:$0xff] }
  0x83   : > { %626 = vrot.lane.b32.xlu2 %v5095_v56, %s4779_s8  ;;  %v5218_v56 = vld [vmem:[%s4846_s29 + $0x10a] sm:$0xff]  ;;  %7657 = vst [vmem:[#allocation25_spill] sm:$0xff] %v5221_v55 }
  0x84   : > { %v410_v59 = vpop.permute.xlu0 %409  ;;  %v414_v60 = vpop.permute.xlu1 %413  ;;  %7656 = vst [vmem:[#allocation24_spill] sm:$0xff] %v5218_v56 }
  0x85   : > { %506 = vst.msk [vmem:[#allocation2] sm:$0xff] %vm505_vm1, %v410_v59  ;;  %v432_v62 = vpop.permute.xlu2 %431  ;;  %v5155_v59 = vld [vmem:[%s4846_s29 + $0xca] sm:$0xff] }
  0x86   : > { %508 = vst.msk [vmem:[#allocation2 + $0x10] sm:$0xff] %vm505_vm1, %v414_v60  ;;  %v5161_v60 = vld [vmem:[%s4846_s29 + $0xda] sm:$0xff] }
  0x87   : > { %517 = vst.msk [vmem:[#allocation2 + $0x58] sm:$0xff] %vm505_vm1, %v432_v62  ;;  %v5168_v62 = vld [vmem:[%s4846_s29 + $0xc8] sm:$0xff] }
  0x88   : > { %7651 = vst [vmem:[#allocation19_spill] sm:$0xff] %v5155_v59 }
  0x89   : > { %7652 = vst [vmem:[#allocation20_spill] sm:$0xff] %v5161_v60 }
  0x8a   : > { %628 = vrot.lane.b32.xlu0 %v5119_v63, %s4779_s8  ;;  %630 = vrot.lane.b32.xlu1 %v5122_v0, %s4779_s8  ;;  %330 = vst.msk [vmem:[#allocation2 + $0x88] sm:$0xff] %vm312_vm0, %v5168_v62  ;;  %v5188_v0 = vld [vmem:[%s4846_s29 + $0xf2] sm:$0xff] }
  0x8b   : > { %632 = vrot.lane.b32.xlu2 %v5128_v3, %s4779_s8  ;;  %v5185_v3 = vld [vmem:[%s4846_s29 + $0xe2] sm:$0xff]  ;;  %7654 = vst [vmem:[#allocation22_spill] sm:$0xff] %v5188_v0 }
  0x8c   : > { %v412_v34 = vpop.permute.xlu0 %411  ;;  %v416_v38 = vpop.permute.xlu1 %415  ;;  %7653 = vst [vmem:[#allocation21_spill] sm:$0xff] %v5185_v3 }
  0x8d   : > { %507 = vst.msk [vmem:[#allocation2 + $0x8] sm:$0xff] %vm505_vm1, %v412_v34  ;;  %v438_v46 = vpop.permute.xlu2 %437  ;;  %v5171_v34 = vld [vmem:[%s4846_s29 + $0x98] sm:$0xff] }
  0x8e   : > { %509 = vst.msk [vmem:[#allocation2 + $0x18] sm:$0xff] %vm505_vm1, %v416_v38 }
  0x8f   : > { %520 = vst.msk [vmem:[#allocation2 + $0x70] sm:$0xff] %vm505_vm1, %v438_v46 }
  0x90   : > { %326 = vst.msk [vmem:[#allocation2 + $0x68] sm:$0xff] %vm312_vm0, %v5171_v34 }
  0x92   : > { %634 = vrot.lane.b32.xlu0 %v5152_v53, %s4779_s8  ;;  %636 = vrot.lane.b32.xlu1 %v5155_v59, %s4779_s8  ;;  %v5181_v59 = vld [vmem:[%s4846_s29 + $0xd8] sm:$0xff] }
  0x93   : > { %638 = vrot.lane.b32.xlu2 %v5161_v60, %s4779_s8  ;;  %331 = vst.msk [vmem:[#allocation2 + $0x90] sm:$0xff] %vm312_vm0, %v5181_v59  ;;  %v5194_v60 = vld [vmem:[%s4846_s29 + $0xfa] sm:$0xff] }
  0x94   : > { %v422_v38 = vpop.permute.xlu0 %421  ;;  %v424_v46 = vpop.permute.xlu1 %423  ;;  %7655 = vst [vmem:[#allocation23_spill] sm:$0xff] %v5194_v60 }
  0x95   : > { %512 = vst.msk [vmem:[#allocation2 + $0x30] sm:$0xff] %vm505_vm1, %v422_v38  ;;  %v444_v53 = vpop.permute.xlu2 %443  ;;  %v5201_v38 = vld [vmem:[%s4846_s29 + $0xf0] sm:$0xff] }
  0x96   : > { %513 = vst.msk [vmem:[#allocation2 + $0x38] sm:$0xff] %vm505_vm1, %v424_v46  ;;  %v5204_v46 = vld [vmem:[%s4846_s29 + $0xc0] sm:$0xff] }
  0x97   : > { %523 = vst.msk [vmem:[#allocation2 + $0x88] sm:$0xff] %vm505_vm1, %v444_v53 }
  0x98   : > { %333 = vst.msk [vmem:[#allocation2 + $0xa0] sm:$0xff] %vm312_vm0, %v5201_v38 }
  0x99   : > { %329 = vst.msk [vmem:[#allocation2 + $0x80] sm:$0xff] %vm312_vm0, %v5204_v46 }
  0x9a   : > { %640 = vrot.lane.b32.xlu0 %v5185_v3, %s4779_s8  ;;  %642 = vrot.lane.b32.xlu1 %v5188_v0, %s4779_s8  ;;  %v5214_v0 = vld [vmem:[%s4846_s29 + $0xf8] sm:$0xff] }
  0x9b   : > { %644 = vrot.lane.b32.xlu2 %v5194_v60, %s4779_s8  ;;  %334 = vst.msk [vmem:[#allocation2 + $0xa8] sm:$0xff] %vm312_vm0, %v5214_v0  ;;  %v5227_v60 = vld [vmem:[%s4846_s29 + $0x122] sm:$0xff] }
  0x9c   : > { %v428_v53 = vpop.permute.xlu0 %427  ;;  %v430_v63 = vpop.permute.xlu1 %429  ;;  %7658 = vst [vmem:[#allocation26_spill] sm:$0xff] %v5227_v60 }
  0x9d   : > { %515 = vst.msk [vmem:[#allocation2 + $0x48] sm:$0xff] %vm505_vm1, %v428_v53  ;;  %v450_v3 = vpop.permute.xlu2 %449  ;;  %v5237_v53 = vld [vmem:[%s4846_s29 + $0xe0] sm:$0xff] }
  0x9e   : > { %516 = vst.msk [vmem:[#allocation2 + $0x50] sm:$0xff] %vm505_vm1, %v430_v63  ;;  %v5234_v63 = vld [vmem:[%s4846_s29 + $0x110] sm:$0xff] }
  0x9f   : > { %526 = vst.msk [vmem:[#allocation2 + $0xa0] sm:$0xff] %vm505_vm1, %v450_v3 }
  0xa0   : > { %336 = vst.msk [vmem:[#allocation2 + $0xb8] sm:$0xff] %vm312_vm0, %v5234_v63 }
  0xa1   : > { %332 = vst.msk [vmem:[#allocation2 + $0x98] sm:$0xff] %vm312_vm0, %v5237_v53 }
  0xa2   : > { %646 = vrot.lane.b32.xlu0 %v5218_v56, %s4779_s8  ;;  %648 = vrot.lane.b32.xlu1 %v5221_v55, %s4779_s8  ;;  %v5247_v55 = vld [vmem:[%s4846_s29 + $0x120] sm:$0xff] }
  0xa3   : > { %650 = vrot.lane.b32.xlu2 %v5227_v60, %s4779_s8  ;;  %337 = vst.msk [vmem:[#allocation2 + $0xc0] sm:$0xff] %vm312_vm0, %v5247_v55  ;;  %v5260_v60 = vld [vmem:[%s4846_s29 + $0x142] sm:$0xff] }
  0xa4   : > { %v434_v3 = vpop.permute.xlu0 %433  ;;  %v436_v54 = vpop.permute.xlu1 %435  ;;  %7661 = vst [vmem:[#allocation29_spill] sm:$0xff] %v5260_v60 }
  0xa5   : > { %518 = vst.msk [vmem:[#allocation2 + $0x60] sm:$0xff] %vm505_vm1, %v434_v3  ;;  %v456_v56 = vpop.permute.xlu2 %455  ;;  %v5270_v3 = vld [vmem:[%s4846_s29 + $0x108] sm:$0xff] }
  0xa6   : > { %519 = vst.msk [vmem:[#allocation2 + $0x68] sm:$0xff] %vm505_vm1, %v436_v54  ;;  %v5267_v54 = vld [vmem:[%s4846_s29 + $0x138] sm:$0xff] }
  0xa7   : > { %529 = vst.msk [vmem:[#allocation2 + $0xb8] sm:$0xff] %vm505_vm1, %v456_v56 }
  0xa8   : > { %339 = vst.msk [vmem:[#allocation2 + $0xd0] sm:$0xff] %vm312_vm0, %v5267_v54 }
  0xa9   : > { %335 = vst.msk [vmem:[#allocation2 + $0xb0] sm:$0xff] %vm312_vm0, %v5270_v3 }
  0xaa   : > { %652 = vrot.lane.b32.xlu0 %v5251_v49, %s4779_s8  ;;  %654 = vrot.lane.b32.xlu1 %v5254_v48, %s4779_s8  ;;  %v5280_v48 = vld [vmem:[%s4846_s29 + $0x140] sm:$0xff] }
  0xab   : > { %656 = vrot.lane.b32.xlu2 %v5260_v60, %s4779_s8  ;;  %340 = vst.msk [vmem:[#allocation2 + $0xd8] sm:$0xff] %vm312_vm0, %v5280_v48  ;;  %v5293_v60 = vld [vmem:[%s4846_s29 + $0x16a] sm:$0xff] }
  0xac   : > { %v440_v56 = vpop.permute.xlu0 %439  ;;  %v442_v47 = vpop.permute.xlu1 %441  ;;  %7664 = vst [vmem:[#allocation32_spill] sm:$0xff] %v5293_v60 }
  0xad   : > { %521 = vst.msk [vmem:[#allocation2 + $0x78] sm:$0xff] %vm505_vm1, %v440_v56  ;;  %v462_v49 = vpop.permute.xlu2 %461  ;;  %v5303_v56 = vld [vmem:[%s4846_s29 + $0x128] sm:$0xff] }
  0xae   : > { %522 = vst.msk [vmem:[#allocation2 + $0x80] sm:$0xff] %vm505_vm1, %v442_v47  ;;  %v5300_v47 = vld [vmem:[%s4846_s29 + $0x158] sm:$0xff] }
  0xaf   : > { %532 = vst.msk [vmem:[#allocation2 + $0xd0] sm:$0xff] %vm505_vm1, %v462_v49 }
  0xb0   : > { %342 = vst.msk [vmem:[#allocation2 + $0xe8] sm:$0xff] %vm312_vm0, %v5300_v47 }
  0xb1   : > { %338 = vst.msk [vmem:[#allocation2 + $0xc8] sm:$0xff] %vm312_vm0, %v5303_v56 }
  0xb2   : > { %658 = vrot.lane.b32.xlu0 %v5284_v42, %s4779_s8  ;;  %660 = vrot.lane.b32.xlu1 %v5287_v41, %s4779_s8  ;;  %v5313_v42 = vld [vmem:[%s4846_s29 + $0x168] sm:$0xff] }
  0xb3   : > { %662 = vrot.lane.b32.xlu2 %v5293_v60, %s4779_s8  ;;  %343 = vst.msk [vmem:[#allocation2 + $0xf0] sm:$0xff] %vm312_vm0, %v5313_v42 }
  0xb4   : > { %v446_v49 = vpop.permute.xlu0 %445  ;;  %v448_v40 = vpop.permute.xlu1 %447 }
  0xb5   : > { %524 = vst.msk [vmem:[#allocation2 + $0x90] sm:$0xff] %vm505_vm1, %v446_v49  ;;  %v468_v41 = vpop.permute.xlu2 %467  ;;  %v5327_v49 = vld [vmem:[%s4846_s29 + $0x150] sm:$0xff] }
  0xb6   : > { %525 = vst.msk [vmem:[#allocation2 + $0x98] sm:$0xff] %vm505_vm1, %v448_v40 }
  0xb7   : > { %535 = vst.msk [vmem:[#allocation2 + $0xe8] sm:$0xff] %vm505_vm1, %v468_v41 }
  0xb8   : > { %341 = vst.msk [vmem:[#allocation2 + $0xe0] sm:$0xff] %vm312_vm0, %v5327_v49 }
  0xba   : > { %664 = vrot.lane.b32.xlu0 %v5317_v36, %s4779_s8  ;;  %796 = vrot.lane.b32.xlu1 %v5043_v44, %s4780_s9  ;;  %v5341_v44 = vld [vmem:[%s4846_s29 + $0x170] sm:$0xff] }
  0xbb   : > { %798 = vrot.lane.b32.xlu2 %v5074_v51, %s4780_s9  ;;  %344 = vst.msk [vmem:[#allocation2 + $0xf8] sm:$0xff] %vm312_vm0, %v5341_v44 }
  0xbc   : > { %v452_v40 = vpop.permute.xlu0 %451  ;;  %v454_v60 = vpop.permute.xlu1 %453 }
  0xbd   : > { %527 = vst.msk [vmem:[#allocation2 + $0xa8] sm:$0xff] %vm505_vm1, %v452_v40  ;;  %v603_v41 = vpop.permute.xlu2 %602 }
  0xbe   : > { %528 = vst.msk [vmem:[#allocation2 + $0xb0] sm:$0xff] %vm505_vm1, %v454_v60 }
  0xbf   : > { %699 = vst.msk [vmem:[#allocation2] sm:$0xff] %vm698_vm2, %v603_v41 }
  0xc2   : > { %800 = vrot.lane.b32.xlu0 %v5017_v37, %s4780_s9  ;;  %802 = vrot.lane.b32.xlu1 %v5040_v43, %s4780_s9 }
  0xc3   : > { %804 = vrot.lane.b32.xlu2 %v5048_v45, %s4780_s9 }
  0xc4   : > { %v458_v51 = vpop.permute.xlu0 %457  ;;  %v460_v36 = vpop.permute.xlu1 %459 }
  0xc5   : > { %530 = vst.msk [vmem:[#allocation2 + $0xc0] sm:$0xff] %vm505_vm1, %v458_v51  ;;  %v609_v60 = vpop.permute.xlu2 %608 }
  0xc6   : > { %531 = vst.msk [vmem:[#allocation2 + $0xc8] sm:$0xff] %vm505_vm1, %v460_v36 }
  0xc7   : > { %702 = vst.msk [vmem:[#allocation2 + $0x18] sm:$0xff] %vm698_vm2, %v609_v60 }
  0xca   : > { %806 = vrot.lane.b32.xlu0 %v5105_v58, %s4780_s9  ;;  %808 = vrot.lane.b32.xlu1 %v5071_v50, %s4780_s9 }
  0xcb   : > { %810 = vrot.lane.b32.xlu2 %v5079_v52, %s4780_s9 }
  0xcc   : > { %v464_v37 = vpop.permute.xlu0 %463  ;;  %v466_v43 = vpop.permute.xlu1 %465 }
  0xcd   : > { %533 = vst.msk [vmem:[#allocation2 + $0xd8] sm:$0xff] %vm505_vm1, %v464_v37  ;;  %v615_v40 = vpop.permute.xlu2 %614 }
  0xce   : > { %534 = vst.msk [vmem:[#allocation2 + $0xe0] sm:$0xff] %vm505_vm1, %v466_v43 }
  0xcf   : > { %705 = vst.msk [vmem:[#allocation2 + $0x30] sm:$0xff] %vm698_vm2, %v615_v40 }
  0xd2   : > { %812 = vrot.lane.b32.xlu0 %v5138_v33, %s4780_s9  ;;  %814 = vrot.lane.b32.xlu1 %v5102_v57, %s4780_s9 }
  0xd3   : > { %816 = vrot.lane.b32.xlu2 %v5115_v61, %s4780_s9 }
  0xd4   : > { %v470_v36 = vpop.permute.xlu0 %469  ;;  %v472_v50 = vpop.permute.xlu1 %471 }
  0xd5   : > { %536 = vst.msk [vmem:[#allocation2 + $0xf0] sm:$0xff] %vm505_vm1, %v470_v36  ;;  %v621_v41 = vpop.permute.xlu2 %620 }
  0xd6   : > { %537 = vst.msk [vmem:[#allocation2 + $0xf8] sm:$0xff] %vm505_vm1, %v472_v50 }
  0xd7   : > { %708 = vst.msk [vmem:[#allocation2 + $0x48] sm:$0xff] %vm698_vm2, %v621_v41 }
  0xda   : > { %818 = vrot.lane.b32.xlu0 %v5171_v34, %s4780_s9  ;;  %820 = vrot.lane.b32.xlu1 %v5135_v32, %s4780_s9 }
  0xdb   : > { %822 = vrot.lane.b32.xlu2 %v5148_v39, %s4780_s9 }
  0xdc   : > { %v605_v51 = vpop.permute.xlu0 %604  ;;  %v607_v57 = vpop.permute.xlu1 %606 }
  0xdd   : > { %700 = vst.msk [vmem:[#allocation2 + $0x8] sm:$0xff] %vm698_vm2, %v605_v51  ;;  %v627_v60 = vpop.permute.xlu2 %626 }
  0xde   : > { %701 = vst.msk [vmem:[#allocation2 + $0x10] sm:$0xff] %vm698_vm2, %v607_v57 }
  0xdf   : > { %711 = vst.msk [vmem:[#allocation2 + $0x60] sm:$0xff] %vm698_vm2, %v627_v60 }
  0xe2   : > { %824 = vrot.lane.b32.xlu0 %v5204_v46, %s4780_s9  ;;  %826 = vrot.lane.b32.xlu1 %v5168_v62, %s4780_s9 }
  0xe3   : > { %828 = vrot.lane.b32.xlu2 %v5181_v59, %s4780_s9 }
  0xe4   : > { %v611_v37 = vpop.permute.xlu0 %610  ;;  %v613_v32 = vpop.permute.xlu1 %612 }
  0xe5   : > { %703 = vst.msk [vmem:[#allocation2 + $0x20] sm:$0xff] %vm698_vm2, %v611_v37  ;;  %v633_v43 = vpop.permute.xlu2 %632 }
  0xe6   : > { %704 = vst.msk [vmem:[#allocation2 + $0x28] sm:$0xff] %vm698_vm2, %v613_v32 }
  0xe7   : > { %714 = vst.msk [vmem:[#allocation2 + $0x78] sm:$0xff] %vm698_vm2, %v633_v43  ;;  %v5422_v43 = vld [vmem:[%s4846_s29 + $0x180] sm:$0xff] }
  0xea   : > { %830 = vrot.lane.b32.xlu0 %v5237_v53, %s4780_s9  ;;  %832 = vrot.lane.b32.xlu1 %v5201_v38, %s4780_s9 }
  0xeb   : > { %834 = vrot.lane.b32.xlu2 %v5214_v0, %s4780_s9 }
  0xec   : > { %v617_v40 = vpop.permute.xlu0 %616  ;;  %v619_v62 = vpop.permute.xlu1 %618 }
  0xed   : > { %706 = vst.msk [vmem:[#allocation2 + $0x38] sm:$0xff] %vm698_vm2, %v617_v40  ;;  %v639_v36 = vpop.permute.xlu2 %638  ;;  %v5426_v40 = vld [vmem:[%s4846_s29 + $0x188] sm:$0xff] }
  0xee   : > { %707 = vst.msk [vmem:[#allocation2 + $0x40] sm:$0xff] %vm698_vm2, %v619_v62 }
  0xef   : > { %717 = vst.msk [vmem:[#allocation2 + $0x90] sm:$0xff] %vm698_vm2, %v639_v36 }
  0xf2   : > { %836 = vrot.lane.b32.xlu0 %v5270_v3, %s4780_s9  ;;  %838 = vrot.lane.b32.xlu1 %v5234_v63, %s4780_s9 }
  0xf3   : > { %840 = vrot.lane.b32.xlu2 %v5247_v55, %s4780_s9 }
  0xf4   : > { %v623_v50 = vpop.permute.xlu0 %622  ;;  %v625_v38 = vpop.permute.xlu1 %624 }
  0xf5   : > { %709 = vst.msk [vmem:[#allocation2 + $0x50] sm:$0xff] %vm698_vm2, %v623_v50  ;;  %v645_v41 = vpop.permute.xlu2 %644 }
  0xf6   : > { %710 = vst.msk [vmem:[#allocation2 + $0x58] sm:$0xff] %vm698_vm2, %v625_v38 }
  0xf7   : > { %720 = vst.msk [vmem:[#allocation2 + $0xa8] sm:$0xff] %vm698_vm2, %v645_v41 }
  0xfa   : > { %842 = vrot.lane.b32.xlu0 %v5303_v56, %s4780_s9  ;;  %844 = vrot.lane.b32.xlu1 %v5267_v54, %s4780_s9 }
  0xfb   : > { %846 = vrot.lane.b32.xlu2 %v5280_v48, %s4780_s9 }
  0xfc   : > { %v629_v63 = vpop.permute.xlu0 %628  ;;  %v631_v51 = vpop.permute.xlu1 %630 }
  0xfd   : > { %712 = vst.msk [vmem:[#allocation2 + $0x68] sm:$0xff] %vm698_vm2, %v629_v63  ;;  %v651_v57 = vpop.permute.xlu2 %650 }
  0xfe   : > { %713 = vst.msk [vmem:[#allocation2 + $0x70] sm:$0xff] %vm698_vm2, %v631_v51  ;;  %v5527_v51 = vld [vmem:[%s4846_s29 + $0x181] sm:$0xff] }
  0xff   : > { %723 = vst.msk [vmem:[#allocation2 + $0xc0] sm:$0xff] %vm698_vm2, %v651_v57  ;;  %v5530_v57 = vld [vmem:[%s4846_s29 + $0x189] sm:$0xff] }
 0x102   : > { %848 = vrot.lane.b32.xlu0 %v5327_v49, %s4780_s9  ;;  %850 = vrot.lane.b32.xlu1 %v5300_v47, %s4780_s9 }
 0x103   : > { %852 = vrot.lane.b32.xlu2 %v5313_v42, %s4780_s9 }
 0x104   : > { %v635_v60 = vpop.permute.xlu0 %634  ;;  %v637_v37 = vpop.permute.xlu1 %636 }
 0x105   : > { %715 = vst.msk [vmem:[#allocation2 + $0x80] sm:$0xff] %vm698_vm2, %v635_v60  ;;  %v657_v32 = vpop.permute.xlu2 %656  ;;  %v7666_v60 = vld [vmem:[#allocation5_spill] sm:$0xff] }
 0x106   : > { %716 = vst.msk [vmem:[#allocation2 + $0x88] sm:$0xff] %vm698_vm2, %v637_v37  ;;  %v7667_v37 = vld [vmem:[#allocation6_spill] sm:$0xff] }
 0x107   : > { %726 = vst.msk [vmem:[#allocation2 + $0xd8] sm:$0xff] %vm698_vm2, %v657_v32 }
 0x10a   : > { %854 = vrot.lane.b32.xlu0 %v5341_v44, %s4780_s9  ;;  %856 = vrot.lane.b32.xlu1 %v5422_v43, %s4780_s9 }
 0x10b   : > { %858 = vrot.lane.b32.xlu2 %v5426_v40, %s4780_s9 }
 0x10c   : > { %v641_v62 = vpop.permute.xlu0 %640  ;;  %v643_v36 = vpop.permute.xlu1 %642 }
 0x10d   : > { %718 = vst.msk [vmem:[#allocation2 + $0x98] sm:$0xff] %vm698_vm2, %v641_v62  ;;  %v663_v50 = vpop.permute.xlu2 %662 }
 0x10e   : > { %719 = vst.msk [vmem:[#allocation2 + $0xa0] sm:$0xff] %vm698_vm2, %v643_v36  ;;  %v7668_v36 = vld [vmem:[#allocation7_spill] sm:$0xff] }
 0x10f   : > { %729 = vst.msk [vmem:[#allocation2 + $0xf0] sm:$0xff] %vm698_vm2, %v663_v50  ;;  %v7669_v50 = vld [vmem:[#allocation8_spill] sm:$0xff] }
 0x112   : > { %989 = vrot.lane.b32.xlu0 %v4850_v1, %s4781_s10  ;;  %991 = vrot.lane.b32.xlu1 %v4862_v4, %s4781_s10 }
 0x113   : > { %993 = vrot.lane.b32.xlu2 %v4856_v2, %s4781_s10 }
 0x114   : > { %v647_v38 = vpop.permute.xlu0 %646  ;;  %v649_v41 = vpop.permute.xlu1 %648 }
 0x115   : > { %721 = vst.msk [vmem:[#allocation2 + $0xb0] sm:$0xff] %vm698_vm2, %v647_v38  ;;  %v799_v63 = vpop.permute.xlu2 %798  ;;  %v7670_v38 = vld [vmem:[#allocation9_spill] sm:$0xff] }
 0x116   : > { %722 = vst.msk [vmem:[#allocation2 + $0xb8] sm:$0xff] %vm698_vm2, %v649_v41 }
 0x117   : > { %894 = vst.msk [vmem:[#allocation2 + $0x8] sm:$0xff] %vm892_vm3, %v799_v63 }
 0x11a   : > { %995 = vrot.lane.b32.xlu0 %v4865_v5, %s4781_s10  ;;  %997 = vrot.lane.b32.xlu1 %v4873_v6, %s4781_s10 }
 0x11b   : > { %999 = vrot.lane.b32.xlu2 %v4876_v7, %s4781_s10 }
 0x11c   : > { %v653_v1 = vpop.permute.xlu0 %652  ;;  %v655_v4 = vpop.permute.xlu1 %654 }
 0x11d   : > { %724 = vst.msk [vmem:[#allocation2 + $0xc8] sm:$0xff] %vm698_vm2, %v653_v1  ;;  %v805_v2 = vpop.permute.xlu2 %804  ;;  %v7671_v1 = vld [vmem:[#allocation10_spill] sm:$0xff] }
 0x11e   : > { %725 = vst.msk [vmem:[#allocation2 + $0xd0] sm:$0xff] %vm698_vm2, %v655_v4 }
 0x11f   : > { %897 = vst.msk [vmem:[#allocation2 + $0x20] sm:$0xff] %vm892_vm3, %v805_v2  ;;  %v7672_v2 = vld [vmem:[#allocation11_spill] sm:$0xff] }
 0x122   : > { %1001 = vrot.lane.b32.xlu0 %v4879_v8, %s4781_s10  ;;  %1003 = vrot.lane.b32.xlu1 %v4888_v9, %s4781_s10 }
 0x123   : > { %1005 = vrot.lane.b32.xlu2 %v4891_v10, %s4781_s10 }
 0x124   : > { %v659_v5 = vpop.permute.xlu0 %658  ;;  %v661_v6 = vpop.permute.xlu1 %660 }
 0x125   : > { %727 = vst.msk [vmem:[#allocation2 + $0xe0] sm:$0xff] %vm698_vm2, %v659_v5  ;;  %v811_v7 = vpop.permute.xlu2 %810  ;;  %v7673_v5 = vld [vmem:[#allocation12_spill] sm:$0xff] }
 0x126   : > { %728 = vst.msk [vmem:[#allocation2 + $0xe8] sm:$0xff] %vm698_vm2, %v661_v6 }
 0x127   : > { %900 = vst.msk [vmem:[#allocation2 + $0x38] sm:$0xff] %vm892_vm3, %v811_v7 }
 0x12a   : > { %1007 = vrot.lane.b32.xlu0 %v4894_v11, %s4781_s10  ;;  %1009 = vrot.lane.b32.xlu1 %v4903_v12, %s4781_s10 }
 0x12b   : > { %1011 = vrot.lane.b32.xlu2 %v4906_v13, %s4781_s10 }
 0x12c   : > { %v665_v8 = vpop.permute.xlu0 %664  ;;  %v797_v9 = vpop.permute.xlu1 %796 }
 0x12d   : > { %730 = vst.msk [vmem:[#allocation2 + $0xf8] sm:$0xff] %vm698_vm2, %v665_v8  ;;  %v817_v10 = vpop.permute.xlu2 %816  ;;  %v7674_v8 = vld [vmem:[#allocation13_spill] sm:$0xff] }
 0x12e   : > { %893 = vst.msk [vmem:[#allocation2] sm:$0xff] %vm892_vm3, %v797_v9 }
 0x12f   : > { %903 = vst.msk [vmem:[#allocation2 + $0x50] sm:$0xff] %vm892_vm3, %v817_v10  ;;  %v7675_v10 = vld [vmem:[#allocation14_spill] sm:$0xff] }
 0x132   : > { %1013 = vrot.lane.b32.xlu0 %v4909_v14, %s4781_s10  ;;  %1015 = vrot.lane.b32.xlu1 %v4918_v15, %s4781_s10 }
 0x133   : > { %1017 = vrot.lane.b32.xlu2 %v4921_v16, %s4781_s10 }
 0x134   : > { %v801_v11 = vpop.permute.xlu0 %800  ;;  %v803_v12 = vpop.permute.xlu1 %802 }
 0x135   : > { %895 = vst.msk [vmem:[#allocation2 + $0x10] sm:$0xff] %vm892_vm3, %v801_v11  ;;  %v823_v13 = vpop.permute.xlu2 %822  ;;  %v7676_v11 = vld [vmem:[#allocation15_spill] sm:$0xff] }
 0x136   : > { %896 = vst.msk [vmem:[#allocation2 + $0x18] sm:$0xff] %vm892_vm3, %v803_v12 }
 0x137   : > { %906 = vst.msk [vmem:[#allocation2 + $0x68] sm:$0xff] %vm892_vm3, %v823_v13 }
 0x13a   : > { %1019 = vrot.lane.b32.xlu0 %v4924_v17, %s4781_s10  ;;  %1021 = vrot.lane.b32.xlu1 %v4933_v18, %s4781_s10 }
 0x13b   : > { %1023 = vrot.lane.b32.xlu2 %v4936_v19, %s4781_s10 }
 0x13c   : > { %v807_v14 = vpop.permute.xlu0 %806  ;;  %v809_v15 = vpop.permute.xlu1 %808 }
 0x13d   : > { %898 = vst.msk [vmem:[#allocation2 + $0x28] sm:$0xff] %vm892_vm3, %v807_v14  ;;  %v829_v16 = vpop.permute.xlu2 %828  ;;  %v7677_v14 = vld [vmem:[#allocation16_spill] sm:$0xff] }
 0x13e   : > { %899 = vst.msk [vmem:[#allocation2 + $0x30] sm:$0xff] %vm892_vm3, %v809_v15 }
 0x13f   : > { %909 = vst.msk [vmem:[#allocation2 + $0x80] sm:$0xff] %vm892_vm3, %v829_v16  ;;  %v7678_v16 = vld [vmem:[#allocation17_spill] sm:$0xff] }
 0x142   : > { %1025 = vrot.lane.b32.xlu0 %v4939_v20, %s4781_s10  ;;  %1027 = vrot.lane.b32.xlu1 %v4948_v21, %s4781_s10 }
 0x143   : > { %1029 = vrot.lane.b32.xlu2 %v4951_v22, %s4781_s10 }
 0x144   : > { %v813_v17 = vpop.permute.xlu0 %812  ;;  %v815_v18 = vpop.permute.xlu1 %814 }
 0x145   : > { %901 = vst.msk [vmem:[#allocation2 + $0x40] sm:$0xff] %vm892_vm3, %v813_v17  ;;  %v835_v19 = vpop.permute.xlu2 %834  ;;  %v7679_v17 = vld [vmem:[#allocation18_spill] sm:$0xff] }
 0x146   : > { %902 = vst.msk [vmem:[#allocation2 + $0x48] sm:$0xff] %vm892_vm3, %v815_v18 }
 0x147   : > { %912 = vst.msk [vmem:[#allocation2 + $0x98] sm:$0xff] %vm892_vm3, %v835_v19 }
 0x14a   : > { %1031 = vrot.lane.b32.xlu0 %v4954_v23, %s4781_s10  ;;  %1033 = vrot.lane.b32.xlu1 %v4963_v24, %s4781_s10 }
 0x14b   : > { %1035 = vrot.lane.b32.xlu2 %v4966_v25, %s4781_s10 }
 0x14c   : > { %v819_v20 = vpop.permute.xlu0 %818  ;;  %v821_v21 = vpop.permute.xlu1 %820 }
 0x14d   : > { %904 = vst.msk [vmem:[#allocation2 + $0x58] sm:$0xff] %vm892_vm3, %v819_v20  ;;  %v841_v22 = vpop.permute.xlu2 %840  ;;  %v7680_v20 = vld [vmem:[#allocation19_spill] sm:$0xff] }
 0x14e   : > { %905 = vst.msk [vmem:[#allocation2 + $0x60] sm:$0xff] %vm892_vm3, %v821_v21 }
 0x14f   : > { %915 = vst.msk [vmem:[#allocation2 + $0xb0] sm:$0xff] %vm892_vm3, %v841_v22  ;;  %v7681_v22 = vld [vmem:[#allocation20_spill] sm:$0xff] }
 0x152   : > { %1037 = vrot.lane.b32.xlu0 %v4969_v26, %s4781_s10  ;;  %1039 = vrot.lane.b32.xlu1 %v4978_v27, %s4781_s10 }
 0x153   : > { %1041 = vrot.lane.b32.xlu2 %v4981_v28, %s4781_s10 }
 0x154   : > { %v825_v23 = vpop.permute.xlu0 %824  ;;  %v827_v24 = vpop.permute.xlu1 %826 }
 0x155   : > { %907 = vst.msk [vmem:[#allocation2 + $0x70] sm:$0xff] %vm892_vm3, %v825_v23  ;;  %v847_v25 = vpop.permute.xlu2 %846  ;;  %v7682_v23 = vld [vmem:[#allocation21_spill] sm:$0xff] }
 0x156   : > { %908 = vst.msk [vmem:[#allocation2 + $0x78] sm:$0xff] %vm892_vm3, %v827_v24 }
 0x157   : > { %918 = vst.msk [vmem:[#allocation2 + $0xc8] sm:$0xff] %vm892_vm3, %v847_v25 }
 0x15a   : > { %1043 = vrot.lane.b32.xlu0 %v4984_v29, %s4781_s10  ;;  %1045 = vrot.lane.b32.xlu1 %v4993_v30, %s4781_s10 }
 0x15b   : > { %1047 = vrot.lane.b32.xlu2 %v4996_v31, %s4781_s10 }
 0x15c   : > { %v831_v26 = vpop.permute.xlu0 %830  ;;  %v833_v27 = vpop.permute.xlu1 %832 }
 0x15d   : > { %910 = vst.msk [vmem:[#allocation2 + $0x88] sm:$0xff] %vm892_vm3, %v831_v26  ;;  %v853_v28 = vpop.permute.xlu2 %852  ;;  %v7683_v26 = vld [vmem:[#allocation22_spill] sm:$0xff] }
 0x15e   : > { %911 = vst.msk [vmem:[#allocation2 + $0x90] sm:$0xff] %vm892_vm3, %v833_v27 }
 0x15f   : > { %921 = vst.msk [vmem:[#allocation2 + $0xe0] sm:$0xff] %vm892_vm3, %v853_v28  ;;  %v7684_v28 = vld [vmem:[#allocation23_spill] sm:$0xff] }
 0x162   : > { %1049 = vrot.lane.b32.xlu0 %v5527_v51, %s4781_s10  ;;  %1051 = vrot.lane.b32.xlu1 %v5530_v57, %s4781_s10 }
 0x163   : > { %1182 = vrot.lane.b32.xlu2 %v5008_v35, %s4782_s11 }
 0x164   : > { %v837_v29 = vpop.permute.xlu0 %836  ;;  %v839_v30 = vpop.permute.xlu1 %838 }
 0x165   : > { %913 = vst.msk [vmem:[#allocation2 + $0xa0] sm:$0xff] %vm892_vm3, %v837_v29  ;;  %v859_v31 = vpop.permute.xlu2 %858  ;;  %v7685_v29 = vld [vmem:[#allocation24_spill] sm:$0xff] }
 0x166   : > { %914 = vst.msk [vmem:[#allocation2 + $0xa8] sm:$0xff] %vm892_vm3, %v839_v30 }
 0x167   : > { %924 = vst.msk [vmem:[#allocation2 + $0xf8] sm:$0xff] %vm892_vm3, %v859_v31 }
 0x16a   : > { %1184 = vrot.lane.b32.xlu0 %v7666_v60, %s4782_s11  ;;  %1186 = vrot.lane.b32.xlu1 %v7667_v37, %s4782_s11  ;;  %v7686_v60 = vld [vmem:[#allocation25_spill] sm:$0xff] }
 0x16b   : > { %1188 = vrot.lane.b32.xlu2 %v7668_v36, %s4782_s11 }
 0x16c   : > { %v843_v32 = vpop.permute.xlu0 %842  ;;  %v845_v62 = vpop.permute.xlu1 %844 }
 0x16d   : > { %916 = vst.msk [vmem:[#allocation2 + $0xb8] sm:$0xff] %vm892_vm3, %v843_v32  ;;  %v994_v35 = vpop.permute.xlu2 %993  ;;  %v7687_v32 = vld [vmem:[#allocation26_spill] sm:$0xff] }
 0x16e   : > { %917 = vst.msk [vmem:[#allocation2 + $0xc0] sm:$0xff] %vm892_vm3, %v845_v62  ;;  %v7688_v62 = vld [vmem:[#allocation27_spill] sm:$0xff] }
 0x16f   : > { %1088 = vst.msk [vmem:[#allocation2 + $0x10] sm:$0xff] %vm1085_vm4, %v994_v35 }
 0x172   : > { %1190 = vrot.lane.b32.xlu0 %v7669_v50, %s4782_s11  ;;  %1192 = vrot.lane.b32.xlu1 %v7670_v38, %s4782_s11  ;;  %v7689_v50 = vld [vmem:[#allocation28_spill] sm:$0xff] }
 0x173   : > { %1194 = vrot.lane.b32.xlu2 %v7671_v1, %s4782_s11 }
 0x174   : > { %v849_v41 = vpop.permute.xlu0 %848  ;;  %v851_v63 = vpop.permute.xlu1 %850 }
 0x175   : > { %919 = vst.msk [vmem:[#allocation2 + $0xd0] sm:$0xff] %vm892_vm3, %v849_v41  ;;  %v1000_v4 = vpop.permute.xlu2 %999  ;;  %v7690_v41 = vld [vmem:[#allocation29_spill] sm:$0xff] }
 0x176   : > { %920 = vst.msk [vmem:[#allocation2 + $0xd8] sm:$0xff] %vm892_vm3, %v851_v63  ;;  %v7691_v63 = vld [vmem:[#allocation30_spill] sm:$0xff] }
 0x177   : > { %1091 = vst.msk [vmem:[#allocation2 + $0x28] sm:$0xff] %vm1085_vm4, %v1000_v4 }
 0x17a   : > { %1196 = vrot.lane.b32.xlu0 %v7672_v2, %s4782_s11  ;;  %1198 = vrot.lane.b32.xlu1 %v7673_v5, %s4782_s11  ;;  %v7692_v2 = vld [vmem:[#allocation31_spill] sm:$0xff] }
 0x17b   : > { %1200 = vrot.lane.b32.xlu2 %v7674_v8, %s4782_s11  ;;  %v7694_v8 = vld [vmem:[#allocation33_spill] sm:$0xff] }
 0x17c   : > { %v855_v6 = vpop.permute.xlu0 %854  ;;  %v857_v7 = vpop.permute.xlu1 %856 }
 0x17d   : > { %922 = vst.msk [vmem:[#allocation2 + $0xe8] sm:$0xff] %vm892_vm3, %v855_v6  ;;  %v1006_v9 = vpop.permute.xlu2 %1005  ;;  %v5624_v6 = vld [vmem:[%s4846_s29 + $0x182] sm:$0xff] }
 0x17e   : > { %923 = vst.msk [vmem:[#allocation2 + $0xf0] sm:$0xff] %vm892_vm3, %v857_v7  ;;  %v7693_v7 = vld [vmem:[#allocation32_spill] sm:$0xff] }
 0x17f   : > { %1094 = vst.msk [vmem:[#allocation2 + $0x40] sm:$0xff] %vm1085_vm4, %v1006_v9 }
 0x182   : > { %1202 = vrot.lane.b32.xlu0 %v7675_v10, %s4782_s11  ;;  %1204 = vrot.lane.b32.xlu1 %v7676_v11, %s4782_s11 }
 0x183   : > { %1206 = vrot.lane.b32.xlu2 %v7677_v14, %s4782_s11  ;;  %v4575_v14 = vld [vmem:[%s4846_s29 + $0x38] sm:$0xff] }
 0x184   : > { %v990_v12 = vpop.permute.xlu0 %989  ;;  %v992_v13 = vpop.permute.xlu1 %991 }
 0x185   : > { %1086 = vst.msk [vmem:[#allocation2] sm:$0xff] %vm1085_vm4, %v990_v12  ;;  %v1012_v15 = vpop.permute.xlu2 %1011  ;;  %v5635_v12 = vld [vmem:[%s4846_s29 + $0x18a] sm:$0xff] }
 0x186   : > { %1087 = vst.msk [vmem:[#allocation2 + $0x8] sm:$0xff] %vm1085_vm4, %v992_v13  ;;  %v4574_v13 = vld [vmem:[%s4846_s29 + $0x30] sm:$0xff] }
 0x187   : > { %1097 = vst.msk [vmem:[#allocation2 + $0x58] sm:$0xff] %vm1085_vm4, %v1012_v15 }
 0x18a   : > { %1208 = vrot.lane.b32.xlu0 %v7678_v16, %s4782_s11  ;;  %1210 = vrot.lane.b32.xlu1 %v7679_v17, %s4782_s11 }
 0x18b   : > { %1212 = vrot.lane.b32.xlu2 %v7680_v20, %s4782_s11 }
 0x18c   : > { %v996_v18 = vpop.permute.xlu0 %995  ;;  %v998_v19 = vpop.permute.xlu1 %997 }
 0x18d   : > { %1089 = vst.msk [vmem:[#allocation2 + $0x18] sm:$0xff] %vm1085_vm4, %v996_v18  ;;  %v1018_v21 = vpop.permute.xlu2 %1017  ;;  %v4578_v18 = vld [vmem:[%s4846_s29 + $0x60] sm:$0xff] }
 0x18e   : > { %1090 = vst.msk [vmem:[#allocation2 + $0x20] sm:$0xff] %vm1085_vm4, %v998_v19 }
 0x18f   : > { %1100 = vst.msk [vmem:[#allocation2 + $0x70] sm:$0xff] %vm1085_vm4, %v1018_v21 }
 0x192   : > { %1214 = vrot.lane.b32.xlu0 %v7681_v22, %s4782_s11  ;;  %1216 = vrot.lane.b32.xlu1 %v7682_v23, %s4782_s11  ;;  %v4581_v22 = vld [vmem:[%s4846_s29 + $0x80] sm:$0xff] }
 0x193   : > { %1218 = vrot.lane.b32.xlu2 %v7683_v26, %s4782_s11  ;;  %v4587_v26 = vld [vmem:[%s4846_s29 + $0xc8] sm:$0xff] }
 0x194   : > { %v1002_v24 = vpop.permute.xlu0 %1001  ;;  %v1004_v25 = vpop.permute.xlu1 %1003 }
 0x195   : > { %1092 = vst.msk [vmem:[#allocation2 + $0x30] sm:$0xff] %vm1085_vm4, %v1002_v24  ;;  %v1024_v27 = vpop.permute.xlu2 %1023  ;;  %v4584_v24 = vld [vmem:[%s4846_s29 + $0xa8] sm:$0xff] }
 0x196   : > { %1093 = vst.msk [vmem:[#allocation2 + $0x38] sm:$0xff] %vm1085_vm4, %v1004_v25 }
 0x197   : > { %1103 = vst.msk [vmem:[#allocation2 + $0x88] sm:$0xff] %vm1085_vm4, %v1024_v27 }
 0x19a   : > { %1220 = vrot.lane.b32.xlu0 %v7684_v28, %s4782_s11  ;;  %1222 = vrot.lane.b32.xlu1 %v7685_v29, %s4782_s11  ;;  %v4590_v28 = vld [vmem:[%s4846_s29 + $0xf0] sm:$0xff] }
 0x19b   : > { %1224 = vrot.lane.b32.xlu2 %v7686_v60, %s4782_s11 }
 0x19c   : > { %v1008_v30 = vpop.permute.xlu0 %1007  ;;  %v1010_v31 = vpop.permute.xlu1 %1009 }
 0x19d   : > { %1095 = vst.msk [vmem:[#allocation2 + $0x48] sm:$0xff] %vm1085_vm4, %v1008_v30  ;;  %v1030_v37 = vpop.permute.xlu2 %1029  ;;  %v4593_v30 = vld [vmem:[%s4846_s29 + $0x110] sm:$0xff] }
 0x19e   : > { %1096 = vst.msk [vmem:[#allocation2 + $0x50] sm:$0xff] %vm1085_vm4, %v1010_v31 }
 0x19f   : > { %1106 = vst.msk [vmem:[#allocation2 + $0xa0] sm:$0xff] %vm1085_vm4, %v1030_v37  ;;  %v4604_v37 = vld [vmem:[%s4846_s29 + $0x198] sm:$0xff] }
 0x1a2   : > { %1226 = vrot.lane.b32.xlu0 %v7687_v32, %s4782_s11  ;;  %1228 = vrot.lane.b32.xlu1 %v7688_v62, %s4782_s11  ;;  %v4606_v62 = vld [vmem:[%s4846_s29 + $0x31] sm:$0xff] }
 0x1a3   : > { %1230 = vrot.lane.b32.xlu2 %v7689_v50, %s4782_s11 }
 0x1a4   : > { %v1014_v36 = vpop.permute.xlu0 %1013  ;;  %v1016_v35 = vpop.permute.xlu1 %1015 }
 0x1a5   : > { %1098 = vst.msk [vmem:[#allocation2 + $0x60] sm:$0xff] %vm1085_vm4, %v1014_v36  ;;  %v1036_v38 = vpop.permute.xlu2 %1035  ;;  %v4607_v36 = vld [vmem:[%s4846_s29 + $0x39] sm:$0xff] }
 0x1a6   : > { %1099 = vst.msk [vmem:[#allocation2 + $0x68] sm:$0xff] %vm1085_vm4, %v1016_v35  ;;  %v4608_v35 = vld [vmem:[%s4846_s29 + $0x49] sm:$0xff] }
 0x1a7   : > { %1109 = vst.msk [vmem:[#allocation2 + $0xb8] sm:$0xff] %vm1085_vm4, %v1036_v38 }
 0x1aa   : > { %1232 = vrot.lane.b32.xlu0 %v7690_v41, %s4782_s11  ;;  %1234 = vrot.lane.b32.xlu1 %v7691_v63, %s4782_s11  ;;  %v4609_v41 = vld [vmem:[%s4846_s29 + $0x51] sm:$0xff]  ;;  %v4610_v63 = vld [vmem:[%s4846_s29 + $0x61] sm:$0xff] }
 0x1ab   : > { %1236 = vrot.lane.b32.xlu2 %v7692_v2, %s4782_s11 }
 0x1ac   : > { %v1020_v1 = vpop.permute.xlu0 %1019  ;;  %v1022_v4 = vpop.permute.xlu1 %1021 }
 0x1ad   : > { %1101 = vst.msk [vmem:[#allocation2 + $0x78] sm:$0xff] %vm1085_vm4, %v1020_v1  ;;  %v1042_v5 = vpop.permute.xlu2 %1041  ;;  %v4611_v1 = vld [vmem:[%s4846_s29 + $0x69] sm:$0xff] }
 0x1ae   : > { %1102 = vst.msk [vmem:[#allocation2 + $0x80] sm:$0xff] %vm1085_vm4, %v1022_v4 }
 0x1af   : > { %1112 = vst.msk [vmem:[#allocation2 + $0xd0] sm:$0xff] %vm1085_vm4, %v1042_v5 }
 0x1b2   : > { %1238 = vrot.lane.b32.xlu0 %v7693_v7, %s4782_s11  ;;  %1240 = vrot.lane.b32.xlu1 %v7694_v8, %s4782_s11  ;;  %v4612_v7 = vld [vmem:[%s4846_s29 + $0x79] sm:$0xff]  ;;  %v4613_v8 = vld [vmem:[%s4846_s29 + $0x81] sm:$0xff] }
 0x1b3   : > { %1242 = vrot.lane.b32.xlu2 %v5624_v6, %s4782_s11 }
 0x1b4   : > { %v1026_v9 = vpop.permute.xlu0 %1025  ;;  %v1028_v10 = vpop.permute.xlu1 %1027 }
 0x1b5   : > { %1104 = vst.msk [vmem:[#allocation2 + $0x90] sm:$0xff] %vm1085_vm4, %v1026_v9  ;;  %v1048_v11 = vpop.permute.xlu2 %1047  ;;  %v4614_v9 = vld [vmem:[%s4846_s29 + $0x91] sm:$0xff] }
 0x1b6   : > { %1105 = vst.msk [vmem:[#allocation2 + $0x98] sm:$0xff] %vm1085_vm4, %v1028_v10 }
 0x1b7   : > { %1115 = vst.msk [vmem:[#allocation2 + $0xe8] sm:$0xff] %vm1085_vm4, %v1048_v11 }
 0x1ba   : > { %1244 = vrot.lane.b32.xlu0 %v5635_v12, %s4782_s11  ;;  %1376 = vrot.lane.b32.xlu1 %v4574_v13, %s4783_s12 }
 0x1bb   : > { %1378 = vrot.lane.b32.xlu2 %v4575_v14, %s4783_s12  ;;  %v4615_v14 = vld [vmem:[%s4846_s29 + $0x99] sm:$0xff] }
 0x1bc   : > { %v1032_v15 = vpop.permute.xlu0 %1031  ;;  %v1034_v16 = vpop.permute.xlu1 %1033 }
 0x1bd   : > { %1107 = vst.msk [vmem:[#allocation2 + $0xa8] sm:$0xff] %vm1085_vm4, %v1032_v15  ;;  %v1183_v17 = vpop.permute.xlu2 %1182  ;;  %v4616_v15 = vld [vmem:[%s4846_s29 + $0xa9] sm:$0xff] }
 0x1be   : > { %1108 = vst.msk [vmem:[#allocation2 + $0xb0] sm:$0xff] %vm1085_vm4, %v1034_v16  ;;  %v4617_v16 = vld [vmem:[%s4846_s29 + $0xb1] sm:$0xff] }
 0x1bf   : > { %1279 = vst.msk [vmem:[#allocation2] sm:$0xff] %vm1278_vm5, %v1183_v17 }
 0x1c2   : > { %1380 = vrot.lane.b32.xlu0 %v5048_v45, %s4783_s12  ;;  %1382 = vrot.lane.b32.xlu1 %v5105_v58, %s4783_s12 }
 0x1c3   : > { %1384 = vrot.lane.b32.xlu2 %v4578_v18, %s4783_s12 }
 0x1c4   : > { %v1038_v19 = vpop.permute.xlu0 %1037  ;;  %v1040_v20 = vpop.permute.xlu1 %1039 }
 0x1c5   : > { %1110 = vst.msk [vmem:[#allocation2 + $0xc0] sm:$0xff] %vm1085_vm4, %v1038_v19  ;;  %v1189_v21 = vpop.permute.xlu2 %1188 }
 0x1c6   : > { %1111 = vst.msk [vmem:[#allocation2 + $0xc8] sm:$0xff] %vm1085_vm4, %v1040_v20  ;;  %v4618_v20 = vld [vmem:[%s4846_s29 + $0xc1] sm:$0xff] }
 0x1c7   : > { %1282 = vst.msk [vmem:[#allocation2 + $0x18] sm:$0xff] %vm1278_vm5, %v1189_v21  ;;  %v4619_v21 = vld [vmem:[%s4846_s29 + $0xc9] sm:$0xff] }
 0x1ca   : > { %1386 = vrot.lane.b32.xlu0 %v5079_v52, %s4783_s12  ;;  %1388 = vrot.lane.b32.xlu1 %v5138_v33, %s4783_s12 }
 0x1cb   : > { %1390 = vrot.lane.b32.xlu2 %v4581_v22, %s4783_s12  ;;  %v4620_v22 = vld [vmem:[%s4846_s29 + $0xd9] sm:$0xff] }
 0x1cc   : > { %v1044_v45 = vpop.permute.xlu0 %1043  ;;  %v1046_v58 = vpop.permute.xlu1 %1045 }
 0x1cd   : > { %1113 = vst.msk [vmem:[#allocation2 + $0xd8] sm:$0xff] %vm1085_vm4, %v1044_v45  ;;  %v1195_v23 = vpop.permute.xlu2 %1194 }
 0x1ce   : > { %1114 = vst.msk [vmem:[#allocation2 + $0xe0] sm:$0xff] %vm1085_vm4, %v1046_v58 }
 0x1cf   : > { %1285 = vst.msk [vmem:[#allocation2 + $0x30] sm:$0xff] %vm1278_vm5, %v1195_v23 }
 0x1d2   : > { %1392 = vrot.lane.b32.xlu0 %v5115_v61, %s4783_s12  ;;  %1394 = vrot.lane.b32.xlu1 %v5171_v34, %s4783_s12 }
 0x1d3   : > { %1396 = vrot.lane.b32.xlu2 %v4584_v24, %s4783_s12  ;;  %v4621_v24 = vld [vmem:[%s4846_s29 + $0xe1] sm:$0xff] }
 0x1d4   : > { %v1050_v52 = vpop.permute.xlu0 %1049  ;;  %v1052_v33 = vpop.permute.xlu1 %1051 }
 0x1d5   : > { %1116 = vst.msk [vmem:[#allocation2 + $0xf0] sm:$0xff] %vm1085_vm4, %v1050_v52  ;;  %v1201_v25 = vpop.permute.xlu2 %1200  ;;  %v4622_v52 = vld [vmem:[%s4846_s29 + $0xf1] sm:$0xff] }
 0x1d6   : > { %1117 = vst.msk [vmem:[#allocation2 + $0xf8] sm:$0xff] %vm1085_vm4, %v1052_v33  ;;  %v4623_v33 = vld [vmem:[%s4846_s29 + $0xf9] sm:$0xff] }
 0x1d7   : > { %1288 = vst.msk [vmem:[#allocation2 + $0x48] sm:$0xff] %vm1278_vm5, %v1201_v25 }
 0x1da   : > { %1398 = vrot.lane.b32.xlu0 %v5148_v39, %s4783_s12  ;;  %1400 = vrot.lane.b32.xlu1 %v5204_v46, %s4783_s12 }
 0x1db   : > { %1402 = vrot.lane.b32.xlu2 %v4587_v26, %s4783_s12 }
 0x1dc   : > { %v1185_v61 = vpop.permute.xlu0 %1184  ;;  %v1187_v34 = vpop.permute.xlu1 %1186 }
 0x1dd   : > { %1280 = vst.msk [vmem:[#allocation2 + $0x8] sm:$0xff] %vm1278_vm5, %v1185_v61  ;;  %v1207_v27 = vpop.permute.xlu2 %1206 }
 0x1de   : > { %1281 = vst.msk [vmem:[#allocation2 + $0x10] sm:$0xff] %vm1278_vm5, %v1187_v34  ;;  %v4624_v34 = vld [vmem:[%s4846_s29 + $0x109] sm:$0xff] }
 0x1df   : > { %1291 = vst.msk [vmem:[#allocation2 + $0x60] sm:$0xff] %vm1278_vm5, %v1207_v27  ;;  %v4625_v27 = vld [vmem:[%s4846_s29 + $0x111] sm:$0xff] }
 0x1e2   : > { %1404 = vrot.lane.b32.xlu0 %v5181_v59, %s4783_s12  ;;  %1406 = vrot.lane.b32.xlu1 %v5237_v53, %s4783_s12 }
 0x1e3   : > { %1408 = vrot.lane.b32.xlu2 %v4590_v28, %s4783_s12  ;;  %v4626_v28 = vld [vmem:[%s4846_s29 + $0x121] sm:$0xff] }
 0x1e4   : > { %v1191_v39 = vpop.permute.xlu0 %1190  ;;  %v1193_v46 = vpop.permute.xlu1 %1192 }
 0x1e5   : > { %1283 = vst.msk [vmem:[#allocation2 + $0x20] sm:$0xff] %vm1278_vm5, %v1191_v39  ;;  %v1213_v29 = vpop.permute.xlu2 %1212 }
 0x1e6   : > { %1284 = vst.msk [vmem:[#allocation2 + $0x28] sm:$0xff] %vm1278_vm5, %v1193_v46 }
 0x1e7   : > { %1294 = vst.msk [vmem:[#allocation2 + $0x78] sm:$0xff] %vm1278_vm5, %v1213_v29 }
 0x1ea   : > { %1410 = vrot.lane.b32.xlu0 %v5214_v0, %s4783_s12  ;;  %1412 = vrot.lane.b32.xlu1 %v5270_v3, %s4783_s12 }
 0x1eb   : > { %1414 = vrot.lane.b32.xlu2 %v4593_v30, %s4783_s12  ;;  %v4627_v30 = vld [vmem:[%s4846_s29 + $0x129] sm:$0xff] }
 0x1ec   : > { %v1197_v59 = vpop.permute.xlu0 %1196  ;;  %v1199_v53 = vpop.permute.xlu1 %1198 }
 0x1ed   : > { %1286 = vst.msk [vmem:[#allocation2 + $0x38] sm:$0xff] %vm1278_vm5, %v1197_v59  ;;  %v1219_v31 = vpop.permute.xlu2 %1218  ;;  %v4628_v59 = vld [vmem:[%s4846_s29 + $0x139] sm:$0xff] }
 0x1ee   : > { %1287 = vst.msk [vmem:[#allocation2 + $0x40] sm:$0xff] %vm1278_vm5, %v1199_v53  ;;  %v4629_v53 = vld [vmem:[%s4846_s29 + $0x141] sm:$0xff] }
 0x1ef   : > { %1297 = vst.msk [vmem:[#allocation2 + $0x90] sm:$0xff] %vm1278_vm5, %v1219_v31 }
 0x1f2   : > { %1416 = vrot.lane.b32.xlu0 %v5247_v55, %s4783_s12  ;;  %1418 = vrot.lane.b32.xlu1 %v5303_v56, %s4783_s12 }
 0x1f3   : > { %1420 = vrot.lane.b32.xlu2 %v5267_v54, %s4783_s12 }
 0x1f4   : > { %v1203_v0 = vpop.permute.xlu0 %1202  ;;  %v1205_v60 = vpop.permute.xlu1 %1204 }
 0x1f5   : > { %1289 = vst.msk [vmem:[#allocation2 + $0x50] sm:$0xff] %vm1278_vm5, %v1203_v0  ;;  %v1225_v3 = vpop.permute.xlu2 %1224 }
 0x1f6   : > { %1290 = vst.msk [vmem:[#allocation2 + $0x58] sm:$0xff] %vm1278_vm5, %v1205_v60 }
 0x1f7   : > { %1300 = vst.msk [vmem:[#allocation2 + $0xa8] sm:$0xff] %vm1278_vm5, %v1225_v3  ;;  %v4630_v3 = vld [vmem:[%s4846_s29 + $0x151] sm:$0xff] }
 0x1fa   : > { %1422 = vrot.lane.b32.xlu0 %v5280_v48, %s4783_s12  ;;  %1424 = vrot.lane.b32.xlu1 %v5327_v49, %s4783_s12 }
 0x1fb   : > { %1426 = vrot.lane.b32.xlu2 %v5300_v47, %s4783_s12 }
 0x1fc   : > { %v1209_v55 = vpop.permute.xlu0 %1208  ;;  %v1211_v56 = vpop.permute.xlu1 %1210 }
 0x1fd   : > { %1292 = vst.msk [vmem:[#allocation2 + $0x68] sm:$0xff] %vm1278_vm5, %v1209_v55  ;;  %v1231_v54 = vpop.permute.xlu2 %1230  ;;  %v4631_v55 = vld [vmem:[%s4846_s29 + $0x159] sm:$0xff] }
 0x1fe   : > { %1293 = vst.msk [vmem:[#allocation2 + $0x70] sm:$0xff] %vm1278_vm5, %v1211_v56  ;;  %v4632_v56 = vld [vmem:[%s4846_s29 + $0x169] sm:$0xff] }
 0x1ff   : > { %1303 = vst.msk [vmem:[#allocation2 + $0xc0] sm:$0xff] %vm1278_vm5, %v1231_v54 }
 0x202   : > { %1428 = vrot.lane.b32.xlu0 %v5313_v42, %s4783_s12  ;;  %1430 = vrot.lane.b32.xlu1 %v5341_v44, %s4783_s12  ;;  %v4605_v42 = vld [vmem:[%s4846_s29 + $0x1a0] sm:$0xff] }
 0x203   : > { %1432 = vrot.lane.b32.xlu2 %v5422_v43, %s4783_s12 }
 0x204   : > { %v1215_v48 = vpop.permute.xlu0 %1214  ;;  %v1217_v49 = vpop.permute.xlu1 %1216 }
 0x205   : > { %1295 = vst.msk [vmem:[#allocation2 + $0x80] sm:$0xff] %vm1278_vm5, %v1215_v48  ;;  %v1237_v47 = vpop.permute.xlu2 %1236 }
 0x206   : > { %1296 = vst.msk [vmem:[#allocation2 + $0x88] sm:$0xff] %vm1278_vm5, %v1217_v49 }
 0x207   : > { %1306 = vst.msk [vmem:[#allocation2 + $0xd8] sm:$0xff] %vm1278_vm5, %v1237_v47  ;;  %v4633_v47 = vld [vmem:[%s4846_s29 + $0x171] sm:$0xff] }
 0x20a   : > { %1434 = vrot.lane.b32.xlu0 %v5426_v40, %s4783_s12  ;;  %1436 = vrot.lane.b32.xlu1 %v4604_v37, %s4783_s12 }
 0x20b   : > { %1438 = vrot.lane.b32.xlu2 %v4605_v42, %s4783_s12 }
 0x20c   : > { %v1221_v44 = vpop.permute.xlu0 %1220  ;;  %v1223_v32 = vpop.permute.xlu1 %1222 }
 0x20d   : > { %1298 = vst.msk [vmem:[#allocation2 + $0x98] sm:$0xff] %vm1278_vm5, %v1221_v44  ;;  %v1243_v43 = vpop.permute.xlu2 %1242 }
 0x20e   : > { %1299 = vst.msk [vmem:[#allocation2 + $0xa0] sm:$0xff] %vm1278_vm5, %v1223_v32  ;;  %v4636_v32 = vld [vmem:[%s4846_s29 + $0x199] sm:$0xff] }
 0x20f   : > { %1309 = vst.msk [vmem:[#allocation2 + $0xf0] sm:$0xff] %vm1278_vm5, %v1243_v43  ;;  %v4637_v43 = vld [vmem:[%s4846_s29 + $0x1a1] sm:$0xff] }
 0x212   : > { %1569 = vrot.lane.b32.xlu0 %v4606_v62, %s4784_s13  ;;  %1571 = vrot.lane.b32.xlu1 %v4607_v36, %s4784_s13  ;;  %v4638_v62 = vld [vmem:[%s4846_s29 + $0x32] sm:$0xff] }
 0x213   : > { %1573 = vrot.lane.b32.xlu2 %v4608_v35, %s4784_s13  ;;  %v4639_v35 = vld [vmem:[%s4846_s29 + $0x3a] sm:$0xff] }
 0x214   : > { %v1227_v40 = vpop.permute.xlu0 %1226  ;;  %v1229_v50 = vpop.permute.xlu1 %1228 }
 0x215   : > { %1301 = vst.msk [vmem:[#allocation2 + $0xb0] sm:$0xff] %vm1278_vm5, %v1227_v40  ;;  %v1379_v38 = vpop.permute.xlu2 %1378  ;;  %v4640_v40 = vld [vmem:[%s4846_s29 + $0x4a] sm:$0xff] }
 0x216   : > { %1302 = vst.msk [vmem:[#allocation2 + $0xb8] sm:$0xff] %vm1278_vm5, %v1229_v50 }
 0x217   : > { %1474 = vst.msk [vmem:[#allocation2 + $0x8] sm:$0xff] %vm1472_vm6, %v1379_v38 }
 0x21a   : > { %1575 = vrot.lane.b32.xlu0 %v4609_v41, %s4784_s13  ;;  %1577 = vrot.lane.b32.xlu1 %v4610_v63, %s4784_s13  ;;  %v4641_v41 = vld [vmem:[%s4846_s29 + $0x52] sm:$0xff] }
 0x21b   : > { %1579 = vrot.lane.b32.xlu2 %v4611_v1, %s4784_s13  ;;  %v4642_v1 = vld [vmem:[%s4846_s29 + $0x62] sm:$0xff] }
 0x21c   : > { %v1233_v4 = vpop.permute.xlu0 %1232  ;;  %v1235_v2 = vpop.permute.xlu1 %1234 }
 0x21d   : > { %1304 = vst.msk [vmem:[#allocation2 + $0xc8] sm:$0xff] %vm1278_vm5, %v1233_v4  ;;  %v1385_v5 = vpop.permute.xlu2 %1384  ;;  %v4643_v4 = vld [vmem:[%s4846_s29 + $0x6a] sm:$0xff] }
 0x21e   : > { %1305 = vst.msk [vmem:[#allocation2 + $0xd0] sm:$0xff] %vm1278_vm5, %v1235_v2 }
 0x21f   : > { %1477 = vst.msk [vmem:[#allocation2 + $0x20] sm:$0xff] %vm1472_vm6, %v1385_v5 }
 0x222   : > { %1581 = vrot.lane.b32.xlu0 %v4612_v7, %s4784_s13  ;;  %1583 = vrot.lane.b32.xlu1 %v4613_v8, %s4784_s13  ;;  %v4645_v8 = vld [vmem:[%s4846_s29 + $0x82] sm:$0xff] }
 0x223   : > { %1585 = vrot.lane.b32.xlu2 %v4614_v9, %s4784_s13  ;;  %v4646_v9 = vld [vmem:[%s4846_s29 + $0x92] sm:$0xff] }
 0x224   : > { %v1239_v10 = vpop.permute.xlu0 %1238  ;;  %v1241_v11 = vpop.permute.xlu1 %1240 }
 0x225   : > { %1307 = vst.msk [vmem:[#allocation2 + $0xe0] sm:$0xff] %vm1278_vm5, %v1239_v10  ;;  %v1391_v13 = vpop.permute.xlu2 %1390 }
 0x226   : > { %1308 = vst.msk [vmem:[#allocation2 + $0xe8] sm:$0xff] %vm1278_vm5, %v1241_v11 }
 0x227   : > { %1480 = vst.msk [vmem:[#allocation2 + $0x38] sm:$0xff] %vm1472_vm6, %v1391_v13  ;;  %v4644_v13 = vld [vmem:[%s4846_s29 + $0x7a] sm:$0xff] }
 0x22a   : > { %1587 = vrot.lane.b32.xlu0 %v4615_v14, %s4784_s13  ;;  %1589 = vrot.lane.b32.xlu1 %v4616_v15, %s4784_s13  ;;  %v4648_v15 = vld [vmem:[%s4846_s29 + $0xaa] sm:$0xff] }
 0x22b   : > { %1591 = vrot.lane.b32.xlu2 %v4617_v16, %s4784_s13  ;;  %v4649_v16 = vld [vmem:[%s4846_s29 + $0xb2] sm:$0xff] }
 0x22c   : > { %v1245_v17 = vpop.permute.xlu0 %1244  ;;  %v1377_v18 = vpop.permute.xlu1 %1376 }
 0x22d   : > { %1310 = vst.msk [vmem:[#allocation2 + $0xf8] sm:$0xff] %vm1278_vm5, %v1245_v17  ;;  %v1397_v19 = vpop.permute.xlu2 %1396 }
 0x22e   : > { %1473 = vst.msk [vmem:[#allocation2] sm:$0xff] %vm1472_vm6, %v1377_v18 }
 0x22f   : > { %1483 = vst.msk [vmem:[#allocation2 + $0x50] sm:$0xff] %vm1472_vm6, %v1397_v19  ;;  %v4647_v19 = vld [vmem:[%s4846_s29 + $0x9a] sm:$0xff] }
 0x232   : > { %1593 = vrot.lane.b32.xlu0 %v4618_v20, %s4784_s13  ;;  %1595 = vrot.lane.b32.xlu1 %v4619_v21, %s4784_s13  ;;  %v4651_v21 = vld [vmem:[%s4846_s29 + $0xca] sm:$0xff] }
 0x233   : > { %1597 = vrot.lane.b32.xlu2 %v4620_v22, %s4784_s13  ;;  %v4652_v22 = vld [vmem:[%s4846_s29 + $0xda] sm:$0xff] }
 0x234   : > { %v1381_v45 = vpop.permute.xlu0 %1380  ;;  %v1383_v58 = vpop.permute.xlu1 %1382 }
 0x235   : > { %1475 = vst.msk [vmem:[#allocation2 + $0x10] sm:$0xff] %vm1472_vm6, %v1381_v45  ;;  %v1403_v23 = vpop.permute.xlu2 %1402 }
 0x236   : > { %1476 = vst.msk [vmem:[#allocation2 + $0x18] sm:$0xff] %vm1472_vm6, %v1383_v58 }
 0x237   : > { %1486 = vst.msk [vmem:[#allocation2 + $0x68] sm:$0xff] %vm1472_vm6, %v1403_v23  ;;  %v4650_v23 = vld [vmem:[%s4846_s29 + $0xc2] sm:$0xff] }
 0x23a   : > { %1599 = vrot.lane.b32.xlu0 %v4621_v24, %s4784_s13  ;;  %1601 = vrot.lane.b32.xlu1 %v4622_v52, %s4784_s13  ;;  %v4654_v52 = vld [vmem:[%s4846_s29 + $0xf2] sm:$0xff] }
 0x23b   : > { %1603 = vrot.lane.b32.xlu2 %v4623_v33, %s4784_s13  ;;  %v4655_v33 = vld [vmem:[%s4846_s29 + $0xfa] sm:$0xff] }
 0x23c   : > { %v1387_v25 = vpop.permute.xlu0 %1386  ;;  %v1389_v26 = vpop.permute.xlu1 %1388 }
 0x23d   : > { %1478 = vst.msk [vmem:[#allocation2 + $0x28] sm:$0xff] %vm1472_vm6, %v1387_v25  ;;  %v1409_v61 = vpop.permute.xlu2 %1408 }
 0x23e   : > { %1479 = vst.msk [vmem:[#allocation2 + $0x30] sm:$0xff] %vm1472_vm6, %v1389_v26 }
 0x23f   : > { %1489 = vst.msk [vmem:[#allocation2 + $0x80] sm:$0xff] %vm1472_vm6, %v1409_v61  ;;  %v4653_v61 = vld [vmem:[%s4846_s29 + $0xe2] sm:$0xff] }
 0x242   : > { %1605 = vrot.lane.b32.xlu0 %v4624_v34, %s4784_s13  ;;  %1607 = vrot.lane.b32.xlu1 %v4625_v27, %s4784_s13  ;;  %v4657_v27 = vld [vmem:[%s4846_s29 + $0x112] sm:$0xff] }
 0x243   : > { %1609 = vrot.lane.b32.xlu2 %v4626_v28, %s4784_s13  ;;  %v4658_v28 = vld [vmem:[%s4846_s29 + $0x122] sm:$0xff] }
 0x244   : > { %v1393_v39 = vpop.permute.xlu0 %1392  ;;  %v1395_v46 = vpop.permute.xlu1 %1394 }
 0x245   : > { %1481 = vst.msk [vmem:[#allocation2 + $0x40] sm:$0xff] %vm1472_vm6, %v1393_v39  ;;  %v1415_v29 = vpop.permute.xlu2 %1414 }
 0x246   : > { %1482 = vst.msk [vmem:[#allocation2 + $0x48] sm:$0xff] %vm1472_vm6, %v1395_v46 }
 0x247   : > { %1492 = vst.msk [vmem:[#allocation2 + $0x98] sm:$0xff] %vm1472_vm6, %v1415_v29  ;;  %v4656_v29 = vld [vmem:[%s4846_s29 + $0x10a] sm:$0xff] }
 0x24a   : > { %1611 = vrot.lane.b32.xlu0 %v4627_v30, %s4784_s13  ;;  %1613 = vrot.lane.b32.xlu1 %v4628_v59, %s4784_s13 }
 0x24b   : > { %1615 = vrot.lane.b32.xlu2 %v4629_v53, %s4784_s13 }
 0x24c   : > { %v1399_v31 = vpop.permute.xlu0 %1398  ;;  %v1401_v0 = vpop.permute.xlu1 %1400 }
 0x24d   : > { %1484 = vst.msk [vmem:[#allocation2 + $0x58] sm:$0xff] %vm1472_vm6, %v1399_v31  ;;  %v1421_v60 = vpop.permute.xlu2 %1420  ;;  %v4661_v31 = vld [vmem:[%s4846_s29 + $0x142] sm:$0xff] }
 0x24e   : > { %1485 = vst.msk [vmem:[#allocation2 + $0x60] sm:$0xff] %vm1472_vm6, %v1401_v0  ;;  %v4660_v0 = vld [vmem:[%s4846_s29 + $0x13a] sm:$0xff] }
 0x24f   : > { %1495 = vst.msk [vmem:[#allocation2 + $0xb0] sm:$0xff] %vm1472_vm6, %v1421_v60 }
 0x252   : > { %1617 = vrot.lane.b32.xlu0 %v4630_v3, %s4784_s13  ;;  %1619 = vrot.lane.b32.xlu1 %v4631_v55, %s4784_s13 }
 0x253   : > { %1621 = vrot.lane.b32.xlu2 %v4632_v56, %s4784_s13  ;;  %v4659_v56 = vld [vmem:[%s4846_s29 + $0x12a] sm:$0xff] }
 0x254   : > { %v1405_v54 = vpop.permute.xlu0 %1404  ;;  %v1407_v48 = vpop.permute.xlu1 %1406 }
 0x255   : > { %1487 = vst.msk [vmem:[#allocation2 + $0x70] sm:$0xff] %vm1472_vm6, %v1405_v54  ;;  %v1427_v49 = vpop.permute.xlu2 %1426 }
 0x256   : > { %1488 = vst.msk [vmem:[#allocation2 + $0x78] sm:$0xff] %vm1472_vm6, %v1407_v48 }
 0x257   : > { %1498 = vst.msk [vmem:[#allocation2 + $0xc8] sm:$0xff] %vm1472_vm6, %v1427_v49 }
 0x25a   : > { %1623 = vrot.lane.b32.xlu0 %v4633_v47, %s4784_s13  ;;  %1625 = vrot.lane.b32.xlu1 %v5527_v51, %s4784_s13  ;;  %v4663_v47 = vld [vmem:[%s4846_s29 + $0x15a] sm:$0xff] }
 0x25b   : > { %1627 = vrot.lane.b32.xlu2 %v5530_v57, %s4784_s13 }
 0x25c   : > { %v1411_v37 = vpop.permute.xlu0 %1410  ;;  %v1413_v42 = vpop.permute.xlu1 %1412 }
 0x25d   : > { %1490 = vst.msk [vmem:[#allocation2 + $0x88] sm:$0xff] %vm1472_vm6, %v1411_v37  ;;  %v1433_v44 = vpop.permute.xlu2 %1432  ;;  %v1943_v37 = vld [vmem:[%s7549_s1 + $0x10] sm:$0x3] }
 0x25e   : > { %1491 = vst.msk [vmem:[#allocation2 + $0x90] sm:$0xff] %vm1472_vm6, %v1413_v42 }
 0x25f   : > { %1501 = vst.msk [vmem:[#allocation2 + $0xe0] sm:$0xff] %vm1472_vm6, %v1433_v44  ;;  %v1957_v44 = vunpack.c.l.b16 %v1943_v37 }
 0x262   : > { %1629 = vrot.lane.b32.xlu0 %v4636_v32, %s4784_s13  ;;  %1631 = vrot.lane.b32.xlu1 %v4637_v43, %s4784_s13  ;;  %v1960_v32 = vpack.c.b16 %v1957_v44, %v1957_v44 }
 0x263   : > { %1762 = vrot.lane.b32.xlu2 %v4638_v62, %s4785_s14 }
 0x264   : > { %v1417_v51 = vpop.permute.xlu0 %1416  ;;  %v1419_v36 = vpop.permute.xlu1 %1418  ;;  %v2014_v43 = vsel %vm2012_vm8, %v1960_v32, 0 }
 0x265   : > { %1493 = vst.msk [vmem:[#allocation2 + $0xa0] sm:$0xff] %vm1472_vm6, %v1417_v51  ;;  %v1439_v57 = vpop.permute.xlu2 %1438  ;;  %2021 = vmatpush.bf16.msra.mxu0 %v2014_v43  ;;  %4735 = vmatpush.bf16.msra.mxu3 %v2014_v43 }
 0x266   : > { %1494 = vst.msk [vmem:[#allocation2 + $0xa8] sm:$0xff] %vm1472_vm6, %v1419_v36  ;;  %v4730_v36 = vld [vmem:[%s7549_s1 + $0x8] sm:$0xff] }
 0x267   : > { %1504 = vst.msk [vmem:[#allocation2 + $0xf8] sm:$0xff] %vm1472_vm6, %v1439_v57 }
 0x269   : > { %2022 = vmatpush.bf16.msra.mxu0 %v4730_v36  ;;  %4736 = vmatpush.bf16.msra.mxu3 %v4730_v36 }
 0x26a   : > { %1764 = vrot.lane.b32.xlu0 %v4639_v35, %s4785_s14  ;;  %1766 = vrot.lane.b32.xlu1 %v4640_v40, %s4785_s14  ;;  %v4729_v35 = vld [vmem:[%s7549_s1] sm:$0xff] }
 0x26b   : > { %1768 = vrot.lane.b32.xlu2 %v4641_v41, %s4785_s14  ;;  %v4662_v41 = vld [vmem:[%s4846_s29 + $0x152] sm:$0xff] }
 0x26c   : > { %v1423_v50 = vpop.permute.xlu0 %1422  ;;  %v1425_v38 = vpop.permute.xlu1 %1424 }
 0x26d   : > { %1496 = vst.msk [vmem:[#allocation2 + $0xb8] sm:$0xff] %vm1472_vm6, %v1423_v50  ;;  %v1574_v63 = vpop.permute.xlu2 %1573  ;;  %2023 = vmatpush.bf16.msra.mxu0 %v4729_v35  ;;  %4737 = vmatpush.bf16.msra.mxu3 %v4729_v35 }
 0x26e   : > { %1497 = vst.msk [vmem:[#allocation2 + $0xc0] sm:$0xff] %vm1472_vm6, %v1425_v38  ;;  %v4664_v38 = vld [vmem:[%s4846_s29 + $0x16a] sm:$0xff] }
 0x26f   : > { %1668 = vst.msk [vmem:[#allocation2 + $0x10] sm:$0xff] %vm1665_vm7, %v1574_v63 }
 0x272   : > { %1770 = vrot.lane.b32.xlu0 %v4642_v1, %s4785_s14  ;;  %1772 = vrot.lane.b32.xlu1 %v4643_v4, %s4785_s14 }
 0x273   : > { %1774 = vrot.lane.b32.xlu2 %v4644_v13, %s4785_s14 }
 0x274   : > { %v1429_v2 = vpop.permute.xlu0 %1428  ;;  %v1431_v5 = vpop.permute.xlu1 %1430 }
 0x275   : > { %1499 = vst.msk [vmem:[#allocation2 + $0xd0] sm:$0xff] %vm1472_vm6, %v1429_v2  ;;  %v1580_v7 = vpop.permute.xlu2 %1579 }
 0x276   : > { %1500 = vst.msk [vmem:[#allocation2 + $0xd8] sm:$0xff] %vm1472_vm6, %v1431_v5  ;;  %v4665_v5 = vld [vmem:[%s4846_s29 + $0x172] sm:$0xff] }
 0x277   : > { %1671 = vst.msk [vmem:[#allocation2 + $0x28] sm:$0xff] %vm1665_vm7, %v1580_v7 }
 0x27a   : > { %1776 = vrot.lane.b32.xlu0 %v4645_v8, %s4785_s14  ;;  %1778 = vrot.lane.b32.xlu1 %v4646_v9, %s4785_s14 }
 0x27b   : > { %1780 = vrot.lane.b32.xlu2 %v4647_v19, %s4785_s14 }
 0x27c   : > { %v1435_v10 = vpop.permute.xlu0 %1434  ;;  %v1437_v11 = vpop.permute.xlu1 %1436 }
 0x27d   : > { %1502 = vst.msk [vmem:[#allocation2 + $0xe8] sm:$0xff] %vm1472_vm6, %v1435_v10  ;;  %v1586_v14 = vpop.permute.xlu2 %1585 }
 0x27e   : > { %1503 = vst.msk [vmem:[#allocation2 + $0xf0] sm:$0xff] %vm1472_vm6, %v1437_v11 }
 0x27f   : > { %1674 = vst.msk [vmem:[#allocation2 + $0x40] sm:$0xff] %vm1665_vm7, %v1586_v14 }
 0x282   : > { %1782 = vrot.lane.b32.xlu0 %v4648_v15, %s4785_s14  ;;  %1784 = vrot.lane.b32.xlu1 %v4649_v16, %s4785_s14 }
 0x283   : > { %1786 = vrot.lane.b32.xlu2 %v4650_v23, %s4785_s14 }
 0x284   : > { %v1570_v17 = vpop.permute.xlu0 %1569  ;;  %v1572_v18 = vpop.permute.xlu1 %1571 }
 0x285   : > { %1666 = vst.msk [vmem:[#allocation2] sm:$0xff] %vm1665_vm7, %v1570_v17  ;;  %v1592_v20 = vpop.permute.xlu2 %1591 }
 0x286   : > { %1667 = vst.msk [vmem:[#allocation2 + $0x8] sm:$0xff] %vm1665_vm7, %v1572_v18 }
 0x287   : > { %1677 = vst.msk [vmem:[#allocation2 + $0x58] sm:$0xff] %vm1665_vm7, %v1592_v20 }
 0x28a   : > { %1788 = vrot.lane.b32.xlu0 %v4651_v21, %s4785_s14  ;;  %1790 = vrot.lane.b32.xlu1 %v4652_v22, %s4785_s14 }
 0x28b   : > { %1792 = vrot.lane.b32.xlu2 %v4653_v61, %s4785_s14 }
 0x28c   : > { %v1576_v45 = vpop.permute.xlu0 %1575  ;;  %v1578_v58 = vpop.permute.xlu1 %1577 }
 0x28d   : > { %1669 = vst.msk [vmem:[#allocation2 + $0x18] sm:$0xff] %vm1665_vm7, %v1576_v45  ;;  %v1598_v24 = vpop.permute.xlu2 %1597 }
 0x28e   : > { %1670 = vst.msk [vmem:[#allocation2 + $0x20] sm:$0xff] %vm1665_vm7, %v1578_v58 }
 0x28f   : > { %1680 = vst.msk [vmem:[#allocation2 + $0x70] sm:$0xff] %vm1665_vm7, %v1598_v24 }
 0x292   : > { %1794 = vrot.lane.b32.xlu0 %v4654_v52, %s4785_s14  ;;  %1796 = vrot.lane.b32.xlu1 %v4655_v33, %s4785_s14 }
 0x293   : > { %1798 = vrot.lane.b32.xlu2 %v4656_v29, %s4785_s14 }
 0x294   : > { %v1582_v25 = vpop.permute.xlu0 %1581  ;;  %v1584_v26 = vpop.permute.xlu1 %1583 }
 0x295   : > { %1672 = vst.msk [vmem:[#allocation2 + $0x30] sm:$0xff] %vm1665_vm7, %v1582_v25  ;;  %v1604_v34 = vpop.permute.xlu2 %1603 }
 0x296   : > { %1673 = vst.msk [vmem:[#allocation2 + $0x38] sm:$0xff] %vm1665_vm7, %v1584_v26 }
 0x297   : > { %1683 = vst.msk [vmem:[#allocation2 + $0x88] sm:$0xff] %vm1665_vm7, %v1604_v34 }
 0x29a   : > { %1800 = vrot.lane.b32.xlu0 %v4657_v27, %s4785_s14  ;;  %1802 = vrot.lane.b32.xlu1 %v4658_v28, %s4785_s14 }
 0x29b   : > { %1804 = vrot.lane.b32.xlu2 %v4659_v56, %s4785_s14 }
 0x29c   : > { %v1588_v39 = vpop.permute.xlu0 %1587  ;;  %v1590_v46 = vpop.permute.xlu1 %1589 }
 0x29d   : > { %1675 = vst.msk [vmem:[#allocation2 + $0x48] sm:$0xff] %vm1665_vm7, %v1588_v39  ;;  %v1610_v30 = vpop.permute.xlu2 %1609 }
 0x29e   : > { %1676 = vst.msk [vmem:[#allocation2 + $0x50] sm:$0xff] %vm1665_vm7, %v1590_v46 }
 0x29f   : > { %1686 = vst.msk [vmem:[#allocation2 + $0xa0] sm:$0xff] %vm1665_vm7, %v1610_v30 }
 0x2a2   : > { %1808 = vrot.lane.b32.xlu1 %v4661_v31, %s4785_s14  ;;  %1806 = vrot.lane.b32.xlu0 %v4660_v0, %s4785_s14 }
 0x2a3   : > { %1810 = vrot.lane.b32.xlu2 %v4662_v41, %s4785_s14 }
 0x2a4   : > { %v1594_v59 = vpop.permute.xlu0 %1593  ;;  %v1596_v53 = vpop.permute.xlu1 %1595 }
 0x2a5   : > { %1678 = vst.msk [vmem:[#allocation2 + $0x60] sm:$0xff] %vm1665_vm7, %v1594_v59  ;;  %v1616_v60 = vpop.permute.xlu2 %1615 }
 0x2a6   : > { %1679 = vst.msk [vmem:[#allocation2 + $0x68] sm:$0xff] %vm1665_vm7, %v1596_v53 }
 0x2a7   : > { %1689 = vst.msk [vmem:[#allocation2 + $0xb8] sm:$0xff] %vm1665_vm7, %v1616_v60 }
 0x2aa   : > { %1812 = vrot.lane.b32.xlu0 %v4663_v47, %s4785_s14  ;;  %1814 = vrot.lane.b32.xlu1 %v4664_v38, %s4785_s14 }
 0x2ab   : > { %1816 = vrot.lane.b32.xlu2 %v4665_v5, %s4785_s14 }
 0x2ac   : > { %v1600_v3 = vpop.permute.xlu0 %1599  ;;  %v1602_v55 = vpop.permute.xlu1 %1601 }
 0x2ad   : > { %1681 = vst.msk [vmem:[#allocation2 + $0x78] sm:$0xff] %vm1665_vm7, %v1600_v3  ;;  %v1622_v54 = vpop.permute.xlu2 %1621 }
 0x2ae   : > { %1682 = vst.msk [vmem:[#allocation2 + $0x80] sm:$0xff] %vm1665_vm7, %v1602_v55 }
 0x2af   : > { %1692 = vst.msk [vmem:[#allocation2 + $0xd0] sm:$0xff] %vm1665_vm7, %v1622_v54 }
 0x2b2   : > { %1818 = vrot.lane.b32.xlu0 %v5624_v6, %s4785_s14  ;;  %1820 = vrot.lane.b32.xlu1 %v5635_v12, %s4785_s14 }
 0x2b4   : > { %v1606_v48 = vpop.permute.xlu0 %1605  ;;  %v1608_v49 = vpop.permute.xlu1 %1607 }
 0x2b5   : > { %1684 = vst.msk [vmem:[#allocation2 + $0x90] sm:$0xff] %vm1665_vm7, %v1606_v48  ;;  %v1628_v42 = vpop.permute.xlu2 %1627 }
 0x2b6   : > { %1685 = vst.msk [vmem:[#allocation2 + $0x98] sm:$0xff] %vm1665_vm7, %v1608_v49 }
 0x2b7   : > { %1695 = vst.msk [vmem:[#allocation2 + $0xe8] sm:$0xff] %vm1665_vm7, %v1628_v42 }
 0x2bc   : > { %v1612_v62 = vpop.permute.xlu0 %1611  ;;  %v1614_v51 = vpop.permute.xlu1 %1613 }
 0x2bd   : > { %1687 = vst.msk [vmem:[#allocation2 + $0xa8] sm:$0xff] %vm1665_vm7, %v1612_v62  ;;  %v1763_v57 = vpop.permute.xlu2 %1762 }
 0x2be   : > { %1688 = vst.msk [vmem:[#allocation2 + $0xb0] sm:$0xff] %vm1665_vm7, %v1614_v51 }
 0x2bf   : > { %1859 = vst.msk [vmem:[#allocation2] sm:$0xff] %vm1858_vm9, %v1763_v57 }
 0x2c4   : > { %v1618_v40 = vpop.permute.xlu0 %1617  ;;  %v1620_v50 = vpop.permute.xlu1 %1619 }
 0x2c5   : > { %1690 = vst.msk [vmem:[#allocation2 + $0xc0] sm:$0xff] %vm1665_vm7, %v1618_v40  ;;  %v1769_v6 = vpop.permute.xlu2 %1768 }
 0x2c6   : > { %1691 = vst.msk [vmem:[#allocation2 + $0xc8] sm:$0xff] %vm1665_vm7, %v1620_v50  ;;  %v1891_v12 = vld [vmem:[#allocation2] sm:$0xff] }
 0x2c7   : > { %1862 = vst.msk [vmem:[#allocation2 + $0x18] sm:$0xff] %vm1858_vm9, %v1769_v6 }
 0x2cc   : > { %v1624_v63 = vpop.permute.xlu0 %1623  ;;  %v1626_v1 = vpop.permute.xlu1 %1625 }
 0x2cd   : > { %1693 = vst.msk [vmem:[#allocation2 + $0xd8] sm:$0xff] %vm1665_vm7, %v1624_v63  ;;  %v1775_v7 = vpop.permute.xlu2 %1774  ;;  %v4669_v63 = vld [vmem:[%s4846_s29 + $0x1a2] sm:$0xff] }
 0x2ce   : > { %1694 = vst.msk [vmem:[#allocation2 + $0xe0] sm:$0xff] %vm1665_vm7, %v1626_v1  ;;  %v1894_v20 = vld [vmem:[#allocation2 + $0x18] sm:$0xff]  ;;  %1824 = vrot.lane.b32.xlu0 %v4669_v63, %s4785_s14 }
 0x2cf   : > { %1865 = vst.msk [vmem:[#allocation2 + $0x30] sm:$0xff] %vm1858_vm9, %v1775_v7 }
 0x2d4   : > { %v1630_v4 = vpop.permute.xlu0 %1629  ;;  %v1632_v2 = vpop.permute.xlu1 %1631 }
 0x2d5   : > { %1696 = vst.msk [vmem:[#allocation2 + $0xf0] sm:$0xff] %vm1665_vm7, %v1630_v4  ;;  %v1781_v10 = vpop.permute.xlu2 %1780 }
 0x2d6   : > { %1697 = vst.msk [vmem:[#allocation2 + $0xf8] sm:$0xff] %vm1665_vm7, %v1632_v2  ;;  %v1897_v46 = vld [vmem:[#allocation2 + $0x30] sm:$0xff]  ;;  %v4786_v2 = vmov 0.0  }
 0x2d7   : > { %1868 = vst.msk [vmem:[#allocation2 + $0x48] sm:$0xff] %vm1858_vm9, %v1781_v10 }
 0x2d8   : > { %2206 = vst.msk [vmem:[#allocation3] sm:$0xff] %vm2205_vm11, %v4786_v2 }
 0x2d9   : > { %2207 = vst.msk [vmem:[#allocation3 + $0x8] sm:$0xff] %vm2205_vm11, %v4786_v2 }
 0x2da   : > { %2211 = vst.msk [vmem:[#allocation3 + $0x198] sm:$0xff] %vm2205_vm11, %v4786_v2 }
 0x2db   : > { %2212 = vst.msk [vmem:[#allocation3 + $0x1a0] sm:$0xff] %vm2205_vm11, %v4786_v2 }
 0x2dc   : > { %v1765_v8 = vpop.permute.xlu0 %1764  ;;  %v1767_v9 = vpop.permute.xlu1 %1766  ;;  %2217 = vst.msk [vmem:[#allocation3 + $0x30] sm:$0x1] %vm2214_vm12, %v4786_v2 }
 0x2dd   : > { %1860 = vst.msk [vmem:[#allocation2 + $0x8] sm:$0xff] %vm1858_vm9, %v1765_v8  ;;  %v1787_v16 = vpop.permute.xlu2 %1786  ;;  %v4668_v8 = vld [vmem:[%s4846_s29 + $0x19a] sm:$0xff]  ;;  %s4789_s29 = smov 56  }
 0x2de   : > { %1861 = vst.msk [vmem:[#allocation2 + $0x10] sm:$0xff] %vm1858_vm9, %v1767_v9  ;;  %v1900_v54 = vld [vmem:[#allocation2 + $0x48] sm:$0xff]  ;;  %1822 = vrot.lane.b32.xlu2 %v4668_v8, %s4785_s14 }
 0x2df   : > { %1871 = vst.msk [vmem:[#allocation2 + $0x60] sm:$0xff] %vm1858_vm9, %v1787_v16 }
 0x2e0   : > { %2215 = vst.msk [vmem:[#allocation3] sm:$0x1] %vm2214_vm12, %v4786_v2 }
 0x2e1   : > { %2209 = vst.msk [vmem:[#allocation3 + $0x10] sm:$0x3] %vm2208_vm13, %v4786_v2 }
 0x2e2   : > { %2213 = vst.msk [vmem:[#allocation3 + $0x1a8] sm:$0x3] %vm2208_vm13, %v4786_v2 }
 0x2e3   : > { %2216 = vst.msk [vmem:[#allocation3 + $0x18] sm:$0x1] %vm2214_vm12, %v4786_v2 }
 0x2e4   : > { %v1892_v11 = vld [vmem:[#allocation2 + $0x8] sm:$0xff]  ;;  %v1771_v13 = vpop.permute.xlu0 %1770  ;;  %v1773_v14 = vpop.permute.xlu1 %1772  ;;  %2218 = vst.msk [vmem:[#allocation3 + $0x48] sm:$0x1] %vm2214_vm12, %v4786_v2 }
 0x2e5   : > { %v1923_v15 = vpack.c.bf16 %v1892_v11, %v1891_v12  ;;  %1863 = vst.msk [vmem:[#allocation2 + $0x20] sm:$0xff] %vm1858_vm9, %v1771_v13  ;;  %v1893_v19 = vld [vmem:[#allocation2 + $0x10] sm:$0xff]  ;;  %v1793_v21 = vpop.permute.xlu2 %1792  ;;  %v2348_v11 = vld [vmem:[#allocation3 + $0x1] sm:$0xff] }
 0x2e6   : > { %1864 = vst.msk [vmem:[#allocation2 + $0x28] sm:$0xff] %vm1858_vm9, %v1773_v14  ;;  %v1924_v22 = vpack.c.bf16 %v1894_v20, %v1893_v19  ;;  %v1903_v50 = vld [vmem:[#allocation2 + $0x60] sm:$0xff]  ;;  %2412 = vrot.lane.b32.xlu1 %v2348_v11, %s4779_s8 }
 0x2e7   : > { %4678 = vmatmul.msk.bf16.vlgmr.msra.gmra.mxu0 %vm1963_vm10, %v1923_v15  ;;  %1874 = vst.msk [vmem:[#allocation2 + $0x78] sm:$0xff] %vm1858_vm9, %v1793_v21  ;;  %v6042_v20 = vld [vmem:[%s7551_s3] ss:$0 sm:$0xff] }
 0x2e8   : > { %2219 = vst.msk [vmem:[#allocation3 + $0x60] sm:$0x1] %vm2214_vm12, %v4786_v2  ;;  %v2349_v14 = vld [vmem:[#allocation3 + $0x9] sm:$0xff] }
 0x2e9   : > { %2220 = vst.msk [vmem:[#allocation3 + $0x78] sm:$0x1] %vm2214_vm12, %v4786_v2  ;;  %2414 = vrot.lane.b32.xlu2 %v2349_v14, %s4779_s8 }
 0x2ea   : > { %2221 = vst.msk [vmem:[#allocation3 + $0x90] sm:$0x1] %vm2214_vm12, %v4786_v2 }
 0x2eb   : > { %2222 = vst.msk [vmem:[#allocation3 + $0xa8] sm:$0x1] %vm2214_vm12, %v4786_v2 }
 0x2ec   : > { %v1777_v17 = vpop.permute.xlu0 %1776  ;;  %v1779_v18 = vpop.permute.xlu1 %1778  ;;  %v1895_v33 = vld [vmem:[#allocation2 + $0x20] sm:$0xff]  ;;  %2223 = vst.msk [vmem:[#allocation3 + $0xc0] sm:$0x1] %vm2214_vm12, %v4786_v2 }
 0x2ed   : > { %1866 = vst.msk [vmem:[#allocation2 + $0x38] sm:$0xff] %vm1858_vm9, %v1777_v17  ;;  %v1799_v23 = vpop.permute.xlu2 %1798  ;;  %v1896_v25 = vld [vmem:[#allocation2 + $0x28] sm:$0xff]  ;;  %v6033_v17 = vld [vmem:[%s7550_s2] ss:$0 sm:$0xff] }
 0x2ee   : > { %1867 = vst.msk [vmem:[#allocation2 + $0x40] sm:$0xff] %vm1858_vm9, %v1779_v18  ;;  %v1925_v26 = vpack.c.bf16 %v1896_v25, %v1895_v33  ;;  %v1906_v10 = vld [vmem:[#allocation2 + $0x78] sm:$0xff] }
 0x2ef   : > { %1877 = vst.msk [vmem:[#allocation2 + $0x90] sm:$0xff] %vm1858_vm9, %v1799_v23 }
 0x2f0   : > { %2224 = vst.msk [vmem:[#allocation3 + $0xd8] sm:$0x1] %vm2214_vm12, %v4786_v2 }
 0x2f1   : > { %2225 = vst.msk [vmem:[#allocation3 + $0xf0] sm:$0x1] %vm2214_vm12, %v4786_v2 }
 0x2f2   : > { %2226 = vst.msk [vmem:[#allocation3 + $0x108] sm:$0x1] %vm2214_vm12, %v4786_v2 }
 0x2f3   : > { %2227 = vst.msk [vmem:[#allocation3 + $0x120] sm:$0x1] %vm2214_vm12, %v4786_v2 }
 0x2f4   : > { %v1783_v45 = vpop.permute.xlu0 %1782  ;;  %v1785_v58 = vpop.permute.xlu1 %1784  ;;  %v1898_v29 = vld [vmem:[#allocation2 + $0x38] sm:$0xff]  ;;  %2228 = vst.msk [vmem:[#allocation3 + $0x138] sm:$0x1] %vm2214_vm12, %v4786_v2 }
 0x2f5   : > { %1869 = vst.msk [vmem:[#allocation2 + $0x50] sm:$0xff] %vm1858_vm9, %v1783_v45  ;;  %v1805_v27 = vpop.permute.xlu2 %1804  ;;  %v1926_v53 = vpack.c.bf16 %v1898_v29, %v1897_v46  ;;  %v1899_v56 = vld [vmem:[#allocation2 + $0x40] sm:$0xff] }
 0x2f6   : > { %1870 = vst.msk [vmem:[#allocation2 + $0x58] sm:$0xff] %vm1858_vm9, %v1785_v58  ;;  %v1909_v30 = vld [vmem:[#allocation2 + $0x90] sm:$0xff]  ;;  %v1927_v49 = vpack.c.bf16 %v1900_v54, %v1899_v56 }
 0x2f7   : > { %4679 = vmatmul.msk.bf16.gmra.mxu0 %vm1963_vm10, %v1924_v22  ;;  %1880 = vst.msk [vmem:[#allocation2 + $0xa8] sm:$0xff] %vm1858_vm9, %v1805_v27 }
 0x2f8   : > { %2229 = vst.msk [vmem:[#allocation3 + $0x150] sm:$0x1] %vm2214_vm12, %v4786_v2 }
 0x2f9   : > { %2230 = vst.msk [vmem:[#allocation3 + $0x168] sm:$0x1] %vm2214_vm12, %v4786_v2 }
 0x2fa   : > { %2231 = vst.msk [vmem:[#allocation3 + $0x180] sm:$0x1] %vm2214_vm12, %v4786_v2 }
 0x2fb   : > { %2232 = vst.msk [vmem:[#allocation3 + $0x198] sm:$0x1] %vm2214_vm12, %v4786_v2 }
 0x2fc   : > { %v1789_v24 = vpop.permute.xlu0 %1788  ;;  %v1791_v52 = vpop.permute.xlu1 %1790  ;;  %v1901_v32 = vld [vmem:[#allocation2 + $0x50] sm:$0xff]  ;;  %2233 = vst.msk [vmem:[#allocation3 + $0x11] sm:$0x1] %vm2214_vm12, %v4786_v2 }
 0x2fd   : > { %1872 = vst.msk [vmem:[#allocation2 + $0x68] sm:$0xff] %vm1858_vm9, %v1789_v24  ;;  %v1811_v47 = vpop.permute.xlu2 %1810  ;;  %v1902_v43 = vld [vmem:[#allocation2 + $0x58] sm:$0xff] }
 0x2fe   : > { %1873 = vst.msk [vmem:[#allocation2 + $0x70] sm:$0xff] %vm1858_vm9, %v1791_v52  ;;  %v1912_v55 = vld [vmem:[#allocation2 + $0xa8] sm:$0xff]  ;;  %v1928_v51 = vpack.c.bf16 %v1902_v43, %v1901_v32 }
 0x2ff   : > { %1883 = vst.msk [vmem:[#allocation2 + $0xc0] sm:$0xff] %vm1858_vm9, %v1811_v47 }
 0x300   : > { %2234 = vst.msk [vmem:[#allocation3 + $0x29] sm:$0x1] %vm2214_vm12, %v4786_v2 }
 0x301   : > { %2235 = vst.msk [vmem:[#allocation3 + $0x41] sm:$0x1] %vm2214_vm12, %v4786_v2 }
 0x302   : > { %2236 = vst.msk [vmem:[#allocation3 + $0x59] sm:$0x1] %vm2214_vm12, %v4786_v2 }
 0x303   : > { %2237 = vst.msk [vmem:[#allocation3 + $0x71] sm:$0x1] %vm2214_vm12, %v4786_v2 }
 0x304   : > { %v1795_v61 = vpop.permute.xlu0 %1794  ;;  %v1797_v34 = vpop.permute.xlu1 %1796  ;;  %v1904_v38 = vld [vmem:[#allocation2 + $0x68] sm:$0xff]  ;;  %2238 = vst.msk [vmem:[#allocation3 + $0x89] sm:$0x1] %vm2214_vm12, %v4786_v2 }
 0x305   : > { %1875 = vst.msk [vmem:[#allocation2 + $0x80] sm:$0xff] %vm1858_vm9, %v1795_v61  ;;  %v1817_v36 = vpop.permute.xlu2 %1816  ;;  %v1929_v6 = vpack.c.bf16 %v1904_v38, %v1903_v50  ;;  %v1905_v9 = vld [vmem:[#allocation2 + $0x70] sm:$0xff] }
 0x306   : > { %1876 = vst.msk [vmem:[#allocation2 + $0x88] sm:$0xff] %vm1858_vm9, %v1797_v34  ;;  %v1915_v35 = vld [vmem:[#allocation2 + $0xc0] sm:$0xff]  ;;  %v1930_v13 = vpack.c.bf16 %v1906_v10, %v1905_v9 }
 0x307   : > { %4680 = vmatmul.msk.bf16.gmra.mxu0 %vm1963_vm10, %v1925_v26  ;;  %1886 = vst.msk [vmem:[#allocation2 + $0xd8] sm:$0xff] %vm1858_vm9, %v1817_v36 }
 0x308   : > { %2239 = vst.msk [vmem:[#allocation3 + $0xa1] sm:$0x1] %vm2214_vm12, %v4786_v2 }
 0x309   : > { %2240 = vst.msk [vmem:[#allocation3 + $0xb9] sm:$0x1] %vm2214_vm12, %v4786_v2 }
 0x30a   : > { %2241 = vst.msk [vmem:[#allocation3 + $0xd1] sm:$0x1] %vm2214_vm12, %v4786_v2 }
 0x30b   : > { %2242 = vst.msk [vmem:[#allocation3 + $0xe9] sm:$0x1] %vm2214_vm12, %v4786_v2 }
 0x30c   : > { %v1801_v28 = vpop.permute.xlu0 %1800  ;;  %v1803_v39 = vpop.permute.xlu1 %1802  ;;  %v1907_v18 = vld [vmem:[#allocation2 + $0x80] sm:$0xff]  ;;  %2243 = vst.msk [vmem:[#allocation3 + $0x101] sm:$0x1] %vm2214_vm12, %v4786_v2 }
 0x30d   : > { %1878 = vst.msk [vmem:[#allocation2 + $0x98] sm:$0xff] %vm1858_vm9, %v1801_v28  ;;  %v1908_v19 = vld [vmem:[#allocation2 + $0x88] sm:$0xff] }
 0x30e   : > { %1879 = vst.msk [vmem:[#allocation2 + $0xa0] sm:$0xff] %vm1858_vm9, %v1803_v39  ;;  %v1918_v7 = vld [vmem:[#allocation2 + $0xd8] sm:$0xff]  ;;  %v1931_v58 = vpack.c.bf16 %v1908_v19, %v1907_v18 }
 0x30f   : > { %2244 = vst.msk [vmem:[#allocation3 + $0x119] sm:$0x1] %vm2214_vm12, %v4786_v2 }
 0x310   : > { %2245 = vst.msk [vmem:[#allocation3 + $0x131] sm:$0x1] %vm2214_vm12, %v4786_v2 }
 0x311   : > { %2246 = vst.msk [vmem:[#allocation3 + $0x149] sm:$0x1] %vm2214_vm12, %v4786_v2 }
 0x312   : > { %2247 = vst.msk [vmem:[#allocation3 + $0x161] sm:$0x1] %vm2214_vm12, %v4786_v2 }
 0x313   : > { %2248 = vst.msk [vmem:[#allocation3 + $0x179] sm:$0x1] %vm2214_vm12, %v4786_v2 }
 0x314   : > { %v1910_v59 = vld [vmem:[#allocation2 + $0x98] sm:$0xff]  ;;  %v1809_v0 = vpop.permute.xlu1 %1808  ;;  %v1807_v60 = vpop.permute.xlu0 %1806  ;;  %2249 = vst.msk [vmem:[#allocation3 + $0x191] sm:$0x1] %vm2214_vm12, %v4786_v2 }
 0x315   : > { %v1932_v31 = vpack.c.bf16 %v1910_v59, %v1909_v30  ;;  %1882 = vst.msk [vmem:[#allocation2 + $0xb8] sm:$0xff] %vm1858_vm9, %v1809_v0  ;;  %v1911_v3 = vld [vmem:[#allocation2 + $0xa0] sm:$0xff] }
 0x316   : > { %1881 = vst.msk [vmem:[#allocation2 + $0xb0] sm:$0xff] %vm1858_vm9, %v1807_v60  ;;  %v1933_v48 = vpack.c.bf16 %v1912_v55, %v1911_v3 }
 0x317   : > { %4681 = vmatmul.msk.bf16.gmra.mxu0 %vm1963_vm10, %v1926_v53  ;;  %4687 = vmatmul.msk.bf16.vlgmr.msra.gmra.mxu3 %vm1963_vm10, %v1932_v31  ;;  %2250 = vst.msk [vmem:[#allocation3 + $0x1a9] sm:$0x1] %vm2214_vm12, %v4786_v2 }
 0x31c   : > { %v1813_v37 = vpop.permute.xlu0 %1812  ;;  %v1914_v44 = vld [vmem:[#allocation2 + $0xb8] sm:$0xff]  ;;  %v1815_v57 = vpop.permute.xlu1 %1814 }
 0x31d   : > { %1884 = vst.msk [vmem:[#allocation2 + $0xc8] sm:$0xff] %vm1858_vm9, %v1813_v37  ;;  %v1913_v42 = vld [vmem:[#allocation2 + $0xb0] sm:$0xff] }
 0x31e   : > { %v1934_v62 = vpack.c.bf16 %v1914_v44, %v1913_v42  ;;  %1885 = vst.msk [vmem:[#allocation2 + $0xd0] sm:$0xff] %vm1858_vm9, %v1815_v57 }
 0x324   : > { %v1916_v40 = vld [vmem:[#allocation2 + $0xc8] sm:$0xff]  ;;  %v1821_v1 = vpop.permute.xlu1 %1820  ;;  %v1819_v4 = vpop.permute.xlu0 %1818 }
 0x325   : > { %v1935_v41 = vpack.c.bf16 %v1916_v40, %v1915_v35  ;;  %1888 = vst.msk [vmem:[#allocation2 + $0xe8] sm:$0xff] %vm1858_vm9, %v1821_v1  ;;  %v1917_v5 = vld [vmem:[#allocation2 + $0xd0] sm:$0xff] }
 0x326   : > { %1887 = vst.msk [vmem:[#allocation2 + $0xe0] sm:$0xff] %vm1858_vm9, %v1819_v4  ;;  %v1936_v12 = vpack.c.bf16 %v1918_v7, %v1917_v5 }
 0x327   : > { %4682 = vmatmul.msk.bf16.gmra.mxu0 %vm1963_vm10, %v1927_v49  ;;  %4688 = vmatmul.msk.bf16.gmra.mxu3 %vm1963_vm10, %v1933_v48 }
 0x32c   : > { %v1920_v16 = vld [vmem:[#allocation2 + $0xe8] sm:$0xff] }
 0x32d   : > { %v1919_v15 = vld [vmem:[#allocation2 + $0xe0] sm:$0xff] }
 0x32e   : > { %v1937_v21 = vpack.c.bf16 %v1920_v16, %v1919_v15 }
 0x337   : > { %4683 = vmatmul.msk.bf16.gmra.mxu0 %vm1963_vm10, %v1928_v51  ;;  %4689 = vmatmul.msk.bf16.gmra.mxu3 %vm1963_vm10, %v1934_v62 }
 0x347   : > { %4684 = vmatmul.msk.bf16.gmra.mxu0 %vm1963_vm10, %v1929_v6  ;;  %4690 = vmatmul.msk.bf16.gmra.mxu3 %vm1963_vm10, %v1935_v41 }
 0x357   : > { %4685 = vmatmul.msk.bf16.gmra.mxu0 %vm1963_vm10, %v1930_v13  ;;  %4691 = vmatmul.msk.bf16.gmra.mxu3 %vm1963_vm10, %v1936_v12 }
 0x364   : > { %v2025_v22 = vpop.f32.mrf.mxu0 }
 0x365   : > { %v6049_v45 = vadd.f32 %v6033_v17, %v2025_v22 }
 0x367   : > { %7695 = vst [vmem:[#allocation5_spill] sm:$0xff] %v6049_v45  ;;  %vm2105_vm14 = vcmp.gt.f32.partialorder %v6049_v45, 0.0  ;;  %v2141_v23 = vmul.f32 %v6042_v20, %v6049_v45  ;;  %4686 = vmatmul.msk.bf16.gmra.mxu0 %vm1963_vm10, %v1931_v58  ;;  %4692 = vmatmul.msk.bf16.gmra.mxu3 %vm1963_vm10, %v1937_v21 }
 0x369   : > { %v2173_v24 = vsel %vm2105_vm14, %v6049_v45, %v2141_v23  ;;  %vm2508_vm14 = vcmask 130112  }
 0x36a   : > { %2252 = vst.msk [vmem:[#allocation3 + $0x19] sm:$0xff] %vm2205_vm11, %v2173_v24  ;;  %v1823_v24 = vpop.permute.xlu2 %1822 }
 0x36b   : > { %1889 = vst.msk [vmem:[#allocation2 + $0xf0] sm:$0xff] %vm1858_vm9, %v1823_v24 }
 0x36c   : > { %v2027_v52 = vpop.f32.mrf.mxu0 }
 0x36d   : > { %v6073_v33 = vadd.f32 %v6033_v17, %v2027_v52 }
 0x36f   : > { %7696 = vst [vmem:[#allocation6_spill] sm:$0xff] %v6073_v33  ;;  %vm2106_vm15 = vcmp.gt.f32.partialorder %v6073_v33, 0.0  ;;  %v2142_v25 = vmul.f32 %v6042_v20, %v6073_v33 }
 0x371   : > { %v2174_v26 = vsel %vm2106_vm15, %v6073_v33, %v2142_v25  ;;  %v2350_v61 = vld [vmem:[#allocation3 + $0x19] sm:$0xff] }
 0x372   : > { %2253 = vst.msk [vmem:[#allocation3 + $0x21] sm:$0xff] %vm2205_vm11, %v2174_v26  ;;  %2416 = vrot.lane.b32.xlu0 %v2350_v61, %s4779_s8  ;;  %v6100_v28 = vld [vmem:[#allocation3 + $0x18] sm:$0xff] }
 0x373   : > { %2318 = vst.msk [vmem:[#allocation4 + $0x10] sm:$0xff] %vm2205_vm11, %v6100_v28 }
 0x374   : > { %v2030_v34 = vpop.f32.mrf.mxu0 }
 0x375   : > { %v6096_v27 = vadd.f32 %v6033_v17, %v2030_v34 }
 0x377   : > { %7697 = vst [vmem:[#allocation7_spill] sm:$0xff] %v6096_v27  ;;  %vm2107_vm0 = vcmp.gt.f32.partialorder %v6096_v27, 0.0  ;;  %v2143_v39 = vmul.f32 %v6042_v20, %v6096_v27 }
 0x379   : > { %v2175_v46 = vsel %vm2107_vm0, %v6096_v27, %v2143_v39  ;;  %v2351_v29 = vld [vmem:[#allocation3 + $0x21] sm:$0xff] }
 0x37a   : > { %v6112_v30 = vld [vmem:[#allocation3 + $0x20] sm:$0xff]  ;;  %2254 = vst.msk [vmem:[#allocation3 + $0x31] sm:$0xff] %vm2205_vm11, %v2175_v46  ;;  %2418 = vrot.lane.b32.xlu1 %v2351_v29, %s4779_s8 }
 0x37b   : > { %2319 = vst.msk [vmem:[#allocation4 + $0x18] sm:$0xff] %vm2205_vm11, %v6112_v30 }
 0x37c   : > { %v2032_v59 = vpop.f32.mrf.mxu0 }
 0x37d   : > { %v6119_v53 = vadd.f32 %v6033_v17, %v2032_v59 }
 0x37f   : > { %7698 = vst [vmem:[#allocation8_spill] sm:$0xff] %v6119_v53  ;;  %vm2108_vm1 = vcmp.gt.f32.partialorder %v6119_v53, 0.0  ;;  %v2144_v31 = vmul.f32 %v6042_v20, %v6119_v53 }
 0x381   : > { %v2176_v0 = vsel %vm2108_vm1, %v6119_v53, %v2144_v31  ;;  %v2352_v60 = vld [vmem:[#allocation3 + $0x31] sm:$0xff]  ;;  %v2285_v31 = vld [vmem:[#allocation3 + $0x8] sm:$0xff] }
 0x382   : > { %v6125_v3 = vld [vmem:[#allocation3 + $0x30] sm:$0xff]  ;;  %2255 = vst.msk [vmem:[#allocation3 + $0x39] sm:$0xff] %vm2205_vm11, %v2176_v0  ;;  %2420 = vrot.lane.b32.xlu2 %v2352_v60, %s4779_s8 }
 0x383   : > { %2320 = vst.msk [vmem:[#allocation4 + $0x20] sm:$0xff] %vm2205_vm11, %v6125_v3 }
 0x384   : > { %v2035_v55 = vpop.f32.mrf.mxu0  ;;  %2317 = vst.msk [vmem:[#allocation4 + $0x8] sm:$0xff] %vm2205_vm11, %v2285_v31 }
 0x385   : > { %v6132_v56 = vadd.f32 %v6033_v17, %v2035_v55  ;;  %v2415_v55 = vpop.permute.xlu2 %2414 }
 0x386   : > { %2510 = vst.msk [vmem:[#allocation4 + $0x8] sm:$0xff] %vm2508_vm14, %v2415_v55 }
 0x387   : > { %7699 = vst [vmem:[#allocation9_spill] sm:$0xff] %v6132_v56  ;;  %vm2109_vm2 = vcmp.gt.f32.partialorder %v6132_v56, 0.0  ;;  %v2145_v54 = vmul.f32 %v6042_v20, %v6132_v56 }
 0x389   : > { %v2177_v48 = vsel %vm2109_vm2, %v6132_v56, %v2145_v54  ;;  %v2353_v49 = vld [vmem:[#allocation3 + $0x39] sm:$0xff] }
 0x38a   : > { %v6138_v47 = vld [vmem:[#allocation3 + $0x38] sm:$0xff]  ;;  %2256 = vst.msk [vmem:[#allocation3 + $0x49] sm:$0xff] %vm2205_vm11, %v2177_v48  ;;  %2422 = vrot.lane.b32.xlu0 %v2353_v49, %s4779_s8 }
 0x38b   : > { %2321 = vst.msk [vmem:[#allocation4 + $0x28] sm:$0xff] %vm2205_vm11, %v6138_v47 }
 0x38c   : > { %v2037_v37 = vpop.f32.mrf.mxu0 }
 0x38d   : > { %v6145_v42 = vadd.f32 %v6033_v17, %v2037_v37 }
 0x38f   : > { %7700 = vst [vmem:[#allocation10_spill] sm:$0xff] %v6145_v42  ;;  %vm2110_vm3 = vcmp.gt.f32.partialorder %v6145_v42, 0.0  ;;  %v2146_v44 = vmul.f32 %v6042_v20, %v6145_v42 }
 0x391   : > { %v2178_v32 = vsel %vm2110_vm3, %v6145_v42, %v2146_v44  ;;  %v2354_v43 = vld [vmem:[#allocation3 + $0x49] sm:$0xff] }
 0x392   : > { %v6151_v62 = vld [vmem:[#allocation3 + $0x48] sm:$0xff]  ;;  %2257 = vst.msk [vmem:[#allocation3 + $0x51] sm:$0xff] %vm2205_vm11, %v2178_v32  ;;  %2424 = vrot.lane.b32.xlu1 %v2354_v43, %s4779_s8 }
 0x393   : > { %2322 = vst.msk [vmem:[#allocation4 + $0x30] sm:$0xff] %vm2205_vm11, %v6151_v62 }
 0x394   : > { %v2040_v51 = vpop.f32.mrf.mxu0 }
 0x395   : > { %v6158_v36 = vadd.f32 %v6033_v17, %v2040_v51 }
 0x397   : > { %7701 = vst [vmem:[#allocation11_spill] sm:$0xff] %v6158_v36  ;;  %vm2111_vm4 = vcmp.gt.f32.partialorder %v6158_v36, 0.0  ;;  %v2147_v57 = vmul.f32 %v6042_v20, %v6158_v36 }
 0x399   : > { %v2179_v35 = vsel %vm2111_vm4, %v6158_v36, %v2147_v57  ;;  %v2355_v40 = vld [vmem:[#allocation3 + $0x51] sm:$0xff] }
 0x39a   : > { %v6164_v50 = vld [vmem:[#allocation3 + $0x50] sm:$0xff]  ;;  %2258 = vst.msk [vmem:[#allocation3 + $0x61] sm:$0xff] %vm2205_vm11, %v2179_v35  ;;  %2426 = vrot.lane.b32.xlu2 %v2355_v40, %s4779_s8  ;;  %v2070_v38 = vpop.f32.mrf.mxu3 }
 0x39b   : > { %v6169_v41 = vadd.f32 %v6033_v17, %v2070_v38  ;;  %2323 = vst.msk [vmem:[#allocation4 + $0x38] sm:$0xff] %vm2205_vm11, %v6164_v50  ;;  %v1825_v38 = vpop.permute.xlu0 %1824 }
 0x39c   : > { %v2042_v6 = vpop.f32.mrf.mxu0  ;;  %1890 = vst.msk [vmem:[#allocation2 + $0xf8] sm:$0xff] %vm1858_vm9, %v1825_v38 }
 0x39d   : > { %7702 = vst [vmem:[#allocation12_spill] sm:$0xff] %v6169_v41  ;;  %v6174_v63 = vadd.f32 %v6033_v17, %v2042_v6  ;;  %vm2123_vm5 = vcmp.gt.f32.partialorder %v6169_v41, 0.0  ;;  %v2159_v1 = vmul.f32 %v6042_v20, %v6169_v41 }
 0x39f   : > { %7703 = vst [vmem:[#allocation13_spill] sm:$0xff] %v6174_v63  ;;  %vm2112_vm6 = vcmp.gt.f32.partialorder %v6174_v63, 0.0  ;;  %v2148_v4 = vmul.f32 %v6042_v20, %v6174_v63  ;;  %v2191_v2 = vsel %vm2123_vm5, %v6169_v41, %v2159_v1 }
 0x3a0   : > { %2270 = vst.msk [vmem:[#allocation3 + $0xf1] sm:$0xff] %vm2205_vm11, %v2191_v2 }
 0x3a1   : > { %v2180_v5 = vsel %vm2112_vm6, %v6174_v63, %v2148_v4  ;;  %v2356_v7 = vld [vmem:[#allocation3 + $0x61] sm:$0xff]  ;;  %v6566_v63 = vld [vmem:[#allocation3 + $0x52] sm:$0xff] }
 0x3a2   : > { %v6185_v8 = vld [vmem:[#allocation3 + $0x60] sm:$0xff]  ;;  %2259 = vst.msk [vmem:[#allocation3 + $0x69] sm:$0xff] %vm2205_vm11, %v2180_v5  ;;  %2428 = vrot.lane.b32.xlu0 %v2356_v7, %s4779_s8  ;;  %v2072_v9 = vpop.f32.mrf.mxu3 }
 0x3a3   : > { %v6190_v10 = vadd.f32 %v6033_v17, %v2072_v9  ;;  %2324 = vst.msk [vmem:[#allocation4 + $0x40] sm:$0xff] %vm2205_vm11, %v6185_v8  ;;  %v1922_v41 = vld [vmem:[#allocation2 + $0xf8] sm:$0xff] }
 0x3a4   : > { %v2045_v12 = vpop.f32.mrf.mxu0  ;;  %7725 = vst [vmem:[#allocation35_spill] sm:$0xff] %v6566_v63 }
 0x3a5   : > { %7704 = vst [vmem:[#allocation14_spill] sm:$0xff] %v6190_v10  ;;  %v6195_v11 = vadd.f32 %v6033_v17, %v2045_v12  ;;  %vm2124_vm7 = vcmp.gt.f32.partialorder %v6190_v10, 0.0  ;;  %v2160_v13 = vmul.f32 %v6042_v20, %v6190_v10 }
 0x3a7   : > { %7705 = vst [vmem:[#allocation15_spill] sm:$0xff] %v6195_v11  ;;  %vm2113_vm8 = vcmp.gt.f32.partialorder %v6195_v11, 0.0  ;;  %v2149_v14 = vmul.f32 %v6042_v20, %v6195_v11  ;;  %v2192_v15 = vsel %vm2124_vm7, %v6190_v10, %v2160_v13  ;;  %v6204_v16 = vld [vmem:[#allocation3 + $0xf0] sm:$0xff] }
 0x3a8   : > { %2271 = vst.msk [vmem:[#allocation3 + $0xf9] sm:$0xff] %vm2205_vm11, %v2192_v15 }
 0x3a9   : > { %v2181_v18 = vsel %vm2113_vm8, %v6195_v11, %v2149_v14  ;;  %v2357_v19 = vld [vmem:[#allocation3 + $0x69] sm:$0xff]  ;;  %2336 = vst.msk [vmem:[#allocation4 + $0xa0] sm:$0xff] %vm2205_vm11, %v6204_v16  ;;  %v2284_v14 = vld [vmem:[#allocation3] sm:$0xff] }
 0x3aa   : > { %v6208_v21 = vld [vmem:[#allocation3 + $0x68] sm:$0xff]  ;;  %2260 = vst.msk [vmem:[#allocation3 + $0x79] sm:$0xff] %vm2205_vm11, %v2181_v18  ;;  %2430 = vrot.lane.b32.xlu1 %v2357_v19, %s4779_s8  ;;  %v2075_v22 = vpop.f32.mrf.mxu3  ;;  %v6555_v11 = vld [vmem:[#allocation3 + $0x1a] sm:$0xff] }
 0x3ab   : > { %v6215_v58 = vadd.f32 %v6033_v17, %v2075_v22  ;;  %2325 = vst.msk [vmem:[#allocation4 + $0x48] sm:$0xff] %vm2205_vm11, %v6208_v21  ;;  %v6574_v53 = vld [vmem:[#allocation3 + $0x6a] sm:$0xff] }
 0x3ac   : > { %v2047_v23 = vpop.f32.mrf.mxu0  ;;  %2316 = vst.msk [vmem:[#allocation4] sm:$0xff] %vm2205_vm11, %v2284_v14 }
 0x3ad   : > { %7706 = vst [vmem:[#allocation16_spill] sm:$0xff] %v6215_v58  ;;  %v6220_v52 = vadd.f32 %v6033_v17, %v2047_v23  ;;  %vm2125_vm12 = vcmp.gt.f32.partialorder %v6215_v58, 0.0  ;;  %v2161_v25 = vmul.f32 %v6042_v20, %v6215_v58 }
 0x3ae   : > { %7726 = vst [vmem:[#allocation36_spill] sm:$0xff] %v6574_v53 }
 0x3af   : > { %7707 = vst [vmem:[#allocation17_spill] sm:$0xff] %v6220_v52  ;;  %vm2114_vm13 = vcmp.gt.f32.partialorder %v6220_v52, 0.0  ;;  %v2150_v26 = vmul.f32 %v6042_v20, %v6220_v52  ;;  %v2193_v61 = vsel %vm2125_vm12, %v6215_v58, %v2161_v25  ;;  %v6231_v34 = vld [vmem:[#allocation3 + $0xf8] sm:$0xff]  ;;  %v2413_v25 = vpop.permute.xlu1 %2412 }
 0x3b0   : > { %2272 = vst.msk [vmem:[#allocation3 + $0x109] sm:$0xff] %vm2205_vm11, %v2193_v61 }
 0x3b1   : > { %v2182_v39 = vsel %vm2114_vm13, %v6220_v52, %v2150_v26  ;;  %v2358_v46 = vld [vmem:[#allocation3 + $0x79] sm:$0xff]  ;;  %2337 = vst.msk [vmem:[#allocation4 + $0xa8] sm:$0xff] %vm2205_vm11, %v6231_v34 }
 0x3b2   : > { %v6234_v29 = vld [vmem:[#allocation3 + $0x78] sm:$0xff]  ;;  %2261 = vst.msk [vmem:[#allocation3 + $0x81] sm:$0xff] %vm2205_vm11, %v2182_v39  ;;  %2432 = vrot.lane.b32.xlu2 %v2358_v46, %s4779_s8  ;;  %v2077_v59 = vpop.f32.mrf.mxu3 }
 0x3b3   : > { %v6241_v0 = vadd.f32 %v6033_v17, %v2077_v59  ;;  %2326 = vst.msk [vmem:[#allocation4 + $0x50] sm:$0xff] %vm2205_vm11, %v6234_v29 }
 0x3b4   : > { %v2050_v60 = vpop.f32.mrf.mxu0  ;;  %2509 = vst.msk [vmem:[#allocation4] sm:$0xff] %vm2508_vm14, %v2413_v25 }
 0x3b5   : > { %7708 = vst [vmem:[#allocation18_spill] sm:$0xff] %v6241_v0  ;;  %v6247_v54 = vadd.f32 %v6033_v17, %v2050_v60  ;;  %vm2126_vm15 = vcmp.gt.f32.partialorder %v6241_v0, 0.0  ;;  %v2162_v48 = vmul.f32 %v6042_v20, %v6241_v0 }
 0x3b7   : > { %7709 = vst [vmem:[#allocation19_spill] sm:$0xff] %v6247_v54  ;;  %vm2115_vm0 = vcmp.gt.f32.partialorder %v6247_v54, 0.0  ;;  %v2151_v49 = vmul.f32 %v6042_v20, %v6247_v54  ;;  %v2194_v37 = vsel %vm2126_vm15, %v6241_v0, %v2162_v48  ;;  %v6257_v44 = vld [vmem:[#allocation3 + $0x108] sm:$0xff] }
 0x3b8   : > { %2273 = vst.msk [vmem:[#allocation3 + $0x111] sm:$0xff] %vm2205_vm11, %v2194_v37 }
 0x3b9   : > { %v2183_v32 = vsel %vm2115_vm0, %v6247_v54, %v2151_v49  ;;  %v2359_v43 = vld [vmem:[#allocation3 + $0x81] sm:$0xff]  ;;  %2338 = vst.msk [vmem:[#allocation4 + $0xb0] sm:$0xff] %vm2205_vm11, %v6257_v44 }
 0x3ba   : > { %v6261_v51 = vld [vmem:[#allocation3 + $0x80] sm:$0xff]  ;;  %2262 = vst.msk [vmem:[#allocation3 + $0x91] sm:$0xff] %vm2205_vm11, %v2183_v32  ;;  %2434 = vrot.lane.b32.xlu0 %v2359_v43, %s4779_s8  ;;  %v2080_v57 = vpop.f32.mrf.mxu3 }
 0x3bb   : > { %v6268_v35 = vadd.f32 %v6033_v17, %v2080_v57  ;;  %2327 = vst.msk [vmem:[#allocation4 + $0x58] sm:$0xff] %vm2205_vm11, %v6261_v51  ;;  %v6579_v56 = vld [vmem:[#allocation3 + $0x7a] sm:$0xff] }
 0x3bc   : > { %v2052_v40 = vpop.f32.mrf.mxu0  ;;  %7727 = vst [vmem:[#allocation37_spill] sm:$0xff] %v6579_v56 }
 0x3bd   : > { %7710 = vst [vmem:[#allocation20_spill] sm:$0xff] %v6268_v35  ;;  %v6273_v6 = vadd.f32 %v6033_v17, %v2052_v40  ;;  %vm2127_vm1 = vcmp.gt.f32.partialorder %v6268_v35, 0.0  ;;  %v2163_v1 = vmul.f32 %v6042_v20, %v6268_v35 }
 0x3bf   : > { %7711 = vst [vmem:[#allocation21_spill] sm:$0xff] %v6273_v6  ;;  %vm2116_vm2 = vcmp.gt.f32.partialorder %v6273_v6, 0.0  ;;  %v2152_v4 = vmul.f32 %v6042_v20, %v6273_v6  ;;  %v2195_v2 = vsel %vm2127_vm1, %v6268_v35, %v2163_v1  ;;  %v6284_v5 = vld [vmem:[#allocation3 + $0x110] sm:$0xff] }
 0x3c0   : > { %2274 = vst.msk [vmem:[#allocation3 + $0x121] sm:$0xff] %vm2205_vm11, %v2195_v2 }
 0x3c1   : > { %v2184_v7 = vsel %vm2116_vm2, %v6273_v6, %v2152_v4  ;;  %v2360_v9 = vld [vmem:[#allocation3 + $0x91] sm:$0xff]  ;;  %2339 = vst.msk [vmem:[#allocation4 + $0xb8] sm:$0xff] %vm2205_vm11, %v6284_v5 }
 0x3c2   : > { %v6287_v12 = vld [vmem:[#allocation3 + $0x90] sm:$0xff]  ;;  %2263 = vst.msk [vmem:[#allocation3 + $0x99] sm:$0xff] %vm2205_vm11, %v2184_v7  ;;  %2436 = vrot.lane.b32.xlu1 %v2360_v9, %s4779_s8  ;;  %v2082_v13 = vpop.f32.mrf.mxu3 }
 0x3c3   : > { %v6294_v15 = vadd.f32 %v6033_v17, %v2082_v13  ;;  %2328 = vst.msk [vmem:[#allocation4 + $0x60] sm:$0xff] %vm2205_vm11, %v6287_v12  ;;  %v2542_v6 = vld [vmem:[#allocation3 + $0xa] sm:$0xff] }
 0x3c4   : > { %v2055_v18 = vpop.f32.mrf.mxu0 }
 0x3c5   : > { %7712 = vst [vmem:[#allocation22_spill] sm:$0xff] %v6294_v15  ;;  %v6300_v19 = vadd.f32 %v6033_v17, %v2055_v18  ;;  %vm2128_vm9 = vcmp.gt.f32.partialorder %v6294_v15, 0.0  ;;  %v2164_v22 = vmul.f32 %v6042_v20, %v6294_v15 }
 0x3c7   : > { %7713 = vst [vmem:[#allocation23_spill] sm:$0xff] %v6300_v19  ;;  %vm2117_vm3 = vcmp.gt.f32.partialorder %v6300_v19, 0.0  ;;  %v2153_v23 = vmul.f32 %v6042_v20, %v6300_v19  ;;  %v2196_v24 = vsel %vm2128_vm9, %v6294_v15, %v2164_v22  ;;  %v6316_v46 = vld [vmem:[#allocation3 + $0x120] sm:$0xff] }
 0x3c8   : > { %2275 = vst.msk [vmem:[#allocation3 + $0x129] sm:$0xff] %vm2205_vm11, %v2196_v24 }
 0x3c9   : > { %v2185_v26 = vsel %vm2117_vm3, %v6300_v19, %v2153_v23  ;;  %v6311_v61 = vld [vmem:[#allocation3 + $0x99] sm:$0xff]  ;;  %2340 = vst.msk [vmem:[#allocation4 + $0xc0] sm:$0xff] %vm2205_vm11, %v6316_v46  ;;  %vm2894_vm3 = vcmask 261312  }
 0x3ca   : > { %v6314_v39 = vld [vmem:[#allocation3 + $0x98] sm:$0xff]  ;;  %2264 = vst.msk [vmem:[#allocation3 + $0xa9] sm:$0xff] %vm2205_vm11, %v2185_v26  ;;  %2438 = vrot.lane.b32.xlu2 %v6311_v61, %s4779_s8  ;;  %v2085_v59 = vpop.f32.mrf.mxu3 }
 0x3cb   : > { %v6322_v31 = vadd.f32 %v6033_v17, %v2085_v59  ;;  %2329 = vst.msk [vmem:[#allocation4 + $0x68] sm:$0xff] %vm2205_vm11, %v6314_v39  ;;  %v6587_v45 = vld [vmem:[#allocation3 + $0x92] sm:$0xff]  ;;  %v6592_v33 = vld [vmem:[#allocation3 + $0x9a] sm:$0xff] }
 0x3cc   : > { %v2057_v60 = vpop.f32.mrf.mxu0  ;;  %7728 = vst [vmem:[#allocation38_spill] sm:$0xff] %v6587_v45 }
 0x3cd   : > { %7714 = vst [vmem:[#allocation24_spill] sm:$0xff] %v6322_v31  ;;  %v6329_v55 = vadd.f32 %v6033_v17, %v2057_v60  ;;  %vm2129_vm4 = vcmp.gt.f32.partialorder %v6322_v31, 0.0  ;;  %v2165_v48 = vmul.f32 %v6042_v20, %v6322_v31 }
 0x3ce   : > { %7729 = vst [vmem:[#allocation39_spill] sm:$0xff] %v6592_v33 }
 0x3cf   : > { %7715 = vst [vmem:[#allocation25_spill] sm:$0xff] %v6329_v55  ;;  %vm2118_vm5 = vcmp.gt.f32.partialorder %v6329_v55, 0.0  ;;  %v2154_v49 = vmul.f32 %v6042_v20, %v6329_v55  ;;  %v2197_v37 = vsel %vm2129_vm4, %v6322_v31, %v2165_v48  ;;  %v6339_v32 = vld [vmem:[#allocation3 + $0x128] sm:$0xff]  ;;  %vm3087_vm4 = vcmask 326912  }
 0x3d0   : > { %2276 = vst.msk [vmem:[#allocation3 + $0x139] sm:$0xff] %vm2205_vm11, %v2197_v37 }
 0x3d1   : > { %v2186_v43 = vsel %vm2118_vm5, %v6329_v55, %v2154_v49  ;;  %v6342_v57 = vld [vmem:[#allocation3 + $0xa9] sm:$0xff]  ;;  %2341 = vst.msk [vmem:[#allocation4 + $0xc8] sm:$0xff] %vm2205_vm11, %v6339_v32  ;;  %vm3280_vm5 = vcmask 392512  }
 0x3d2   : > { %v6344_v40 = vld [vmem:[#allocation3 + $0xa8] sm:$0xff]  ;;  %2265 = vst.msk [vmem:[#allocation3 + $0xb1] sm:$0xff] %vm2205_vm11, %v2186_v43  ;;  %2440 = vrot.lane.b32.xlu0 %v6342_v57, %s4779_s8  ;;  %v2087_v38 = vpop.f32.mrf.mxu3 }
 0x3d3   : > { %v6352_v1 = vadd.f32 %v6033_v17, %v2087_v38  ;;  %2330 = vst.msk [vmem:[#allocation4 + $0x70] sm:$0xff] %vm2205_vm11, %v6344_v40 }
 0x3d4   : > { %v2060_v4 = vpop.f32.mrf.mxu0 }
 0x3d5   : > { %7716 = vst [vmem:[#allocation26_spill] sm:$0xff] %v6352_v1  ;;  %v6357_v2 = vadd.f32 %v6033_v17, %v2060_v4  ;;  %vm2130_vm6 = vcmp.gt.f32.partialorder %v6352_v1, 0.0  ;;  %v2166_v7 = vmul.f32 %v6042_v20, %v6352_v1 }
 0x3d7   : > { %7717 = vst [vmem:[#allocation27_spill] sm:$0xff] %v6357_v2  ;;  %vm2119_vm7 = vcmp.gt.f32.partialorder %v6357_v2, 0.0  ;;  %v2155_v9 = vmul.f32 %v6042_v20, %v6357_v2  ;;  %v2198_v13 = vsel %vm2130_vm6, %v6352_v1, %v2166_v7  ;;  %v6366_v14 = vld [vmem:[#allocation3 + $0x138] sm:$0xff]  ;;  %vm3474_vm6 = vcmask 458112  }
 0x3d8   : > { %2277 = vst.msk [vmem:[#allocation3 + $0x141] sm:$0xff] %vm2205_vm11, %v2198_v13 }
 0x3d9   : > { %v2187_v18 = vsel %vm2119_vm7, %v6357_v2, %v2155_v9  ;;  %v6370_v22 = vld [vmem:[#allocation3 + $0xb1] sm:$0xff]  ;;  %2342 = vst.msk [vmem:[#allocation4 + $0xd0] sm:$0xff] %vm2205_vm11, %v6366_v14  ;;  %v2541_v2 = vld [vmem:[#allocation3 + $0x2] sm:$0xff]  ;;  %vm4030_vm7 = vcmask 1043456  }
 0x3da   : > { %2266 = vst.msk [vmem:[#allocation3 + $0xc1] sm:$0xff] %vm2205_vm11, %v2187_v18  ;;  %2442 = vrot.lane.b32.xlu1 %v6370_v22, %s4779_s8  ;;  %v2090_v23 = vpop.f32.mrf.mxu3  ;;  %v6377_v24 = vld [vmem:[#allocation3 + $0xb0] sm:$0xff] }
 0x3db   : > { %v6380_v25 = vadd.f32 %v6033_v17, %v2090_v23  ;;  %2331 = vst.msk [vmem:[#allocation4 + $0x78] sm:$0xff] %vm2205_vm11, %v6377_v24 }
 0x3dc   : > { %v2062_v26 = vpop.f32.mrf.mxu0  ;;  %v2421_v59 = vpop.permute.xlu2 %2420 }
 0x3dd   : > { %7718 = vst [vmem:[#allocation28_spill] sm:$0xff] %v6380_v25  ;;  %v6385_v60 = vadd.f32 %v6033_v17, %v2062_v26  ;;  %vm2131_vm8 = vcmp.gt.f32.partialorder %v6380_v25, 0.0  ;;  %v2167_v48 = vmul.f32 %v6042_v20, %v6380_v25 }
 0x3de   : > { %2513 = vst.msk [vmem:[#allocation4 + $0x20] sm:$0xff] %vm2508_vm14, %v2421_v59 }
 0x3df   : > { %7719 = vst [vmem:[#allocation29_spill] sm:$0xff] %v6385_v60  ;;  %vm2120_vm12 = vcmp.gt.f32.partialorder %v6385_v60, 0.0  ;;  %v2156_v49 = vmul.f32 %v6042_v20, %v6385_v60  ;;  %v2199_v37 = vsel %vm2131_vm8, %v6380_v25, %v2167_v48  ;;  %v6396_v43 = vld [vmem:[#allocation3 + $0x140] sm:$0xff]  ;;  %vm3667_vm8 = vcmask 523712  }
 0x3e0   : > { %2278 = vst.msk [vmem:[#allocation3 + $0x151] sm:$0xff] %vm2205_vm11, %v2199_v37 }
 0x3e1   : > { %v2188_v38 = vsel %vm2120_vm12, %v6385_v60, %v2156_v49  ;;  %v6399_v4 = vld [vmem:[#allocation3 + $0xc1] sm:$0xff]  ;;  %2343 = vst.msk [vmem:[#allocation4 + $0xd8] sm:$0xff] %vm2205_vm11, %v6396_v43  ;;  %v6505_v60 = vld [vmem:[#allocation3 + $0x109] sm:$0xff]  ;;  %vm3860_vm12 = vcmask 589312  }
 0x3e2   : > { %v6401_v7 = vld [vmem:[#allocation3 + $0xc0] sm:$0xff]  ;;  %2267 = vst.msk [vmem:[#allocation3 + $0xc9] sm:$0xff] %vm2205_vm11, %v2188_v38  ;;  %2444 = vrot.lane.b32.xlu2 %v6399_v4, %s4779_s8  ;;  %v2092_v9 = vpop.f32.mrf.mxu3 }
 0x3e3   : > { %v6409_v13 = vadd.f32 %v6033_v17, %v2092_v9  ;;  %2332 = vst.msk [vmem:[#allocation4 + $0x80] sm:$0xff] %vm2205_vm11, %v6401_v7 }
 0x3e4   : > { %v2065_v18 = vpop.f32.mrf.mxu0  ;;  %v2417_v23 = vpop.permute.xlu0 %2416 }
 0x3e5   : > { %7720 = vst [vmem:[#allocation30_spill] sm:$0xff] %v6409_v13  ;;  %v6414_v26 = vadd.f32 %v6033_v17, %v2065_v18  ;;  %vm2132_vm13 = vcmp.gt.f32.partialorder %v6409_v13, 0.0  ;;  %v2168_v59 = vmul.f32 %v6042_v20, %v6409_v13 }
 0x3e6   : > { %2511 = vst.msk [vmem:[#allocation4 + $0x10] sm:$0xff] %vm2508_vm14, %v2417_v23 }
 0x3e7   : > { %7721 = vst [vmem:[#allocation31_spill] sm:$0xff] %v6414_v26  ;;  %vm2121_vm15 = vcmp.gt.f32.partialorder %v6414_v26, 0.0  ;;  %v2157_v48 = vmul.f32 %v6042_v20, %v6414_v26  ;;  %v2200_v49 = vsel %vm2132_vm13, %v6409_v13, %v2168_v59  ;;  %v6424_v37 = vld [vmem:[#allocation3 + $0x150] sm:$0xff]  ;;  %vm3981_vm13 = vcmask 588800  }
 0x3e8   : > { %2279 = vst.msk [vmem:[#allocation3 + $0x159] sm:$0xff] %vm2205_vm11, %v2200_v49 }
 0x3e9   : > { %v2189_v38 = vsel %vm2121_vm15, %v6414_v26, %v2157_v48  ;;  %v6428_v9 = vld [vmem:[#allocation3 + $0xc9] sm:$0xff]  ;;  %2344 = vst.msk [vmem:[#allocation4 + $0xe0] sm:$0xff] %vm2205_vm11, %v6424_v37 }
 0x3ea   : > { %2268 = vst.msk [vmem:[#allocation3 + $0xd9] sm:$0xff] %vm2205_vm11, %v2189_v38  ;;  %2446 = vrot.lane.b32.xlu0 %v6428_v9, %s4779_s8  ;;  %v2095_v18 = vpop.f32.mrf.mxu3  ;;  %v6435_v23 = vld [vmem:[#allocation3 + $0xc8] sm:$0xff] }
 0x3eb   : > { %v6438_v59 = vadd.f32 %v6033_v17, %v2095_v18  ;;  %2333 = vst.msk [vmem:[#allocation4 + $0x88] sm:$0xff] %vm2205_vm11, %v6435_v23 }
 0x3ec   : > { %v2067_v48 = vpop.f32.mrf.mxu0  ;;  %v2419_v49 = vpop.permute.xlu1 %2418 }
 0x3ed   : > { %7722 = vst [vmem:[#allocation32_spill] sm:$0xff] %v6438_v59  ;;  %v6443_v13 = vadd.f32 %v6033_v17, %v2067_v48  ;;  %vm2133_vm0 = vcmp.gt.f32.partialorder %v6438_v59, 0.0  ;;  %v2169_v38 = vmul.f32 %v6042_v20, %v6438_v59 }
 0x3ee   : > { %2512 = vst.msk [vmem:[#allocation4 + $0x18] sm:$0xff] %vm2508_vm14, %v2419_v49  ;;  %v6459_v49 = vld [vmem:[#allocation3 + $0xf1] sm:$0xff] }
 0x3ef   : > { %7723 = vst [vmem:[#allocation33_spill] sm:$0xff] %v6443_v13  ;;  %vm2122_vm1 = vcmp.gt.f32.partialorder %v6443_v13, 0.0  ;;  %v2158_v18 = vmul.f32 %v6042_v20, %v6443_v13  ;;  %v2201_v31 = vsel %vm2133_vm0, %v6438_v59, %v2169_v38  ;;  %v6454_v25 = vld [vmem:[#allocation3 + $0x158] sm:$0xff] }
 0x3f0   : > { %2280 = vst.msk [vmem:[#allocation3 + $0x169] sm:$0xff] %vm2205_vm11, %v2201_v31  ;;  %v6528_v26 = vld [vmem:[#allocation3 + $0x159] sm:$0xff] }
 0x3f1   : > { %v2190_v48 = vsel %vm2122_vm1, %v6443_v13, %v2158_v18  ;;  %v6457_v1 = vld [vmem:[#allocation3 + $0xd9] sm:$0xff]  ;;  %2345 = vst.msk [vmem:[#allocation4 + $0xe8] sm:$0xff] %vm2205_vm11, %v6454_v25  ;;  %v6507_v13 = vld [vmem:[#allocation3 + $0x121] sm:$0xff] }
 0x3f2   : > { %v6461_v0 = vld [vmem:[#allocation3 + $0xd8] sm:$0xff]  ;;  %2269 = vst.msk [vmem:[#allocation3 + $0xe1] sm:$0xff] %vm2205_vm11, %v2190_v48  ;;  %2448 = vrot.lane.b32.xlu1 %v6457_v1, %s4779_s8  ;;  %2452 = vrot.lane.b32.xlu0 %v6459_v49, %s4779_s8  ;;  %v2097_v31 = vpop.f32.mrf.mxu3 }
 0x3f3   : > { %v6471_v38 = vadd.f32 %v6033_v17, %v2097_v31  ;;  %2334 = vst.msk [vmem:[#allocation4 + $0x90] sm:$0xff] %vm2205_vm11, %v6461_v0  ;;  %v6485_v31 = vld [vmem:[#allocation3 + $0xf9] sm:$0xff] }
 0x3f4   : > { %v2427_v18 = vpop.permute.xlu2 %2426 }
 0x3f5   : > { %7724 = vst [vmem:[#allocation34_spill] sm:$0xff] %v6471_v38  ;;  %vm2134_vm2 = vcmp.gt.f32.partialorder %v6471_v38, 0.0  ;;  %v2170_v48 = vmul.f32 %v6042_v20, %v6471_v38 }
 0x3f6   : > { %2516 = vst.msk [vmem:[#allocation4 + $0x38] sm:$0xff] %vm2508_vm14, %v2427_v18  ;;  %v6493_v18 = vld [vmem:[#allocation3 + $0x111] sm:$0xff] }
 0x3f7   : > { %v2202_v59 = vsel %vm2134_vm2, %v6471_v38, %v2170_v48  ;;  %v6480_v15 = vld [vmem:[#allocation3 + $0x168] sm:$0xff]  ;;  %v1921_v38 = vld [vmem:[#allocation2 + $0xf0] sm:$0xff] }
 0x3f8   : > { %2281 = vst.msk [vmem:[#allocation3 + $0x171] sm:$0xff] %vm2205_vm11, %v2202_v59  ;;  %v1938_v58 = vpack.c.bf16 %v1922_v41, %v1921_v38  ;;  %v6522_v38 = vld [vmem:[#allocation3 + $0x141] sm:$0xff]  ;;  %v6535_v55 = vld [vmem:[#allocation3 + $0x169] sm:$0xff] }
 0x3f9   : > { %v6483_v35 = vld [vmem:[#allocation3 + $0xe1] sm:$0xff]  ;;  %2346 = vst.msk [vmem:[#allocation4 + $0xf0] sm:$0xff] %vm2205_vm11, %v6480_v15 }
 0x3fa   : > { %2450 = vrot.lane.b32.xlu2 %v6483_v35, %s4779_s8  ;;  %2454 = vrot.lane.b32.xlu1 %v6485_v31, %s4779_s8  ;;  %v6495_v48 = vld [vmem:[#allocation3 + $0xe0] sm:$0xff] }
 0x3fb   : > { %2458 = vrot.lane.b32.xlu0 %v6493_v18, %s4779_s8  ;;  %2335 = vst.msk [vmem:[#allocation4 + $0x98] sm:$0xff] %vm2205_vm11, %v6495_v48  ;;  %4693 = vmatmul.msk.bf16.gmra.mxu3 %vm1963_vm10, %v1938_v58  ;;  %v6520_v58 = vld [vmem:[#allocation3 + $0x129] sm:$0xff]  ;;  %vm2701_vm10 = vcmask 195712  }
 0x3fc   : > { %v2423_v59 = vpop.permute.xlu0 %2422 }
 0x3fd   : > { %2514 = vst.msk [vmem:[#allocation4 + $0x28] sm:$0xff] %vm2508_vm14, %v2423_v59  ;;  %v6515_v59 = vld [vmem:[#allocation3 + $0x139] sm:$0xff] }
 0x3ff   : > { %v6503_v10 = vld [vmem:[#allocation3 + $0x170] sm:$0xff] }
 0x400   : > { %2347 = vst.msk [vmem:[#allocation4 + $0xf8] sm:$0xff] %vm2205_vm11, %v6503_v10  ;;  %v6543_v54 = vld [vmem:[#allocation3 + $0x171] sm:$0xff] }
 0x402   : > { %2456 = vrot.lane.b32.xlu2 %v6505_v60, %s4779_s8  ;;  %2460 = vrot.lane.b32.xlu1 %v6507_v13, %s4779_s8 }
 0x403   : > { %2464 = vrot.lane.b32.xlu0 %v6515_v59, %s4779_s8 }
 0x404   : > { %v2425_v41 = vpop.permute.xlu1 %2424 }
 0x405   : > { %2515 = vst.msk [vmem:[#allocation4 + $0x30] sm:$0xff] %vm2508_vm14, %v2425_v41  ;;  %v6533_v41 = vld [vmem:[#allocation3 + $0x151] sm:$0xff] }
 0x40a   : > { %2462 = vrot.lane.b32.xlu2 %v6520_v58, %s4779_s8  ;;  %2466 = vrot.lane.b32.xlu1 %v6522_v38, %s4779_s8 }
 0x40b   : > { %2470 = vrot.lane.b32.xlu0 %v6528_v26, %s4779_s8 }
 0x40c   : > { %v2433_v19 = vpop.permute.xlu2 %2432 }
 0x40d   : > { %2519 = vst.msk [vmem:[#allocation4 + $0x50] sm:$0xff] %vm2508_vm14, %v2433_v19  ;;  %v6548_v19 = vld [vmem:[#allocation3 + $0x22] sm:$0xff] }
 0x412   : > { %2468 = vrot.lane.b32.xlu2 %v6533_v41, %s4779_s8  ;;  %2472 = vrot.lane.b32.xlu1 %v6535_v55, %s4779_s8 }
 0x413   : > { %2605 = vrot.lane.b32.xlu0 %v2541_v2, %s4781_s10  ;;  %v6553_v2 = vld [vmem:[#allocation3 + $0x32] sm:$0xff] }
 0x414   : > { %v2429_v52 = vpop.permute.xlu0 %2428 }
 0x415   : > { %2517 = vst.msk [vmem:[#allocation4 + $0x40] sm:$0xff] %vm2508_vm14, %v2429_v52  ;;  %v6561_v52 = vld [vmem:[#allocation3 + $0x4a] sm:$0xff] }
 0x41a   : > { %2474 = vrot.lane.b32.xlu2 %v6543_v54, %s4779_s8  ;;  %2607 = vrot.lane.b32.xlu1 %v2542_v6, %s4781_s10 }
 0x41b   : > { %2611 = vrot.lane.b32.xlu0 %v6548_v19, %s4781_s10 }
 0x41c   : > { %v2431_v36 = vpop.permute.xlu1 %2430 }
 0x41d   : > { %2518 = vst.msk [vmem:[#allocation4 + $0x48] sm:$0xff] %vm2508_vm14, %v2431_v36  ;;  %v6568_v36 = vld [vmem:[#allocation3 + $0x3a] sm:$0xff] }
 0x422   : > { %2613 = vrot.lane.b32.xlu1 %v6553_v2, %s4781_s10  ;;  %2609 = vrot.lane.b32.xlu2 %v6555_v11, %s4781_s10 }
 0x423   : > { %2617 = vrot.lane.b32.xlu0 %v6561_v52, %s4781_s10 }
 0x424   : > { %v2439_v6 = vpop.permute.xlu2 %2438 }
 0x425   : > { %2522 = vst.msk [vmem:[#allocation4 + $0x68] sm:$0xff] %vm2508_vm14, %v2439_v6  ;;  %v6581_v6 = vld [vmem:[#allocation3 + $0x62] sm:$0xff] }
 0x42a   : > { %2619 = vrot.lane.b32.xlu1 %v6566_v63, %s4781_s10  ;;  %2615 = vrot.lane.b32.xlu2 %v6568_v36, %s4781_s10 }
 0x42b   : > { %2623 = vrot.lane.b32.xlu0 %v6574_v53, %s4781_s10  ;;  %v6660_v53 = vld [vmem:[#allocation3 + $0x13a] sm:$0xff] }
 0x42c   : > { %v2435_v42 = vpop.permute.xlu0 %2434 }
 0x42d   : > { %2520 = vst.msk [vmem:[#allocation4 + $0x58] sm:$0xff] %vm2508_vm14, %v2435_v42  ;;  %v6594_v42 = vld [vmem:[#allocation3 + $0x82] sm:$0xff] }
 0x42e   : > { %7730 = vst [vmem:[#allocation40_spill] sm:$0xff] %v6594_v42 }
 0x432   : > { %2625 = vrot.lane.b32.xlu1 %v6579_v56, %s4781_s10  ;;  %2621 = vrot.lane.b32.xlu2 %v6581_v6, %s4781_s10  ;;  %v6600_v56 = vld [vmem:[#allocation3 + $0xb2] sm:$0xff] }
 0x433   : > { %2629 = vrot.lane.b32.xlu0 %v6587_v45, %s4781_s10  ;;  %7731 = vst [vmem:[#allocation41_spill] sm:$0xff] %v6600_v56  ;;  %v6605_v45 = vld [vmem:[#allocation3 + $0xc2] sm:$0xff] }
 0x434   : > { %v2437_v27 = vpop.permute.xlu1 %2436  ;;  %7732 = vst [vmem:[#allocation42_spill] sm:$0xff] %v6605_v45 }
 0x435   : > { %2521 = vst.msk [vmem:[#allocation4 + $0x60] sm:$0xff] %vm2508_vm14, %v2437_v27  ;;  %v6607_v27 = vld [vmem:[#allocation3 + $0xaa] sm:$0xff] }
 0x436   : > { %7733 = vst [vmem:[#allocation43_spill] sm:$0xff] %v6607_v27 }
 0x43a   : > { %2631 = vrot.lane.b32.xlu1 %v6592_v33, %s4781_s10  ;;  %2627 = vrot.lane.b32.xlu2 %v6594_v42, %s4781_s10  ;;  %v6613_v33 = vld [vmem:[#allocation3 + $0xda] sm:$0xff] }
 0x43b   : > { %2635 = vrot.lane.b32.xlu0 %v6600_v56, %s4781_s10  ;;  %7734 = vst [vmem:[#allocation44_spill] sm:$0xff] %v6613_v33  ;;  %v6618_v56 = vld [vmem:[#allocation3 + $0xe2] sm:$0xff] }
 0x43c   : > { %v2445_v63 = vpop.permute.xlu2 %2444  ;;  %7735 = vst [vmem:[#allocation45_spill] sm:$0xff] %v6618_v56 }
 0x43d   : > { %2525 = vst.msk [vmem:[#allocation4 + $0x80] sm:$0xff] %vm2508_vm14, %v2445_v63  ;;  %v6620_v63 = vld [vmem:[#allocation3 + $0xca] sm:$0xff] }
 0x43e   : > { %7736 = vst [vmem:[#allocation46_spill] sm:$0xff] %v6620_v63 }
 0x442   : > { %2637 = vrot.lane.b32.xlu1 %v6605_v45, %s4781_s10  ;;  %2633 = vrot.lane.b32.xlu2 %v6607_v27, %s4781_s10  ;;  %v6626_v45 = vld [vmem:[#allocation3 + $0xfa] sm:$0xff] }
 0x443   : > { %2641 = vrot.lane.b32.xlu0 %v6613_v33, %s4781_s10  ;;  %7737 = vst [vmem:[#allocation47_spill] sm:$0xff] %v6626_v45  ;;  %v6631_v33 = vld [vmem:[#allocation3 + $0x10a] sm:$0xff] }
 0x444   : > { %v2441_v42 = vpop.permute.xlu0 %2440  ;;  %7738 = vst [vmem:[#allocation48_spill] sm:$0xff] %v6631_v33 }
 0x445   : > { %2523 = vst.msk [vmem:[#allocation4 + $0x70] sm:$0xff] %vm2508_vm14, %v2441_v42  ;;  %v6633_v42 = vld [vmem:[#allocation3 + $0xf2] sm:$0xff] }
 0x446   : > { %7739 = vst [vmem:[#allocation49_spill] sm:$0xff] %v6633_v42 }
 0x44a   : > { %2643 = vrot.lane.b32.xlu1 %v6618_v56, %s4781_s10  ;;  %2639 = vrot.lane.b32.xlu2 %v6620_v63, %s4781_s10  ;;  %v6639_v56 = vld [vmem:[#allocation3 + $0x122] sm:$0xff] }
 0x44b   : > { %2647 = vrot.lane.b32.xlu0 %v6626_v45, %s4781_s10  ;;  %7740 = vst [vmem:[#allocation50_spill] sm:$0xff] %v6639_v56  ;;  %v6644_v45 = vld [vmem:[#allocation3 + $0x12a] sm:$0xff] }
 0x44c   : > { %v2443_v27 = vpop.permute.xlu1 %2442  ;;  %7741 = vst [vmem:[#allocation51_spill] sm:$0xff] %v6644_v45 }
 0x44d   : > { %2524 = vst.msk [vmem:[#allocation4 + $0x78] sm:$0xff] %vm2508_vm14, %v2443_v27  ;;  %v6646_v27 = vld [vmem:[#allocation3 + $0x112] sm:$0xff] }
 0x44e   : > { %7742 = vst [vmem:[#allocation52_spill] sm:$0xff] %v6646_v27 }
 0x452   : > { %2649 = vrot.lane.b32.xlu1 %v6631_v33, %s4781_s10  ;;  %2645 = vrot.lane.b32.xlu2 %v6633_v42, %s4781_s10  ;;  %v6652_v33 = vld [vmem:[#allocation3 + $0x142] sm:$0xff] }
 0x453   : > { %2653 = vrot.lane.b32.xlu0 %v6639_v56, %s4781_s10  ;;  %7743 = vst [vmem:[#allocation53_spill] sm:$0xff] %v6652_v33 }
 0x454   : > { %v2451_v63 = vpop.permute.xlu2 %2450 }
 0x455   : > { %2528 = vst.msk [vmem:[#allocation4 + $0x98] sm:$0xff] %vm2508_vm14, %v2451_v63  ;;  %v6658_v63 = vld [vmem:[#allocation3 + $0x152] sm:$0xff] }
 0x456   : > { %7744 = vst [vmem:[#allocation54_spill] sm:$0xff] %v6658_v63 }
 0x45a   : > { %2655 = vrot.lane.b32.xlu1 %v6644_v45, %s4781_s10  ;;  %2651 = vrot.lane.b32.xlu2 %v6646_v27, %s4781_s10  ;;  %v6666_v45 = vld [vmem:[#allocation3 + $0x16a] sm:$0xff] }
 0x45b   : > { %2659 = vrot.lane.b32.xlu0 %v6652_v33, %s4781_s10  ;;  %7745 = vst [vmem:[#allocation55_spill] sm:$0xff] %v6666_v45 }
 0x45c   : > { %v2457_v42 = vpop.permute.xlu2 %2456  ;;  %v2447_v56 = vpop.permute.xlu0 %2446 }
 0x45d   : > { %2531 = vst.msk [vmem:[#allocation4 + $0xb0] sm:$0xff] %vm2508_vm14, %v2457_v42  ;;  %v6673_v42 = vld [vmem:[#allocation3 + $0x172] sm:$0xff] }
 0x45e   : > { %2526 = vst.msk [vmem:[#allocation4 + $0x88] sm:$0xff] %vm2508_vm14, %v2447_v56 }
 0x45f   : > { %7746 = vst [vmem:[#allocation56_spill] sm:$0xff] %v6673_v42 }
 0x462   : > { %2661 = vrot.lane.b32.xlu1 %v6658_v63, %s4781_s10  ;;  %2657 = vrot.lane.b32.xlu2 %v6660_v53, %s4781_s10  ;;  %v6675_v63 = vld [vmem:[#allocation3 + $0x15a] sm:$0xff] }
 0x463   : > { %2665 = vrot.lane.b32.xlu0 %v6666_v45, %s4781_s10 }
 0x464   : > { %v2463_v33 = vpop.permute.xlu2 %2462  ;;  %v2449_v27 = vpop.permute.xlu1 %2448 }
 0x465   : > { %2534 = vst.msk [vmem:[#allocation4 + $0xc8] sm:$0xff] %vm2508_vm14, %v2463_v33  ;;  %v2453_v56 = vpop.permute.xlu0 %2452 }
 0x466   : > { %2527 = vst.msk [vmem:[#allocation4 + $0x90] sm:$0xff] %vm2508_vm14, %v2449_v27 }
 0x467   : > { %2529 = vst.msk [vmem:[#allocation4 + $0xa0] sm:$0xff] %vm2508_vm14, %v2453_v56 }
 0x46a   : > { %2667 = vrot.lane.b32.xlu1 %v6673_v42, %s4781_s10  ;;  %2663 = vrot.lane.b32.xlu2 %v6675_v63, %s4781_s10 }
 0x46b   : > { %2800 = vrot.lane.b32.xlu0 %v6112_v30, %s4783_s12 }
 0x46c   : > { %v2469_v45 = vpop.permute.xlu2 %2468  ;;  %v2455_v33 = vpop.permute.xlu1 %2454 }
 0x46d   : > { %2537 = vst.msk [vmem:[#allocation4 + $0xe0] sm:$0xff] %vm2508_vm14, %v2469_v45  ;;  %v2459_v27 = vpop.permute.xlu0 %2458 }
 0x46e   : > { %2530 = vst.msk [vmem:[#allocation4 + $0xa8] sm:$0xff] %vm2508_vm14, %v2455_v33 }
 0x46f   : > { %2532 = vst.msk [vmem:[#allocation4 + $0xb8] sm:$0xff] %vm2508_vm14, %v2459_v27 }
 0x472   : > { %2802 = vrot.lane.b32.xlu1 %v6125_v3, %s4783_s12  ;;  %2798 = vrot.lane.b32.xlu2 %v6100_v28, %s4783_s12 }
 0x473   : > { %2806 = vrot.lane.b32.xlu0 %v6151_v62, %s4783_s12 }
 0x474   : > { %v2475_v56 = vpop.permute.xlu2 %2474  ;;  %v2461_v30 = vpop.permute.xlu1 %2460 }
 0x475   : > { %2540 = vst.msk [vmem:[#allocation4 + $0xf8] sm:$0xff] %vm2508_vm14, %v2475_v56  ;;  %v2465_v42 = vpop.permute.xlu0 %2464 }
 0x476   : > { %2533 = vst.msk [vmem:[#allocation4 + $0xc0] sm:$0xff] %vm2508_vm14, %v2461_v30 }
 0x477   : > { %2535 = vst.msk [vmem:[#allocation4 + $0xd0] sm:$0xff] %vm2508_vm14, %v2465_v42 }
 0x47a   : > { %2808 = vrot.lane.b32.xlu1 %v6164_v50, %s4783_s12  ;;  %2804 = vrot.lane.b32.xlu2 %v6138_v47, %s4783_s12 }
 0x47b   : > { %2812 = vrot.lane.b32.xlu0 %v6208_v21, %s4783_s12 }
 0x47c   : > { %v2467_v45 = vpop.permute.xlu1 %2466  ;;  %v2610_v28 = vpop.permute.xlu2 %2609 }
 0x47d   : > { %2536 = vst.msk [vmem:[#allocation4 + $0xd8] sm:$0xff] %vm2508_vm14, %v2467_v45  ;;  %v2471_v3 = vpop.permute.xlu0 %2470 }
 0x47e   : > { %2704 = vst.msk [vmem:[#allocation4 + $0x10] sm:$0xff] %vm2701_vm10, %v2610_v28  ;;  %v2100_v47 = vpop.f32.mrf.mxu3 }
 0x47f   : > { %2538 = vst.msk [vmem:[#allocation4 + $0xe8] sm:$0xff] %vm2508_vm14, %v2471_v3  ;;  %v6711_v21 = vadd.f32 %v6033_v17, %v2100_v47 }
 0x481   : > { %vm2135_vm9 = vcmp.gt.f32.partialorder %v6711_v21, 0.0 }
 0x482   : > { %2814 = vrot.lane.b32.xlu1 %v6234_v29, %s4783_s12  ;;  %2810 = vrot.lane.b32.xlu2 %v6185_v8, %s4783_s12  ;;  %v2171_v29 = vmul.f32 %v6042_v20, %v6711_v21 }
 0x483   : > { %2818 = vrot.lane.b32.xlu0 %v6287_v12, %s4783_s12 }
 0x484   : > { %v2473_v62 = vpop.permute.xlu1 %2472  ;;  %v2616_v50 = vpop.permute.xlu2 %2615  ;;  %v2203_v8 = vsel %vm2135_vm9, %v6711_v21, %v2171_v29 }
 0x485   : > { %2539 = vst.msk [vmem:[#allocation4 + $0xf0] sm:$0xff] %vm2508_vm14, %v2473_v62  ;;  %v2606_v42 = vpop.permute.xlu0 %2605 }
 0x486   : > { %2707 = vst.msk [vmem:[#allocation4 + $0x28] sm:$0xff] %vm2701_vm10, %v2616_v50  ;;  %v2102_v12 = vpop.f32.mrf.mxu3 }
 0x487   : > { %2702 = vst.msk [vmem:[#allocation4] sm:$0xff] %vm2701_vm10, %v2606_v42  ;;  %v6728_v56 = vadd.f32 %v6033_v17, %v2102_v12  ;;  %v2927_v12 = vld [vmem:[#allocation3 + $0x19] sm:$0xff] }
 0x488   : > { %2282 = vst.msk [vmem:[#allocation3 + $0x181] sm:$0xff] %vm2205_vm11, %v2203_v8 }
 0x489   : > { %vm2136_vm14 = vcmp.gt.f32.partialorder %v6728_v56, 0.0 }
 0x48a   : > { %2820 = vrot.lane.b32.xlu1 %v6314_v39, %s4783_s12  ;;  %2816 = vrot.lane.b32.xlu2 %v6261_v51, %s4783_s12  ;;  %v2172_v39 = vmul.f32 %v6042_v20, %v6728_v56 }
 0x48b   : > { %2824 = vrot.lane.b32.xlu0 %v6377_v24, %s4783_s12 }
 0x48c   : > { %v2608_v33 = vpop.permute.xlu1 %2607  ;;  %v2622_v27 = vpop.permute.xlu2 %2621  ;;  %v2204_v51 = vsel %vm2136_vm14, %v6728_v56, %v2172_v39  ;;  %v6800_v39 = vld [vmem:[#allocation3 + $0x39] sm:$0xff] }
 0x48d   : > { %2703 = vst.msk [vmem:[#allocation4 + $0x8] sm:$0xff] %vm2701_vm10, %v2608_v33  ;;  %v2612_v30 = vpop.permute.xlu0 %2611 }
 0x48e   : > { %2710 = vst.msk [vmem:[#allocation4 + $0x40] sm:$0xff] %vm2701_vm10, %v2622_v27 }
 0x48f   : > { %2705 = vst.msk [vmem:[#allocation4 + $0x18] sm:$0xff] %vm2701_vm10, %v2612_v30  ;;  %v2764_v33 = vld [vmem:[#allocation3 + $0x180] sm:$0xff] }
 0x490   : > { %2283 = vst.msk [vmem:[#allocation3 + $0x189] sm:$0xff] %vm2205_vm11, %v2204_v51  ;;  %v2928_v51 = vld [vmem:[#allocation3 + $0x21] sm:$0xff] }
 0x492   : > { %2826 = vrot.lane.b32.xlu1 %v6401_v7, %s4783_s12  ;;  %2822 = vrot.lane.b32.xlu2 %v6344_v40, %s4783_s12 }
 0x493   : > { %2830 = vrot.lane.b32.xlu0 %v6461_v0, %s4783_s12 }
 0x494   : > { %v2614_v17 = vpop.permute.xlu1 %2613  ;;  %v2628_v24 = vpop.permute.xlu2 %2627 }
 0x495   : > { %2706 = vst.msk [vmem:[#allocation4 + $0x20] sm:$0xff] %vm2701_vm10, %v2614_v17  ;;  %v2618_v20 = vpop.permute.xlu0 %2617  ;;  %v6805_v17 = vld [vmem:[#allocation3 + $0x51] sm:$0xff] }
 0x496   : > { %2713 = vst.msk [vmem:[#allocation4 + $0x58] sm:$0xff] %vm2701_vm10, %v2628_v24 }
 0x497   : > { %2708 = vst.msk [vmem:[#allocation4 + $0x30] sm:$0xff] %vm2701_vm10, %v2618_v20 }
 0x49a   : > { %2832 = vrot.lane.b32.xlu1 %v6495_v48, %s4783_s12  ;;  %2828 = vrot.lane.b32.xlu2 %v6435_v23, %s4783_s12 }
 0x49b   : > { %2836 = vrot.lane.b32.xlu0 %v6231_v34, %s4783_s12 }
 0x49c   : > { %v2620_v40 = vpop.permute.xlu1 %2619  ;;  %v2634_v7 = vpop.permute.xlu2 %2633 }
 0x49d   : > { %2709 = vst.msk [vmem:[#allocation4 + $0x38] sm:$0xff] %vm2701_vm10, %v2620_v40  ;;  %v2624_v45 = vpop.permute.xlu0 %2623 }
 0x49e   : > { %2716 = vst.msk [vmem:[#allocation4 + $0x70] sm:$0xff] %vm2701_vm10, %v2634_v7  ;;  %v6812_v7 = vld [vmem:[#allocation3 + $0x61] sm:$0xff] }
 0x49f   : > { %2711 = vst.msk [vmem:[#allocation4 + $0x48] sm:$0xff] %vm2701_vm10, %v2624_v45  ;;  %v6814_v45 = vld [vmem:[#allocation3 + $0x49] sm:$0xff] }
 0x4a2   : > { %2838 = vrot.lane.b32.xlu1 %v6257_v44, %s4783_s12  ;;  %2834 = vrot.lane.b32.xlu2 %v6204_v16, %s4783_s12 }
 0x4a3   : > { %2842 = vrot.lane.b32.xlu0 %v6316_v46, %s4783_s12 }
 0x4a4   : > { %v2626_v48 = vpop.permute.xlu1 %2625  ;;  %v2640_v28 = vpop.permute.xlu2 %2639 }
 0x4a5   : > { %2712 = vst.msk [vmem:[#allocation4 + $0x50] sm:$0xff] %vm2701_vm10, %v2626_v48  ;;  %v2630_v3 = vpop.permute.xlu0 %2629  ;;  %v6820_v48 = vld [vmem:[#allocation3 + $0x79] sm:$0xff] }
 0x4a6   : > { %2719 = vst.msk [vmem:[#allocation4 + $0x88] sm:$0xff] %vm2701_vm10, %v2640_v28 }
 0x4a7   : > { %2714 = vst.msk [vmem:[#allocation4 + $0x60] sm:$0xff] %vm2701_vm10, %v2630_v3 }
 0x4aa   : > { %2844 = vrot.lane.b32.xlu1 %v6339_v32, %s4783_s12  ;;  %2840 = vrot.lane.b32.xlu2 %v6284_v5, %s4783_s12 }
 0x4ab   : > { %2848 = vrot.lane.b32.xlu0 %v6396_v43, %s4783_s12 }
 0x4ac   : > { %v2632_v44 = vpop.permute.xlu1 %2631  ;;  %v2646_v47 = vpop.permute.xlu2 %2645 }
 0x4ad   : > { %2715 = vst.msk [vmem:[#allocation4 + $0x68] sm:$0xff] %vm2701_vm10, %v2632_v44  ;;  %v2636_v62 = vpop.permute.xlu0 %2635 }
 0x4ae   : > { %2722 = vst.msk [vmem:[#allocation4 + $0xa0] sm:$0xff] %vm2701_vm10, %v2646_v47  ;;  %v6827_v47 = vld [vmem:[#allocation3 + $0x81] sm:$0xff] }
 0x4af   : > { %2717 = vst.msk [vmem:[#allocation4 + $0x78] sm:$0xff] %vm2701_vm10, %v2636_v62  ;;  %v6829_v62 = vld [vmem:[#allocation3 + $0x69] sm:$0xff] }
 0x4b2   : > { %2850 = vrot.lane.b32.xlu1 %v6424_v37, %s4783_s12  ;;  %2846 = vrot.lane.b32.xlu2 %v6366_v14, %s4783_s12  ;;  %v2765_v37 = vld [vmem:[#allocation3 + $0x188] sm:$0xff] }
 0x4b3   : > { %2854 = vrot.lane.b32.xlu0 %v6480_v15, %s4783_s12 }
 0x4b4   : > { %v2638_v32 = vpop.permute.xlu1 %2637  ;;  %v2652_v50 = vpop.permute.xlu2 %2651 }
 0x4b5   : > { %2718 = vst.msk [vmem:[#allocation4 + $0x80] sm:$0xff] %vm2701_vm10, %v2638_v32  ;;  %v2642_v42 = vpop.permute.xlu0 %2641 }
 0x4b6   : > { %2725 = vst.msk [vmem:[#allocation4 + $0xb8] sm:$0xff] %vm2701_vm10, %v2652_v50 }
 0x4b7   : > { %2720 = vst.msk [vmem:[#allocation4 + $0x90] sm:$0xff] %vm2701_vm10, %v2642_v42 }
 0x4ba   : > { %2856 = vrot.lane.b32.xlu1 %v6503_v10, %s4783_s12  ;;  %2852 = vrot.lane.b32.xlu2 %v6454_v25, %s4783_s12  ;;  %v6793_v10 = vld [vmem:[#allocation3 + $0x31] sm:$0xff] }
 0x4bb   : > { %2860 = vrot.lane.b32.xlu0 %v2765_v37, %s4783_s12  ;;  %v6840_v37 = vld [vmem:[#allocation3 + $0x91] sm:$0xff] }
 0x4bc   : > { %v2644_v29 = vpop.permute.xlu1 %2643  ;;  %v2658_v15 = vpop.permute.xlu2 %2657 }
 0x4bd   : > { %2721 = vst.msk [vmem:[#allocation4 + $0x98] sm:$0xff] %vm2701_vm10, %v2644_v29  ;;  %v2648_v8 = vpop.permute.xlu0 %2647 }
 0x4be   : > { %2728 = vst.msk [vmem:[#allocation4 + $0xd0] sm:$0xff] %vm2701_vm10, %v2658_v15 }
 0x4bf   : > { %2723 = vst.msk [vmem:[#allocation4 + $0xa8] sm:$0xff] %vm2701_vm10, %v2648_v8 }
 0x4c2   : > { %2991 = vrot.lane.b32.xlu1 %v2927_v12, %s4785_s14  ;;  %2858 = vrot.lane.b32.xlu2 %v2764_v33, %s4783_s12  ;;  %v6896_v12 = vld [vmem:[#allocation3 + $0x181] sm:$0xff]  ;;  %v6907_v33 = vld [vmem:[#allocation3 + $0x189] sm:$0xff] }
 0x4c3   : > { %2995 = vrot.lane.b32.xlu0 %v6793_v10, %s4785_s14 }
 0x4c4   : > { %v2650_v25 = vpop.permute.xlu1 %2649  ;;  %v2664_v27 = vpop.permute.xlu2 %2663 }
 0x4c5   : > { %2724 = vst.msk [vmem:[#allocation4 + $0xb0] sm:$0xff] %vm2701_vm10, %v2650_v25  ;;  %v2654_v30 = vpop.permute.xlu0 %2653 }
 0x4c6   : > { %2731 = vst.msk [vmem:[#allocation4 + $0xe8] sm:$0xff] %vm2701_vm10, %v2664_v27 }
 0x4c7   : > { %2726 = vst.msk [vmem:[#allocation4 + $0xc0] sm:$0xff] %vm2701_vm10, %v2654_v30  ;;  %v7747_v30 = vld [vmem:[#allocation36_spill] sm:$0xff] }
 0x4ca   : > { %2997 = vrot.lane.b32.xlu1 %v6800_v39, %s4785_s14  ;;  %2993 = vrot.lane.b32.xlu2 %v2928_v51, %s4785_s14 }
 0x4cb   : > { %3001 = vrot.lane.b32.xlu0 %v6805_v17, %s4785_s14 }
 0x4cc   : > { %v2656_v24 = vpop.permute.xlu1 %2655  ;;  %v2799_v20 = vpop.permute.xlu2 %2798 }
 0x4cd   : > { %2727 = vst.msk [vmem:[#allocation4 + $0xc8] sm:$0xff] %vm2701_vm10, %v2656_v24  ;;  %v2660_v40 = vpop.permute.xlu0 %2659 }
 0x4ce   : > { %2895 = vst.msk [vmem:[#allocation4] sm:$0xff] %vm2894_vm3, %v2799_v20  ;;  %v7750_v20 = vld [vmem:[#allocation38_spill] sm:$0xff] }
 0x4cf   : > { %2729 = vst.msk [vmem:[#allocation4 + $0xd8] sm:$0xff] %vm2701_vm10, %v2660_v40  ;;  %v7751_v40 = vld [vmem:[#allocation37_spill] sm:$0xff] }
 0x4d2   : > { %3003 = vrot.lane.b32.xlu1 %v6812_v7, %s4785_s14  ;;  %2999 = vrot.lane.b32.xlu2 %v6814_v45, %s4785_s14 }
 0x4d3   : > { %3007 = vrot.lane.b32.xlu0 %v6820_v48, %s4785_s14 }
 0x4d4   : > { %v2662_v28 = vpop.permute.xlu1 %2661  ;;  %v2805_v3 = vpop.permute.xlu2 %2804 }
 0x4d5   : > { %2730 = vst.msk [vmem:[#allocation4 + $0xe0] sm:$0xff] %vm2701_vm10, %v2662_v28  ;;  %v2666_v44 = vpop.permute.xlu0 %2665  ;;  %v7752_v28 = vld [vmem:[#allocation43_spill] sm:$0xff] }
 0x4d6   : > { %2898 = vst.msk [vmem:[#allocation4 + $0x18] sm:$0xff] %vm2894_vm3, %v2805_v3 }
 0x4d7   : > { %2732 = vst.msk [vmem:[#allocation4 + $0xf0] sm:$0xff] %vm2701_vm10, %v2666_v44 }
 0x4da   : > { %3009 = vrot.lane.b32.xlu1 %v6827_v47, %s4785_s14  ;;  %3005 = vrot.lane.b32.xlu2 %v6829_v62, %s4785_s14 }
 0x4db   : > { %3013 = vrot.lane.b32.xlu0 %v6311_v61, %s4785_s14 }
 0x4dc   : > { %v2668_v32 = vpop.permute.xlu1 %2667  ;;  %v2811_v50 = vpop.permute.xlu2 %2810 }
 0x4dd   : > { %2733 = vst.msk [vmem:[#allocation4 + $0xf8] sm:$0xff] %vm2701_vm10, %v2668_v32  ;;  %v2801_v42 = vpop.permute.xlu0 %2800 }
 0x4de   : > { %2901 = vst.msk [vmem:[#allocation4 + $0x30] sm:$0xff] %vm2894_vm3, %v2811_v50  ;;  %v7753_v50 = vld [vmem:[#allocation41_spill] sm:$0xff] }
 0x4df   : > { %2896 = vst.msk [vmem:[#allocation4 + $0x8] sm:$0xff] %vm2894_vm3, %v2801_v42  ;;  %v7754_v42 = vld [vmem:[#allocation39_spill] sm:$0xff] }
 0x4e2   : > { %3015 = vrot.lane.b32.xlu1 %v6342_v57, %s4785_s14  ;;  %3011 = vrot.lane.b32.xlu2 %v6840_v37, %s4785_s14 }
 0x4e3   : > { %3019 = vrot.lane.b32.xlu0 %v6399_v4, %s4785_s14 }
 0x4e4   : > { %v2803_v61 = vpop.permute.xlu1 %2802  ;;  %v2817_v29 = vpop.permute.xlu2 %2816 }
 0x4e5   : > { %2897 = vst.msk [vmem:[#allocation4 + $0x10] sm:$0xff] %vm2894_vm3, %v2803_v61  ;;  %v2807_v15 = vpop.permute.xlu0 %2806  ;;  %v7755_v61 = vld [vmem:[#allocation46_spill] sm:$0xff] }
 0x4e6   : > { %2904 = vst.msk [vmem:[#allocation4 + $0x48] sm:$0xff] %vm2894_vm3, %v2817_v29 }
 0x4e7   : > { %2899 = vst.msk [vmem:[#allocation4 + $0x20] sm:$0xff] %vm2894_vm3, %v2807_v15 }
 0x4ea   : > { %3021 = vrot.lane.b32.xlu1 %v6428_v9, %s4785_s14  ;;  %3017 = vrot.lane.b32.xlu2 %v6370_v22, %s4785_s14 }
 0x4eb   : > { %3025 = vrot.lane.b32.xlu0 %v6483_v35, %s4785_s14 }
 0x4ec   : > { %v2809_v57 = vpop.permute.xlu1 %2808  ;;  %v2823_v4 = vpop.permute.xlu2 %2822 }
 0x4ed   : > { %2900 = vst.msk [vmem:[#allocation4 + $0x28] sm:$0xff] %vm2894_vm3, %v2809_v57  ;;  %v2813_v8 = vpop.permute.xlu0 %2812 }
 0x4ee   : > { %2907 = vst.msk [vmem:[#allocation4 + $0x60] sm:$0xff] %vm2894_vm3, %v2823_v4  ;;  %v7756_v4 = vld [vmem:[#allocation44_spill] sm:$0xff] }
 0x4ef   : > { %2902 = vst.msk [vmem:[#allocation4 + $0x38] sm:$0xff] %vm2894_vm3, %v2813_v8  ;;  %v7757_v8 = vld [vmem:[#allocation42_spill] sm:$0xff] }
 0x4f2   : > { %3027 = vrot.lane.b32.xlu1 %v6459_v49, %s4785_s14  ;;  %3023 = vrot.lane.b32.xlu2 %v6457_v1, %s4785_s14 }
 0x4f3   : > { %3031 = vrot.lane.b32.xlu0 %v6505_v60, %s4785_s14 }
 0x4f4   : > { %v2815_v22 = vpop.permute.xlu1 %2814  ;;  %v2829_v35 = vpop.permute.xlu2 %2828 }
 0x4f5   : > { %2903 = vst.msk [vmem:[#allocation4 + $0x40] sm:$0xff] %vm2894_vm3, %v2815_v22  ;;  %v2819_v9 = vpop.permute.xlu0 %2818  ;;  %v7758_v22 = vld [vmem:[#allocation49_spill] sm:$0xff] }
 0x4f6   : > { %2910 = vst.msk [vmem:[#allocation4 + $0x78] sm:$0xff] %vm2894_vm3, %v2829_v35 }
 0x4f7   : > { %2905 = vst.msk [vmem:[#allocation4 + $0x50] sm:$0xff] %vm2894_vm3, %v2819_v9 }
 0x4fa   : > { %3033 = vrot.lane.b32.xlu1 %v6493_v18, %s4785_s14  ;;  %3029 = vrot.lane.b32.xlu2 %v6485_v31, %s4785_s14 }
 0x4fb   : > { %3037 = vrot.lane.b32.xlu0 %v6520_v58, %s4785_s14 }
 0x4fc   : > { %v2821_v1 = vpop.permute.xlu1 %2820  ;;  %v2835_v60 = vpop.permute.xlu2 %2834 }
 0x4fd   : > { %2906 = vst.msk [vmem:[#allocation4 + $0x58] sm:$0xff] %vm2894_vm3, %v2821_v1  ;;  %v2825_v49 = vpop.permute.xlu0 %2824 }
 0x4fe   : > { %2913 = vst.msk [vmem:[#allocation4 + $0x90] sm:$0xff] %vm2894_vm3, %v2835_v60  ;;  %v7759_v60 = vld [vmem:[#allocation47_spill] sm:$0xff] }
 0x4ff   : > { %2908 = vst.msk [vmem:[#allocation4 + $0x68] sm:$0xff] %vm2894_vm3, %v2825_v49  ;;  %v7760_v49 = vld [vmem:[#allocation45_spill] sm:$0xff] }
 0x502   : > { %3039 = vrot.lane.b32.xlu1 %v6515_v59, %s4785_s14  ;;  %3035 = vrot.lane.b32.xlu2 %v6507_v13, %s4785_s14 }
 0x503   : > { %3043 = vrot.lane.b32.xlu0 %v6533_v41, %s4785_s14 }
 0x504   : > { %v2827_v31 = vpop.permute.xlu1 %2826  ;;  %v2841_v18 = vpop.permute.xlu2 %2840 }
 0x505   : > { %2909 = vst.msk [vmem:[#allocation4 + $0x70] sm:$0xff] %vm2894_vm3, %v2827_v31  ;;  %v2831_v58 = vpop.permute.xlu0 %2830  ;;  %v7761_v31 = vld [vmem:[#allocation52_spill] sm:$0xff] }
 0x506   : > { %2916 = vst.msk [vmem:[#allocation4 + $0xa8] sm:$0xff] %vm2894_vm3, %v2841_v18 }
 0x507   : > { %2911 = vst.msk [vmem:[#allocation4 + $0x80] sm:$0xff] %vm2894_vm3, %v2831_v58 }
 0x50a   : > { %3045 = vrot.lane.b32.xlu1 %v6528_v26, %s4785_s14  ;;  %3041 = vrot.lane.b32.xlu2 %v6522_v38, %s4785_s14 }
 0x50b   : > { %3049 = vrot.lane.b32.xlu0 %v6543_v54, %s4785_s14 }
 0x50c   : > { %v2833_v13 = vpop.permute.xlu1 %2832  ;;  %v2847_v59 = vpop.permute.xlu2 %2846 }
 0x50d   : > { %2912 = vst.msk [vmem:[#allocation4 + $0x88] sm:$0xff] %vm2894_vm3, %v2833_v13  ;;  %v2837_v41 = vpop.permute.xlu0 %2836 }
 0x50e   : > { %2919 = vst.msk [vmem:[#allocation4 + $0xc0] sm:$0xff] %vm2894_vm3, %v2847_v59  ;;  %v7762_v59 = vld [vmem:[#allocation50_spill] sm:$0xff] }
 0x50f   : > { %2914 = vst.msk [vmem:[#allocation4 + $0x98] sm:$0xff] %vm2894_vm3, %v2837_v41  ;;  %v7763_v41 = vld [vmem:[#allocation48_spill] sm:$0xff] }
 0x512   : > { %3051 = vrot.lane.b32.xlu1 %v6896_v12, %s4785_s14  ;;  %3047 = vrot.lane.b32.xlu2 %v6535_v55, %s4785_s14 }
 0x513   : > { %3184 = vrot.lane.b32.xlu0 %v6555_v11, %s4787_s27 }
 0x514   : > { %v2839_v54 = vpop.permute.xlu1 %2838  ;;  %v2853_v26 = vpop.permute.xlu2 %2852 }
 0x515   : > { %2915 = vst.msk [vmem:[#allocation4 + $0xa0] sm:$0xff] %vm2894_vm3, %v2839_v54  ;;  %v2843_v38 = vpop.permute.xlu0 %2842 }
 0x516   : > { %2922 = vst.msk [vmem:[#allocation4 + $0xd8] sm:$0xff] %vm2894_vm3, %v2853_v26 }
 0x517   : > { %2917 = vst.msk [vmem:[#allocation4 + $0xb0] sm:$0xff] %vm2894_vm3, %v2843_v38 }
 0x51a   : > { %3186 = vrot.lane.b32.xlu1 %v6548_v19, %s4787_s27  ;;  %3053 = vrot.lane.b32.xlu2 %v6907_v33, %s4785_s14 }
 0x51b   : > { %3190 = vrot.lane.b32.xlu0 %v6568_v36, %s4787_s27 }
 0x51c   : > { %v2845_v11 = vpop.permute.xlu1 %2844  ;;  %v2859_v55 = vpop.permute.xlu2 %2858 }
 0x51d   : > { %2918 = vst.msk [vmem:[#allocation4 + $0xb8] sm:$0xff] %vm2894_vm3, %v2845_v11  ;;  %v2849_v25 = vpop.permute.xlu0 %2848  ;;  %v7764_v11 = vld [vmem:[#allocation53_spill] sm:$0xff] }
 0x51e   : > { %2925 = vst.msk [vmem:[#allocation4 + $0xf0] sm:$0xff] %vm2894_vm3, %v2859_v55  ;;  %v7765_v55 = vld [vmem:[#allocation51_spill] sm:$0xff] }
 0x51f   : > { %2920 = vst.msk [vmem:[#allocation4 + $0xc8] sm:$0xff] %vm2894_vm3, %v2849_v25 }
 0x522   : > { %3192 = vrot.lane.b32.xlu1 %v6561_v52, %s4787_s27  ;;  %3188 = vrot.lane.b32.xlu2 %v6553_v2, %s4787_s27  ;;  %v7748_v52 = vld [vmem:[#allocation35_spill] sm:$0xff]  ;;  %v7749_v2 = vld [vmem:[#allocation40_spill] sm:$0xff] }
 0x523   : > { %3196 = vrot.lane.b32.xlu0 %v6581_v6, %s4787_s27 }
 0x524   : > { %v2851_v19 = vpop.permute.xlu1 %2850  ;;  %v2994_v36 = vpop.permute.xlu2 %2993 }
 0x525   : > { %2921 = vst.msk [vmem:[#allocation4 + $0xd0] sm:$0xff] %vm2894_vm3, %v2851_v19  ;;  %v2855_v27 = vpop.permute.xlu0 %2854 }
 0x526   : > { %3089 = vst.msk [vmem:[#allocation4 + $0x8] sm:$0xff] %vm3087_vm4, %v2994_v36  ;;  %v7766_v36 = vld [vmem:[#allocation55_spill] sm:$0xff] }
 0x527   : > { %2923 = vst.msk [vmem:[#allocation4 + $0xe0] sm:$0xff] %vm2894_vm3, %v2855_v27  ;;  %v7767_v27 = vld [vmem:[#allocation54_spill] sm:$0xff] }
 0x52a   : > { %3198 = vrot.lane.b32.xlu1 %v7747_v30, %s4787_s27  ;;  %3194 = vrot.lane.b32.xlu2 %v7748_v52, %s4787_s27  ;;  %v6994_v30 = vld [vmem:[#allocation3 + $0x182] sm:$0xff] }
 0x52b   : > { %3202 = vrot.lane.b32.xlu0 %v7749_v2, %s4787_s27 }
 0x52c   : > { %v2857_v6 = vpop.permute.xlu1 %2856  ;;  %v3000_v51 = vpop.permute.xlu2 %2999 }
 0x52d   : > { %2924 = vst.msk [vmem:[#allocation4 + $0xe8] sm:$0xff] %vm2894_vm3, %v2857_v6  ;;  %v2861_v24 = vpop.permute.xlu0 %2860  ;;  %v7001_v6 = vld [vmem:[#allocation3 + $0x18a] sm:$0xff] }
 0x52e   : > { %3092 = vst.msk [vmem:[#allocation4 + $0x20] sm:$0xff] %vm3087_vm4, %v3000_v51  ;;  %v7768_v51 = vld [vmem:[#allocation56_spill] sm:$0xff] }
 0x52f   : > { %2926 = vst.msk [vmem:[#allocation4 + $0xf8] sm:$0xff] %vm2894_vm3, %v2861_v24  ;;  %v3315_v24 = vld [vmem:[#allocation3 + $0x38] sm:$0xff] }
 0x532   : > { %3204 = vrot.lane.b32.xlu1 %v7750_v20, %s4787_s27  ;;  %3200 = vrot.lane.b32.xlu2 %v7751_v40, %s4787_s27 }
 0x533   : > { %3208 = vrot.lane.b32.xlu0 %v7752_v28, %s4787_s27 }
 0x534   : > { %v2992_v3 = vpop.permute.xlu1 %2991  ;;  %v3006_v44 = vpop.permute.xlu2 %3005 }
 0x535   : > { %3088 = vst.msk [vmem:[#allocation4] sm:$0xff] %vm3087_vm4, %v2992_v3  ;;  %v2996_v32 = vpop.permute.xlu0 %2995  ;;  %v3316_v3 = vld [vmem:[#allocation3 + $0x48] sm:$0xff] }
 0x536   : > { %3095 = vst.msk [vmem:[#allocation4 + $0x38] sm:$0xff] %vm3087_vm4, %v3006_v44  ;;  %v3314_v44 = vld [vmem:[#allocation3 + $0x30] sm:$0xff] }
 0x537   : > { %3090 = vst.msk [vmem:[#allocation4 + $0x10] sm:$0xff] %vm3087_vm4, %v2996_v32  ;;  %v3318_v32 = vld [vmem:[#allocation3 + $0x60] sm:$0xff] }
 0x53a   : > { %3210 = vrot.lane.b32.xlu1 %v7753_v50, %s4787_s27  ;;  %3206 = vrot.lane.b32.xlu2 %v7754_v42, %s4787_s27 }
 0x53b   : > { %3214 = vrot.lane.b32.xlu0 %v7755_v61, %s4787_s27 }
 0x53c   : > { %v2998_v29 = vpop.permute.xlu1 %2997  ;;  %v3012_v15 = vpop.permute.xlu2 %3011 }
 0x53d   : > { %3091 = vst.msk [vmem:[#allocation4 + $0x18] sm:$0xff] %vm3087_vm4, %v2998_v29  ;;  %v3002_v57 = vpop.permute.xlu0 %3001  ;;  %v3319_v29 = vld [vmem:[#allocation3 + $0x68] sm:$0xff] }
 0x53e   : > { %3098 = vst.msk [vmem:[#allocation4 + $0x50] sm:$0xff] %vm3087_vm4, %v3012_v15  ;;  %v3317_v15 = vld [vmem:[#allocation3 + $0x50] sm:$0xff] }
 0x53f   : > { %3093 = vst.msk [vmem:[#allocation4 + $0x28] sm:$0xff] %vm3087_vm4, %v3002_v57  ;;  %v3321_v57 = vld [vmem:[#allocation3 + $0x80] sm:$0xff] }
 0x542   : > { %3216 = vrot.lane.b32.xlu1 %v7756_v4, %s4787_s27  ;;  %3212 = vrot.lane.b32.xlu2 %v7757_v8, %s4787_s27 }
 0x543   : > { %3220 = vrot.lane.b32.xlu0 %v7758_v22, %s4787_s27 }
 0x544   : > { %v3004_v35 = vpop.permute.xlu1 %3003  ;;  %v3018_v9 = vpop.permute.xlu2 %3017 }
 0x545   : > { %3094 = vst.msk [vmem:[#allocation4 + $0x30] sm:$0xff] %vm3087_vm4, %v3004_v35  ;;  %v3008_v1 = vpop.permute.xlu0 %3007  ;;  %v3322_v35 = vld [vmem:[#allocation3 + $0x90] sm:$0xff] }
 0x546   : > { %3101 = vst.msk [vmem:[#allocation4 + $0x68] sm:$0xff] %vm3087_vm4, %v3018_v9  ;;  %v3320_v9 = vld [vmem:[#allocation3 + $0x78] sm:$0xff] }
 0x547   : > { %3096 = vst.msk [vmem:[#allocation4 + $0x40] sm:$0xff] %vm3087_vm4, %v3008_v1  ;;  %v3324_v1 = vld [vmem:[#allocation3 + $0xa8] sm:$0xff] }
 0x54a   : > { %3222 = vrot.lane.b32.xlu1 %v7759_v60, %s4787_s27  ;;  %3218 = vrot.lane.b32.xlu2 %v7760_v49, %s4787_s27 }
 0x54b   : > { %3226 = vrot.lane.b32.xlu0 %v7761_v31, %s4787_s27 }
 0x54c   : > { %v3010_v18 = vpop.permute.xlu1 %3009  ;;  %v3024_v58 = vpop.permute.xlu2 %3023 }
 0x54d   : > { %3097 = vst.msk [vmem:[#allocation4 + $0x48] sm:$0xff] %vm3087_vm4, %v3010_v18  ;;  %v3014_v13 = vpop.permute.xlu0 %3013  ;;  %v3325_v18 = vld [vmem:[#allocation3 + $0xb0] sm:$0xff] }
 0x54e   : > { %3104 = vst.msk [vmem:[#allocation4 + $0x80] sm:$0xff] %vm3087_vm4, %v3024_v58  ;;  %v3323_v58 = vld [vmem:[#allocation3 + $0x98] sm:$0xff] }
 0x54f   : > { %3099 = vst.msk [vmem:[#allocation4 + $0x58] sm:$0xff] %vm3087_vm4, %v3014_v13 }
 0x552   : > { %3228 = vrot.lane.b32.xlu1 %v7762_v59, %s4787_s27  ;;  %3224 = vrot.lane.b32.xlu2 %v7763_v41, %s4787_s27 }
 0x553   : > { %3232 = vrot.lane.b32.xlu0 %v6660_v53, %s4787_s27 }
 0x554   : > { %v3016_v54 = vpop.permute.xlu1 %3015  ;;  %v3030_v26 = vpop.permute.xlu2 %3029 }
 0x555   : > { %3100 = vst.msk [vmem:[#allocation4 + $0x60] sm:$0xff] %vm3087_vm4, %v3016_v54  ;;  %v3020_v38 = vpop.permute.xlu0 %3019  ;;  %v3326_v54 = vld [vmem:[#allocation3 + $0xc0] sm:$0xff] }
 0x556   : > { %3107 = vst.msk [vmem:[#allocation4 + $0x98] sm:$0xff] %vm3087_vm4, %v3030_v26 }
 0x557   : > { %3102 = vst.msk [vmem:[#allocation4 + $0x70] sm:$0xff] %vm3087_vm4, %v3020_v38 }
 0x55a   : > { %3234 = vrot.lane.b32.xlu1 %v7764_v11, %s4787_s27  ;;  %3230 = vrot.lane.b32.xlu2 %v7765_v55, %s4787_s27  ;;  %v3329_v11 = vld [vmem:[#allocation3 + $0xe0] sm:$0xff] }
 0x55b   : > { %3238 = vrot.lane.b32.xlu0 %v6675_v63, %s4787_s27 }
 0x55c   : > { %v3022_v25 = vpop.permute.xlu1 %3021  ;;  %v3036_v53 = vpop.permute.xlu2 %3035 }
 0x55d   : > { %3103 = vst.msk [vmem:[#allocation4 + $0x78] sm:$0xff] %vm3087_vm4, %v3022_v25  ;;  %v3026_v19 = vpop.permute.xlu0 %3025  ;;  %v3332_v25 = vld [vmem:[#allocation3 + $0x108] sm:$0xff] }
 0x55e   : > { %3110 = vst.msk [vmem:[#allocation4 + $0xb0] sm:$0xff] %vm3087_vm4, %v3036_v53 }
 0x55f   : > { %3105 = vst.msk [vmem:[#allocation4 + $0x88] sm:$0xff] %vm3087_vm4, %v3026_v19  ;;  %v3335_v19 = vld [vmem:[#allocation3 + $0x128] sm:$0xff] }
 0x562   : > { %3240 = vrot.lane.b32.xlu1 %v7766_v36, %s4787_s27  ;;  %3236 = vrot.lane.b32.xlu2 %v7767_v27, %s4787_s27 }
 0x563   : > { %3244 = vrot.lane.b32.xlu0 %v6994_v30, %s4787_s27 }
 0x564   : > { %v3028_v63 = vpop.permute.xlu1 %3027  ;;  %v3042_v52 = vpop.permute.xlu2 %3041 }
 0x565   : > { %3106 = vst.msk [vmem:[#allocation4 + $0x90] sm:$0xff] %vm3087_vm4, %v3028_v63  ;;  %v3032_v2 = vpop.permute.xlu0 %3031  ;;  %v3524_v63 = vld [vmem:[#allocation3 + $0xf9] sm:$0xff] }
 0x566   : > { %3113 = vst.msk [vmem:[#allocation4 + $0xc8] sm:$0xff] %vm3087_vm4, %v3042_v52  ;;  %v3338_v52 = vld [vmem:[#allocation3 + $0x150] sm:$0xff] }
 0x567   : > { %3108 = vst.msk [vmem:[#allocation4 + $0xa0] sm:$0xff] %vm3087_vm4, %v3032_v2 }
 0x56a   : > { %3246 = vrot.lane.b32.xlu1 %v7001_v6, %s4787_s27  ;;  %3242 = vrot.lane.b32.xlu2 %v7768_v51, %s4787_s27 }
 0x56b   : > { %3380 = vrot.lane.b32.xlu0 %v3315_v24, %s4788_s28 }
 0x56c   : > { %v3034_v20 = vpop.permute.xlu1 %3033  ;;  %v3048_v40 = vpop.permute.xlu2 %3047 }
 0x56d   : > { %3109 = vst.msk [vmem:[#allocation4 + $0xa8] sm:$0xff] %vm3087_vm4, %v3034_v20  ;;  %v3038_v28 = vpop.permute.xlu0 %3037  ;;  %v3716_v20 = vld [vmem:[#allocation3 + $0xf2] sm:$0xff] }
 0x56e   : > { %3116 = vst.msk [vmem:[#allocation4 + $0xe0] sm:$0xff] %vm3087_vm4, %v3048_v40  ;;  %v3700_v40 = vld [vmem:[#allocation3 + $0x32] sm:$0xff] }
 0x56f   : > { %3111 = vst.msk [vmem:[#allocation4 + $0xb8] sm:$0xff] %vm3087_vm4, %v3038_v28 }
 0x572   : > { %3382 = vrot.lane.b32.xlu1 %v3316_v3, %s4788_s28  ;;  %3378 = vrot.lane.b32.xlu2 %v3314_v44, %s4788_s28 }
 0x573   : > { %3386 = vrot.lane.b32.xlu0 %v3318_v32, %s4788_s28  ;;  %v3701_v32 = vld [vmem:[#allocation3 + $0x3a] sm:$0xff] }
 0x574   : > { %v3040_v50 = vpop.permute.xlu1 %3039  ;;  %v3054_v42 = vpop.permute.xlu2 %3053 }
 0x575   : > { %3112 = vst.msk [vmem:[#allocation4 + $0xc0] sm:$0xff] %vm3087_vm4, %v3040_v50  ;;  %v3044_v61 = vpop.permute.xlu0 %3043 }
 0x576   : > { %3119 = vst.msk [vmem:[#allocation4 + $0xf8] sm:$0xff] %vm3087_vm4, %v3054_v42 }
 0x577   : > { %3114 = vst.msk [vmem:[#allocation4 + $0xd0] sm:$0xff] %vm3087_vm4, %v3044_v61 }
 0x57a   : > { %3388 = vrot.lane.b32.xlu1 %v3319_v29, %s4788_s28  ;;  %3384 = vrot.lane.b32.xlu2 %v3317_v15, %s4788_s28  ;;  %v3718_v29 = vld [vmem:[#allocation3 + $0x10a] sm:$0xff] }
 0x57b   : > { %3392 = vrot.lane.b32.xlu0 %v3321_v57, %s4788_s28  ;;  %v3525_v15 = vld [vmem:[#allocation3 + $0x109] sm:$0xff] }
 0x57c   : > { %v3046_v4 = vpop.permute.xlu1 %3045  ;;  %v3189_v8 = vpop.permute.xlu2 %3188 }
 0x57d   : > { %3115 = vst.msk [vmem:[#allocation4 + $0xd8] sm:$0xff] %vm3087_vm4, %v3046_v4  ;;  %v3050_v22 = vpop.permute.xlu0 %3049 }
 0x57e   : > { %3283 = vst.msk [vmem:[#allocation4 + $0x10] sm:$0xff] %vm3280_vm5, %v3189_v8  ;;  %v3719_v8 = vld [vmem:[#allocation3 + $0x112] sm:$0xff] }
 0x57f   : > { %3117 = vst.msk [vmem:[#allocation4 + $0xe8] sm:$0xff] %vm3087_vm4, %v3050_v22  ;;  %v3703_v22 = vld [vmem:[#allocation3 + $0x52] sm:$0xff] }
 0x582   : > { %3394 = vrot.lane.b32.xlu1 %v3322_v35, %s4788_s28  ;;  %3390 = vrot.lane.b32.xlu2 %v3320_v9, %s4788_s28 }
 0x583   : > { %3398 = vrot.lane.b32.xlu0 %v3324_v1, %s4788_s28  ;;  %v3527_v1 = vld [vmem:[#allocation3 + $0x121] sm:$0xff] }
 0x584   : > { %v3052_v60 = vpop.permute.xlu1 %3051  ;;  %v3195_v49 = vpop.permute.xlu2 %3194 }
 0x585   : > { %3118 = vst.msk [vmem:[#allocation4 + $0xf0] sm:$0xff] %vm3087_vm4, %v3052_v60  ;;  %v3185_v31 = vpop.permute.xlu0 %3184  ;;  %v3702_v60 = vld [vmem:[#allocation3 + $0x4a] sm:$0xff] }
 0x586   : > { %3286 = vst.msk [vmem:[#allocation4 + $0x28] sm:$0xff] %vm3280_vm5, %v3195_v49 }
 0x587   : > { %3281 = vst.msk [vmem:[#allocation4] sm:$0xff] %vm3280_vm5, %v3185_v31 }
 0x58a   : > { %3400 = vrot.lane.b32.xlu1 %v3325_v18, %s4788_s28  ;;  %3396 = vrot.lane.b32.xlu2 %v3323_v58, %s4788_s28  ;;  %v3721_v58 = vld [vmem:[#allocation3 + $0x12a] sm:$0xff] }
 0x58b   : > { %3404 = vrot.lane.b32.xlu0 %v6435_v23, %s4788_s28 }
 0x58c   : > { %v3187_v13 = vpop.permute.xlu1 %3186  ;;  %v3201_v59 = vpop.permute.xlu2 %3200 }
 0x58d   : > { %3282 = vst.msk [vmem:[#allocation4 + $0x8] sm:$0xff] %vm3280_vm5, %v3187_v13  ;;  %v3191_v41 = vpop.permute.xlu0 %3190  ;;  %v3528_v13 = vld [vmem:[#allocation3 + $0x129] sm:$0xff] }
 0x58e   : > { %3289 = vst.msk [vmem:[#allocation4 + $0x40] sm:$0xff] %vm3280_vm5, %v3201_v59 }
 0x58f   : > { %3284 = vst.msk [vmem:[#allocation4 + $0x18] sm:$0xff] %vm3280_vm5, %v3191_v41 }
 0x592   : > { %3406 = vrot.lane.b32.xlu1 %v6461_v0, %s4788_s28  ;;  %3402 = vrot.lane.b32.xlu2 %v3326_v54, %s4788_s28 }
 0x593   : > { %3410 = vrot.lane.b32.xlu0 %v6204_v16, %s4788_s28 }
 0x594   : > { %v3193_v26 = vpop.permute.xlu1 %3192  ;;  %v3207_v23 = vpop.permute.xlu2 %3206 }
 0x595   : > { %3285 = vst.msk [vmem:[#allocation4 + $0x20] sm:$0xff] %vm3280_vm5, %v3193_v26  ;;  %v3197_v38 = vpop.permute.xlu0 %3196  ;;  %v3704_v26 = vld [vmem:[#allocation3 + $0x62] sm:$0xff] }
 0x596   : > { %3292 = vst.msk [vmem:[#allocation4 + $0x58] sm:$0xff] %vm3280_vm5, %v3207_v23  ;;  %v3529_v23 = vld [vmem:[#allocation3 + $0x139] sm:$0xff] }
 0x597   : > { %3287 = vst.msk [vmem:[#allocation4 + $0x30] sm:$0xff] %vm3280_vm5, %v3197_v38 }
 0x59a   : > { %3412 = vrot.lane.b32.xlu1 %v6231_v34, %s4788_s28  ;;  %3408 = vrot.lane.b32.xlu2 %v3329_v11, %s4788_s28 }
 0x59b   : > { %3416 = vrot.lane.b32.xlu0 %v6284_v5, %s4788_s28 }
 0x59c   : > { %v3199_v0 = vpop.permute.xlu1 %3198  ;;  %v3213_v16 = vpop.permute.xlu2 %3212 }
 0x59d   : > { %3288 = vst.msk [vmem:[#allocation4 + $0x38] sm:$0xff] %vm3280_vm5, %v3199_v0  ;;  %v3203_v55 = vpop.permute.xlu0 %3202  ;;  %v3530_v0 = vld [vmem:[#allocation3 + $0x141] sm:$0xff] }
 0x59e   : > { %3295 = vst.msk [vmem:[#allocation4 + $0x70] sm:$0xff] %vm3280_vm5, %v3213_v16  ;;  %v3705_v16 = vld [vmem:[#allocation3 + $0x6a] sm:$0xff] }
 0x59f   : > { %3290 = vst.msk [vmem:[#allocation4 + $0x48] sm:$0xff] %vm3280_vm5, %v3203_v55  ;;  %v3723_v55 = vld [vmem:[#allocation3 + $0x142] sm:$0xff] }
 0x5a2   : > { %3418 = vrot.lane.b32.xlu1 %v6316_v46, %s4788_s28  ;;  %3414 = vrot.lane.b32.xlu2 %v3332_v25, %s4788_s28  ;;  %v3523_v46 = vld [vmem:[#allocation3 + $0xf1] sm:$0xff] }
 0x5a3   : > { %3422 = vrot.lane.b32.xlu0 %v6366_v14, %s4788_s28 }
 0x5a4   : > { %v3205_v34 = vpop.permute.xlu1 %3204  ;;  %v3219_v5 = vpop.permute.xlu2 %3218 }
 0x5a5   : > { %3291 = vst.msk [vmem:[#allocation4 + $0x50] sm:$0xff] %vm3280_vm5, %v3205_v34  ;;  %v3209_v53 = vpop.permute.xlu0 %3208 }
 0x5a6   : > { %3298 = vst.msk [vmem:[#allocation4 + $0x88] sm:$0xff] %vm3280_vm5, %v3219_v5  ;;  %v3722_v5 = vld [vmem:[#allocation3 + $0x13a] sm:$0xff] }
 0x5a7   : > { %3293 = vst.msk [vmem:[#allocation4 + $0x60] sm:$0xff] %vm3280_vm5, %v3209_v53  ;;  %v3706_v53 = vld [vmem:[#allocation3 + $0x7a] sm:$0xff] }
 0x5aa   : > { %3424 = vrot.lane.b32.xlu1 %v6396_v43, %s4788_s28  ;;  %3420 = vrot.lane.b32.xlu2 %v3335_v19, %s4788_s28  ;;  %v3717_v43 = vld [vmem:[#allocation3 + $0xfa] sm:$0xff] }
 0x5ab   : > { %3603 = vrot.lane.b32.xlu0 %v3523_v46, %s4789_s29 }
 0x5ac   : > { %v3211_v14 = vpop.permute.xlu1 %3210  ;;  %v3225_v36 = vpop.permute.xlu2 %3224 }
 0x5ad   : > { %3294 = vst.msk [vmem:[#allocation4 + $0x68] sm:$0xff] %vm3280_vm5, %v3211_v14  ;;  %v3215_v27 = vpop.permute.xlu0 %3214 }
 0x5ae   : > { %3301 = vst.msk [vmem:[#allocation4 + $0xa0] sm:$0xff] %vm3280_vm5, %v3225_v36  ;;  %v3949_v36 = vld [vmem:[%s7552_s4 + $0x20] sm:$0xf] }
 0x5af   : > { %3296 = vst.msk [vmem:[#allocation4 + $0x78] sm:$0xff] %vm3280_vm5, %v3215_v27  ;;  %v3971_v27 = vunpack.c.l.b16 %v3949_v36 }
 0x5b2   : > { %3605 = vrot.lane.b32.xlu1 %v3524_v63, %s4789_s29  ;;  %3426 = vrot.lane.b32.xlu2 %v3338_v52, %s4788_s28  ;;  %v3707_v63 = vld [vmem:[#allocation3 + $0x82] sm:$0xff]  ;;  %v3531_v52 = vld [vmem:[#allocation3 + $0x151] sm:$0xff] }
 0x5b3   : > { %3798 = vrot.lane.b32.xlu0 %v3717_v43, %s4790_s30 }
 0x5b4   : > { %v3217_v2 = vpop.permute.xlu1 %3216  ;;  %v3231_v51 = vpop.permute.xlu2 %3230 }
 0x5b5   : > { %3297 = vst.msk [vmem:[#allocation4 + $0x80] sm:$0xff] %vm3280_vm5, %v3217_v2  ;;  %v3221_v24 = vpop.permute.xlu0 %3220  ;;  %v4734_v2 = vld [vmem:[%s7552_s4 + $0x18] sm:$0xff] }
 0x5b6   : > { %3304 = vst.msk [vmem:[#allocation4 + $0xb8] sm:$0xff] %vm3280_vm5, %v3231_v51 }
 0x5b7   : > { %3299 = vst.msk [vmem:[#allocation4 + $0x90] sm:$0xff] %vm3280_vm5, %v3221_v24 }
 0x5ba   : > { %3571 = vrot.lane.b32.xlu1 %v6793_v10, %s4789_s29  ;;  %3796 = vrot.lane.b32.xlu2 %v3716_v20, %s4790_s30  ;;  %v3526_v10 = vld [vmem:[#allocation3 + $0x111] sm:$0xff] }
 0x5bb   : > { %3764 = vrot.lane.b32.xlu0 %v3700_v40, %s4790_s30  ;;  %v3532_v40 = vld [vmem:[#allocation3 + $0x159] sm:$0xff] }
 0x5bc   : > { %v3223_v28 = vpop.permute.xlu1 %3222  ;;  %v3237_v3 = vpop.permute.xlu2 %3236 }
 0x5bd   : > { %3300 = vst.msk [vmem:[#allocation4 + $0x98] sm:$0xff] %vm3280_vm5, %v3223_v28  ;;  %v3227_v44 = vpop.permute.xlu0 %3226  ;;  %v3339_v28 = vld [vmem:[#allocation3 + $0x158] sm:$0xff] }
 0x5be   : > { %3307 = vst.msk [vmem:[#allocation4 + $0xd0] sm:$0xff] %vm3280_vm5, %v3237_v3  ;;  %v3725_v3 = vld [vmem:[#allocation3 + $0x15a] sm:$0xff] }
 0x5bf   : > { %3302 = vst.msk [vmem:[#allocation4 + $0xa8] sm:$0xff] %vm3280_vm5, %v3227_v44  ;;  %v4732_v44 = vld [vmem:[%s7552_s4 + $0x8] sm:$0xff] }
 0x5c2   : > { %3766 = vrot.lane.b32.xlu1 %v3701_v32, %s4790_s30  ;;  %3573 = vrot.lane.b32.xlu2 %v6800_v39, %s4789_s29 }
 0x5c3   : > { %3609 = vrot.lane.b32.xlu0 %v3526_v10, %s4789_s29 }
 0x5c4   : > { %v3229_v50 = vpop.permute.xlu1 %3228  ;;  %v3243_v42 = vpop.permute.xlu2 %3242 }
 0x5c5   : > { %3303 = vst.msk [vmem:[#allocation4 + $0xb0] sm:$0xff] %vm3280_vm5, %v3229_v50  ;;  %v3233_v61 = vpop.permute.xlu0 %3232 }
 0x5c6   : > { %3310 = vst.msk [vmem:[#allocation4 + $0xe8] sm:$0xff] %vm3280_vm5, %v3243_v42  ;;  %v4731_v42 = vld [vmem:[%s7552_s4] sm:$0xff] }
 0x5c7   : > { %3305 = vst.msk [vmem:[#allocation4 + $0xc0] sm:$0xff] %vm3280_vm5, %v3233_v61  ;;  %v3724_v61 = vld [vmem:[#allocation3 + $0x152] sm:$0xff] }
 0x5ca   : > { %3800 = vrot.lane.b32.xlu1 %v3718_v29, %s4790_s30  ;;  %3607 = vrot.lane.b32.xlu2 %v3525_v15, %s4789_s29  ;;  %v3708_v29 = vld [vmem:[#allocation3 + $0x92] sm:$0xff] }
 0x5cb   : > { %3575 = vrot.lane.b32.xlu0 %v6814_v45, %s4789_s29 }
 0x5cc   : > { %v3235_v39 = vpop.permute.xlu1 %3234  ;;  %v3379_v57 = vpop.permute.xlu2 %3378 }
 0x5cd   : > { %3306 = vst.msk [vmem:[#allocation4 + $0xc8] sm:$0xff] %vm3280_vm5, %v3235_v39  ;;  %v3239_v4 = vpop.permute.xlu0 %3238 }
 0x5ce   : > { %3475 = vst.msk [vmem:[#allocation4] sm:$0xff] %vm3474_vm6, %v3379_v57 }
 0x5cf   : > { %3308 = vst.msk [vmem:[#allocation4 + $0xd8] sm:$0xff] %vm3280_vm5, %v3239_v4  ;;  %v3709_v4 = vld [vmem:[#allocation3 + $0x9a] sm:$0xff] }
 0x5d2   : > { %3577 = vrot.lane.b32.xlu1 %v6805_v17, %s4789_s29  ;;  %3802 = vrot.lane.b32.xlu2 %v3719_v8, %s4790_s30  ;;  %v3720_v17 = vld [vmem:[#allocation3 + $0x122] sm:$0xff]  ;;  %v3516_v8 = vld [vmem:[#allocation3 + $0x99] sm:$0xff] }
 0x5d3   : > { %3770 = vrot.lane.b32.xlu0 %v3703_v22, %s4790_s30 }
 0x5d4   : > { %v3241_v45 = vpop.permute.xlu1 %3240  ;;  %v3385_v35 = vpop.permute.xlu2 %3384 }
 0x5d5   : > { %3309 = vst.msk [vmem:[#allocation4 + $0xe0] sm:$0xff] %vm3280_vm5, %v3241_v45  ;;  %v3245_v9 = vpop.permute.xlu0 %3244 }
 0x5d6   : > { %3478 = vst.msk [vmem:[#allocation4 + $0x18] sm:$0xff] %vm3474_vm6, %v3385_v35 }
 0x5d7   : > { %3311 = vst.msk [vmem:[#allocation4 + $0xf0] sm:$0xff] %vm3280_vm5, %v3245_v9  ;;  %v3533_v9 = vld [vmem:[#allocation3 + $0x169] sm:$0xff] }
 0x5da   : > { %3611 = vrot.lane.b32.xlu1 %v3527_v1, %s4789_s29  ;;  %3768 = vrot.lane.b32.xlu2 %v3702_v60, %s4790_s30  ;;  %v3340_v1 = vld [vmem:[#allocation3 + $0x168] sm:$0xff] }
 0x5db   : > { %3804 = vrot.lane.b32.xlu0 %v3720_v17, %s4790_s30  ;;  %v3726_v60 = vld [vmem:[#allocation3 + $0x16a] sm:$0xff] }
 0x5dc   : > { %v3247_v49 = vpop.permute.xlu1 %3246  ;;  %v3391_v31 = vpop.permute.xlu2 %3390 }
 0x5dd   : > { %3312 = vst.msk [vmem:[#allocation4 + $0xf8] sm:$0xff] %vm3280_vm5, %v3247_v49  ;;  %v3381_v18 = vpop.permute.xlu0 %3380 }
 0x5de   : > { %3481 = vst.msk [vmem:[#allocation4 + $0x30] sm:$0xff] %vm3474_vm6, %v3391_v31 }
 0x5df   : > { %3476 = vst.msk [vmem:[#allocation4 + $0x8] sm:$0xff] %vm3474_vm6, %v3381_v18  ;;  %v3727_v18 = vld [vmem:[#allocation3 + $0x172] sm:$0xff] }
 0x5e2   : > { %3806 = vrot.lane.b32.xlu1 %v3721_v58, %s4790_s30  ;;  %3613 = vrot.lane.b32.xlu2 %v3528_v13, %s4789_s29  ;;  %v3534_v58 = vld [vmem:[#allocation3 + $0x171] sm:$0xff] }
 0x5e3   : > { %3581 = vrot.lane.b32.xlu0 %v6829_v62, %s4789_s29  ;;  %v3518_v13 = vld [vmem:[#allocation3 + $0xb1] sm:$0xff] }
 0x5e4   : > { %v3383_v59 = vpop.permute.xlu1 %3382  ;;  %v3397_v41 = vpop.permute.xlu2 %3396 }
 0x5e5   : > { %3477 = vst.msk [vmem:[#allocation4 + $0x10] sm:$0xff] %vm3474_vm6, %v3383_v59  ;;  %v3387_v54 = vpop.permute.xlu0 %3386 }
 0x5e6   : > { %3484 = vst.msk [vmem:[#allocation4 + $0x48] sm:$0xff] %vm3474_vm6, %v3397_v41 }
 0x5e7   : > { %3479 = vst.msk [vmem:[#allocation4 + $0x20] sm:$0xff] %vm3474_vm6, %v3387_v54 }
 0x5ea   : > { %3772 = vrot.lane.b32.xlu1 %v3704_v26, %s4790_s30  ;;  %3579 = vrot.lane.b32.xlu2 %v6812_v7, %s4789_s29 }
 0x5eb   : > { %3615 = vrot.lane.b32.xlu0 %v3529_v23, %s4789_s29 }
 0x5ec   : > { %v3389_v38 = vpop.permute.xlu1 %3388  ;;  %v3403_v62 = vpop.permute.xlu2 %3402 }
 0x5ed   : > { %3480 = vst.msk [vmem:[#allocation4 + $0x28] sm:$0xff] %vm3474_vm6, %v3389_v38  ;;  %v3393_v11 = vpop.permute.xlu0 %3392 }
 0x5ee   : > { %3487 = vst.msk [vmem:[#allocation4 + $0x60] sm:$0xff] %vm3474_vm6, %v3403_v62  ;;  %v3710_v62 = vld [vmem:[#allocation3 + $0xaa] sm:$0xff] }
 0x5ef   : > { %3482 = vst.msk [vmem:[#allocation4 + $0x38] sm:$0xff] %vm3474_vm6, %v3393_v11  ;;  %v3517_v11 = vld [vmem:[#allocation3 + $0xa9] sm:$0xff] }
 0x5f2   : > { %3617 = vrot.lane.b32.xlu1 %v3530_v0, %s4789_s29  ;;  %3774 = vrot.lane.b32.xlu2 %v3705_v16, %s4790_s30  ;;  %v3342_v0 = vld [vmem:[#allocation3 + $0x180] sm:$0xff] }
 0x5f3   : > { %3810 = vrot.lane.b32.xlu0 %v3723_v55, %s4790_s30 }
 0x5f4   : > { %v3395_v7 = vpop.permute.xlu1 %3394  ;;  %v3409_v25 = vpop.permute.xlu2 %3408 }
 0x5f5   : > { %3483 = vst.msk [vmem:[#allocation4 + $0x40] sm:$0xff] %vm3474_vm6, %v3395_v7  ;;  %v3399_v34 = vpop.permute.xlu0 %3398 }
 0x5f6   : > { %3490 = vst.msk [vmem:[#allocation4 + $0x78] sm:$0xff] %vm3474_vm6, %v3409_v25  ;;  %v3343_v25 = vld [vmem:[#allocation3 + $0x188] sm:$0xff] }
 0x5f7   : > { %3485 = vst.msk [vmem:[#allocation4 + $0x50] sm:$0xff] %vm3474_vm6, %v3399_v34  ;;  %v3711_v34 = vld [vmem:[#allocation3 + $0xb2] sm:$0xff] }
 0x5fa   : > { %3583 = vrot.lane.b32.xlu1 %v6820_v48, %s4789_s29  ;;  %3808 = vrot.lane.b32.xlu2 %v3722_v5, %s4790_s30  ;;  %v3976_v48 = vpack.c.b16 %v3971_v27, %v3971_v27 }
 0x5fb   : > { %3776 = vrot.lane.b32.xlu0 %v3706_v53, %s4790_s30 }
 0x5fc   : > { %v3401_v19 = vpop.permute.xlu1 %3400  ;;  %v3415_v46 = vpop.permute.xlu2 %3414  ;;  %v4032_v43 = vsel %vm4030_vm7, %v3976_v48, 0 }
 0x5fd   : > { %3486 = vst.msk [vmem:[#allocation4 + $0x58] sm:$0xff] %vm3474_vm6, %v3401_v19  ;;  %v3405_v14 = vpop.permute.xlu0 %3404  ;;  %4738 = vmatpush.bf16.msra.mxu2 %v4032_v43  ;;  %4037 = vmatpush.bf16.msra.mxu1 %v4032_v43 }
 0x5fe   : > { %3493 = vst.msk [vmem:[#allocation4 + $0x90] sm:$0xff] %vm3474_vm6, %v3415_v46 }
 0x5ff   : > { %3488 = vst.msk [vmem:[#allocation4 + $0x68] sm:$0xff] %vm3474_vm6, %v3405_v14 }
 0x601   : > { %4739 = vmatpush.bf16.msra.mxu2 %v4734_v2  ;;  %4038 = vmatpush.bf16.msra.mxu1 %v4734_v2 }
 0x602   : > { %3778 = vrot.lane.b32.xlu1 %v3707_v63, %s4790_s30  ;;  %3585 = vrot.lane.b32.xlu2 %v6827_v47, %s4789_s29  ;;  %v4733_v47 = vld [vmem:[%s7552_s4 + $0x10] sm:$0xff] }
 0x603   : > { %3619 = vrot.lane.b32.xlu0 %v3531_v52, %s4789_s29 }
 0x604   : > { %v3407_v51 = vpop.permute.xlu1 %3406  ;;  %v3421_v24 = vpop.permute.xlu2 %3420 }
 0x605   : > { %3489 = vst.msk [vmem:[#allocation4 + $0x70] sm:$0xff] %vm3474_vm6, %v3407_v51  ;;  %v3411_v20 = vpop.permute.xlu0 %3410  ;;  %4740 = vmatpush.bf16.msra.mxu2 %v4733_v47  ;;  %4039 = vmatpush.bf16.msra.mxu1 %v4733_v47 }
 0x606   : > { %3496 = vst.msk [vmem:[#allocation4 + $0xa8] sm:$0xff] %vm3474_vm6, %v3421_v24 }
 0x607   : > { %3491 = vst.msk [vmem:[#allocation4 + $0x80] sm:$0xff] %vm3474_vm6, %v3411_v20 }
 0x609   : > { %4741 = vmatpush.bf16.msra.mxu2 %v4732_v44  ;;  %4040 = vmatpush.bf16.msra.mxu1 %v4732_v44  ;;  %v3537_v44 = vld [vmem:[#allocation3 + $0x199] sm:$0xff] }
 0x60a   : > { %3621 = vrot.lane.b32.xlu1 %v3532_v40, %s4789_s29  ;;  %3428 = vrot.lane.b32.xlu2 %v3339_v28, %s4788_s28 }
 0x60b   : > { %3814 = vrot.lane.b32.xlu0 %v3725_v3, %s4790_s30  ;;  %v3344_v3 = vld [vmem:[#allocation3 + $0x198] sm:$0xff] }
 0x60c   : > { %v3413_v32 = vpop.permute.xlu1 %3412  ;;  %v3427_v10 = vpop.permute.xlu2 %3426 }
 0x60d   : > { %3492 = vst.msk [vmem:[#allocation4 + $0x88] sm:$0xff] %vm3474_vm6, %v3413_v32  ;;  %v3417_v50 = vpop.permute.xlu0 %3416  ;;  %4742 = vmatpush.bf16.msra.mxu2 %v4731_v42  ;;  %4041 = vmatpush.bf16.msra.mxu1 %v4731_v42  ;;  %v3712_v32 = vld [vmem:[#allocation3 + $0xc2] sm:$0xff] }
 0x60e   : > { %3499 = vst.msk [vmem:[#allocation4 + $0xc0] sm:$0xff] %vm3474_vm6, %v3427_v10  ;;  %v3538_v42 = vld [vmem:[#allocation3 + $0x1a1] sm:$0xff] }
 0x60f   : > { %3494 = vst.msk [vmem:[#allocation4 + $0x98] sm:$0xff] %vm3474_vm6, %v3417_v50 }
 0x612   : > { %3587 = vrot.lane.b32.xlu1 %v6840_v37, %s4789_s29  ;;  %3812 = vrot.lane.b32.xlu2 %v3724_v61, %s4790_s30  ;;  %v3341_v37 = vld [vmem:[#allocation3 + $0x170] sm:$0xff]  ;;  %v3345_v61 = vld [vmem:[#allocation3 + $0x1a0] sm:$0xff] }
 0x613   : > { %3780 = vrot.lane.b32.xlu0 %v3708_v29, %s4790_s30  ;;  %v3731_v29 = vld [vmem:[#allocation3 + $0x1a2] sm:$0xff] }
 0x614   : > { %v3419_v15 = vpop.permute.xlu1 %3418  ;;  %v3797_v39 = vpop.permute.xlu2 %3796 }
 0x615   : > { %3495 = vst.msk [vmem:[#allocation4 + $0xa0] sm:$0xff] %vm3474_vm6, %v3419_v15  ;;  %v3423_v57 = vpop.permute.xlu0 %3422 }
 0x616   : > { %3497 = vst.msk [vmem:[#allocation4 + $0xb0] sm:$0xff] %vm3474_vm6, %v3423_v57 }
 0x61a   : > { %3782 = vrot.lane.b32.xlu1 %v3709_v4, %s4790_s30  ;;  %3589 = vrot.lane.b32.xlu2 %v3516_v8, %s4789_s29 }
 0x61b   : > { %3432 = vrot.lane.b32.xlu0 %v3341_v37, %s4788_s28 }
 0x61c   : > { %v3425_v22 = vpop.permute.xlu1 %3424  ;;  %v3574_v45 = vpop.permute.xlu2 %3573 }
 0x61d   : > { %3498 = vst.msk [vmem:[#allocation4 + $0xb8] sm:$0xff] %vm3474_vm6, %v3425_v22  ;;  %v3604_v35 = vpop.permute.xlu0 %3603  ;;  %v3730_v22 = vld [vmem:[#allocation3 + $0x19a] sm:$0xff] }
 0x61e   : > { %3669 = vst.msk [vmem:[#allocation4 + $0x8] sm:$0xff] %vm3667_vm8, %v3574_v45  ;;  %v3521_v45 = vld [vmem:[#allocation3 + $0xd9] sm:$0xff] }
 0x61f   : > { %3684 = vst.msk [vmem:[#allocation4 + $0x80] sm:$0xff] %vm3667_vm8, %v3604_v35  ;;  %v3714_v35 = vld [vmem:[#allocation3 + $0xda] sm:$0xff] }
 0x620   : > { %3877 = vst.msk [vmem:[#allocation4 + $0x80] sm:$0xff] %vm3860_vm12, %v3797_v39 }
 0x622   : > { %3623 = vrot.lane.b32.xlu1 %v3533_v9, %s4789_s29  ;;  %3430 = vrot.lane.b32.xlu2 %v3340_v1, %s4788_s28 }
 0x623   : > { %3816 = vrot.lane.b32.xlu0 %v3726_v60, %s4790_s30 }
 0x624   : > { %v3606_v17 = vpop.permute.xlu1 %3605  ;;  %v3608_v49 = vpop.permute.xlu2 %3607 }
 0x625   : > { %3685 = vst.msk [vmem:[#allocation4 + $0x88] sm:$0xff] %vm3667_vm8, %v3606_v17  ;;  %v3799_v31 = vpop.permute.xlu0 %3798 }
 0x626   : > { %3686 = vst.msk [vmem:[#allocation4 + $0x90] sm:$0xff] %vm3667_vm8, %v3608_v49 }
 0x627   : > { %3878 = vst.msk [vmem:[#allocation4 + $0x88] sm:$0xff] %vm3860_vm12, %v3799_v31  ;;  %v3909_v26 = vld [vmem:[#allocation4 + $0x80] sm:$0xff] }
 0x62a   : > { %3818 = vrot.lane.b32.xlu1 %v3727_v18, %s4790_s30  ;;  %3625 = vrot.lane.b32.xlu2 %v3534_v58, %s4789_s29  ;;  %v3715_v18 = vld [vmem:[#allocation3 + $0xe2] sm:$0xff] }
 0x62b   : > { %3593 = vrot.lane.b32.xlu0 %v3518_v13, %s4789_s29  ;;  %v3522_v58 = vld [vmem:[#allocation3 + $0xe1] sm:$0xff]  ;;  %v7769_v13 = vld [vmem:[#allocation6_spill] sm:$0xff] }
 0x62c   : > { %v3572_v59 = vpop.permute.xlu1 %3571  ;;  %v3803_v41 = vpop.permute.xlu2 %3802 }
 0x62d   : > { %3668 = vst.msk [vmem:[#allocation4] sm:$0xff] %vm3667_vm8, %v3572_v59  ;;  %v3765_v54 = vpop.permute.xlu0 %3764 }
 0x62e   : > { %3861 = vst.msk [vmem:[#allocation4] sm:$0xff] %vm3860_vm12, %v3765_v54  ;;  %v3910_v23 = vld [vmem:[#allocation4 + $0x88] sm:$0xff] }
 0x62f   : > { %v3933_v38 = vpack.c.bf16 %v3910_v23, %v3909_v26 }
 0x631   : > { %4718 = vmatmul.msk.bf16.vlgmr.msra.gmra.mxu2 %vm3981_vm13, %v3933_v38 }
 0x632   : > { %3784 = vrot.lane.b32.xlu1 %v3710_v62, %s4790_s30  ;;  %3591 = vrot.lane.b32.xlu2 %v3517_v11, %s4789_s29  ;;  %v7770_v62 = vld [vmem:[#allocation7_spill] sm:$0xff]  ;;  %v7771_v11 = vld [vmem:[#allocation5_spill] sm:$0xff] }
 0x633   : > { %3434 = vrot.lane.b32.xlu0 %v3342_v0, %s4788_s28  ;;  %v7772_v0 = vld [vmem:[#allocation9_spill] sm:$0xff] }
 0x634   : > { %v3767_v16 = vpop.permute.xlu1 %3766  ;;  %v3769_v55 = vpop.permute.xlu2 %3768 }
 0x635   : > { %3862 = vst.msk [vmem:[#allocation4 + $0x8] sm:$0xff] %vm3860_vm12, %v3767_v16  ;;  %v3610_v7 = vpop.permute.xlu0 %3609  ;;  %v3893_v19 = vld [vmem:[#allocation4] sm:$0xff] }
 0x636   : > { %3687 = vst.msk [vmem:[#allocation4 + $0x98] sm:$0xff] %vm3667_vm8, %v3610_v7 }
 0x637   : > { %3880 = vst.msk [vmem:[#allocation4 + $0x98] sm:$0xff] %vm3860_vm12, %v3803_v41 }
 0x63a   : > { %3436 = vrot.lane.b32.xlu1 %v3343_v25, %s4788_s28  ;;  %3786 = vrot.lane.b32.xlu2 %v3711_v34, %s4790_s30  ;;  %v7773_v25 = vld [vmem:[#allocation10_spill] sm:$0xff]  ;;  %v7774_v34 = vld [vmem:[#allocation8_spill] sm:$0xff] }
 0x63b   : > { %3629 = vrot.lane.b32.xlu0 %v6907_v33, %s4789_s29  ;;  %v3519_v33 = vld [vmem:[#allocation3 + $0xc1] sm:$0xff] }
 0x63c   : > { %v3801_v5 = vpop.permute.xlu1 %3800  ;;  %v3614_v53 = vpop.permute.xlu2 %3613  ;;  %v3894_v46 = vld [vmem:[#allocation4 + $0x8] sm:$0xff] }
 0x63d   : > { %3879 = vst.msk [vmem:[#allocation4 + $0x90] sm:$0xff] %vm3860_vm12, %v3801_v5  ;;  %v3576_v14 = vpop.permute.xlu0 %3575  ;;  %v3925_v36 = vpack.c.bf16 %v3894_v46, %v3893_v19  ;;  %v7775_v5 = vld [vmem:[#allocation13_spill] sm:$0xff] }
 0x63e   : > { %3689 = vst.msk [vmem:[#allocation4 + $0xa8] sm:$0xff] %vm3667_vm8, %v3614_v53  ;;  %v3912_v52 = vld [vmem:[#allocation4 + $0x98] sm:$0xff] }
 0x63f   : > { %3670 = vst.msk [vmem:[#allocation4 + $0x10] sm:$0xff] %vm3667_vm8, %v3576_v14  ;;  %4710 = vmatmul.msk.bf16.vlgmr.msra.gmra.mxu1 %vm3981_vm13, %v3925_v36 }
 0x640   : > { %3863 = vst.msk [vmem:[#allocation4 + $0x10] sm:$0xff] %vm3860_vm12, %v3769_v55 }
 0x642   : > { %3820 = vrot.lane.b32.xlu1 %v6994_v30, %s4790_s30  ;;  %3627 = vrot.lane.b32.xlu2 %v6896_v12, %s4789_s29  ;;  %v3520_v30 = vld [vmem:[#allocation3 + $0xc9] sm:$0xff] }
 0x643   : > { %3595 = vrot.lane.b32.xlu0 %v3519_v33, %s4789_s29  ;;  %v3713_v12 = vld [vmem:[#allocation3 + $0xca] sm:$0xff] }
 0x644   : > { %v3578_v27 = vpop.permute.xlu1 %3577  ;;  %v3580_v48 = vpop.permute.xlu2 %3579  ;;  %v3911_v63 = vld [vmem:[#allocation4 + $0x90] sm:$0xff] }
 0x645   : > { %3671 = vst.msk [vmem:[#allocation4 + $0x18] sm:$0xff] %vm3667_vm8, %v3578_v27  ;;  %v3771_v43 = vpop.permute.xlu0 %3770  ;;  %v3934_v2 = vpack.c.bf16 %v3912_v52, %v3911_v63  ;;  %v7776_v27 = vld [vmem:[#allocation15_spill] sm:$0xff] }
 0x646   : > { %3672 = vst.msk [vmem:[#allocation4 + $0x20] sm:$0xff] %vm3667_vm8, %v3580_v48  ;;  %v7777_v48 = vld [vmem:[#allocation11_spill] sm:$0xff] }
 0x647   : > { %3864 = vst.msk [vmem:[#allocation4 + $0x18] sm:$0xff] %vm3860_vm12, %v3771_v43  ;;  %4719 = vmatmul.msk.bf16.gmra.mxu2 %vm3981_vm13, %v3934_v2  ;;  %v3895_v47 = vld [vmem:[#allocation4 + $0x10] sm:$0xff] }
 0x648   : > { %v7778_v63 = vld [vmem:[#allocation19_spill] sm:$0xff] }
 0x64a   : > { %3597 = vrot.lane.b32.xlu1 %v3520_v30, %s4789_s29  ;;  %3822 = vrot.lane.b32.xlu2 %v7001_v6, %s4790_s30 }
 0x64b   : > { %3790 = vrot.lane.b32.xlu0 %v3713_v12, %s4790_s30 }
 0x64c   : > { %v3612_v51 = vpop.permute.xlu1 %3611  ;;  %v3775_v24 = vpop.permute.xlu2 %3774 }
 0x64d   : > { %3688 = vst.msk [vmem:[#allocation4 + $0xa0] sm:$0xff] %vm3667_vm8, %v3612_v51  ;;  %v3805_v20 = vpop.permute.xlu0 %3804 }
 0x64e   : > { %3881 = vst.msk [vmem:[#allocation4 + $0xa0] sm:$0xff] %vm3860_vm12, %v3805_v20  ;;  %v3896_v40 = vld [vmem:[#allocation4 + $0x18] sm:$0xff]  ;;  %v7780_v20 = vld [vmem:[#allocation17_spill] sm:$0xff] }
 0x64f   : > { %v3926_v28 = vpack.c.bf16 %v3896_v40, %v3895_v47  ;;  %v7781_v47 = vld [vmem:[#allocation25_spill] sm:$0xff] }
 0x651   : > { %4711 = vmatmul.msk.bf16.gmra.mxu1 %vm3981_vm13, %v3926_v28 }
 0x652   : > { %3438 = vrot.lane.b32.xlu1 %v3344_v3, %s4788_s28  ;;  %3788 = vrot.lane.b32.xlu2 %v3712_v32, %s4790_s30  ;;  %v7783_v32 = vld [vmem:[#allocation23_spill] sm:$0xff] }
 0x653   : > { %3631 = vrot.lane.b32.xlu0 %v3537_v44, %s4789_s29  ;;  %v7782_v44 = vld [vmem:[#allocation27_spill] sm:$0xff] }
 0x654   : > { %v3807_v6 = vpop.permute.xlu1 %3806  ;;  %v3809_v10 = vpop.permute.xlu2 %3808 }
 0x655   : > { %3882 = vst.msk [vmem:[#allocation4 + $0xa8] sm:$0xff] %vm3860_vm12, %v3807_v6  ;;  %v3582_v50 = vpop.permute.xlu0 %3581  ;;  %v3913_v57 = vld [vmem:[#allocation4 + $0xa0] sm:$0xff]  ;;  %v7784_v6 = vld [vmem:[#allocation31_spill] sm:$0xff] }
 0x656   : > { %3673 = vst.msk [vmem:[#allocation4 + $0x28] sm:$0xff] %vm3667_vm8, %v3582_v50 }
 0x657   : > { %3866 = vst.msk [vmem:[#allocation4 + $0x28] sm:$0xff] %vm3860_vm12, %v3775_v24  ;;  %v7779_v24 = vld [vmem:[#allocation21_spill] sm:$0xff] }
 0x65a   : > { %3633 = vrot.lane.b32.xlu1 %v3538_v42, %s4789_s29  ;;  %3440 = vrot.lane.b32.xlu2 %v3345_v61, %s4788_s28  ;;  %s7370_s28 = scalar_lea.vmem %s7555_s7, %s4728_s23 }
 0x65b   : > { %3826 = vrot.lane.b32.xlu0 %v3731_v29, %s4790_s30 }
 0x65c   : > { %v3773_v15 = vpop.permute.xlu1 %3772  ;;  %v3586_v39 = vpop.permute.xlu2 %3585  ;;  %v3914_v4 = vld [vmem:[#allocation4 + $0xa8] sm:$0xff] }
 0x65d   : > { %3865 = vst.msk [vmem:[#allocation4 + $0x20] sm:$0xff] %vm3860_vm12, %v3773_v15  ;;  %v3616_v8 = vpop.permute.xlu0 %3615  ;;  %v3935_v37 = vpack.c.bf16 %v3914_v4, %v3913_v57  ;;  %v7786_v57 = vld [vmem:[#allocation29_spill] sm:$0xff]  ;;  %v7787_v4 = vld [vmem:[#allocation14_spill] sm:$0xff] }
 0x65e   : > { %3675 = vst.msk [vmem:[#allocation4 + $0x38] sm:$0xff] %vm3667_vm8, %v3586_v39  ;;  %v3898_v17 = vld [vmem:[#allocation4 + $0x28] sm:$0xff]  ;;  %v7785_v39 = vld [vmem:[#allocation33_spill] sm:$0xff] }
 0x65f   : > { %3690 = vst.msk [vmem:[#allocation4 + $0xb0] sm:$0xff] %vm3667_vm8, %v3616_v8  ;;  %4720 = vmatmul.msk.bf16.gmra.mxu2 %vm3981_vm13, %v3935_v37 }
 0x660   : > { %3883 = vst.msk [vmem:[#allocation4 + $0xb0] sm:$0xff] %vm3860_vm12, %v3809_v10 }
 0x662   : > { %3599 = vrot.lane.b32.xlu1 %v3521_v45, %s4789_s29  ;;  %3824 = vrot.lane.b32.xlu2 %v3730_v22, %s4790_s30  ;;  %v7788_v45 = vld [vmem:[#allocation16_spill] sm:$0xff] }
 0x663   : > { %3792 = vrot.lane.b32.xlu0 %v3714_v35, %s4790_s30  ;;  %v7789_v35 = vld [vmem:[#allocation12_spill] sm:$0xff] }
 0x664   : > { %v3618_v9 = vpop.permute.xlu1 %3617  ;;  %v3429_v1 = vpop.permute.xlu2 %3428  ;;  %v3897_v60 = vld [vmem:[#allocation4 + $0x20] sm:$0xff] }
 0x665   : > { %3691 = vst.msk [vmem:[#allocation4 + $0xb8] sm:$0xff] %vm3667_vm8, %v3618_v9  ;;  %v3811_v49 = vpop.permute.xlu0 %3810  ;;  %v3927_v31 = vpack.c.bf16 %v3898_v17, %v3897_v60  ;;  %v7790_v9 = vld [vmem:[#allocation20_spill] sm:$0xff] }
 0x666   : > { %3500 = vst.msk [vmem:[#allocation4 + $0xc8] sm:$0xff] %vm3474_vm6, %v3429_v1 }
 0x667   : > { %3884 = vst.msk [vmem:[#allocation4 + $0xb8] sm:$0xff] %vm3860_vm12, %v3811_v49  ;;  %4712 = vmatmul.msk.bf16.gmra.mxu1 %vm3981_vm13, %v3927_v31  ;;  %v3915_v26 = vld [vmem:[#allocation4 + $0xb0] sm:$0xff] }
 0x66a   : > { %3794 = vrot.lane.b32.xlu1 %v3715_v18, %s4790_s30  ;;  %3601 = vrot.lane.b32.xlu2 %v3522_v58, %s4789_s29  ;;  %v7791_v58 = vld [vmem:[#allocation22_spill] sm:$0xff] }
 0x66b   : > { %4157 = vrot.lane.b32.xlu0 %v7769_v13, %s4791_s18  ;;  %v7792_v13 = vld [vmem:[#allocation18_spill] sm:$0xff] }
 0x66c   : > { %v3584_v59 = vpop.permute.xlu1 %3583  ;;  %v3813_v41 = vpop.permute.xlu2 %3812 }
 0x66d   : > { %3674 = vst.msk [vmem:[#allocation4 + $0x30] sm:$0xff] %vm3667_vm8, %v3584_v59  ;;  %v3777_v54 = vpop.permute.xlu0 %3776  ;;  %v7793_v59 = vld [vmem:[#allocation26_spill] sm:$0xff] }
 0x66e   : > { %3867 = vst.msk [vmem:[#allocation4 + $0x30] sm:$0xff] %vm3860_vm12, %v3777_v54  ;;  %v3916_v23 = vld [vmem:[#allocation4 + $0xb8] sm:$0xff] }
 0x66f   : > { %v3936_v38 = vpack.c.bf16 %v3916_v23, %v3915_v26 }
 0x671   : > { %4721 = vmatmul.msk.bf16.gmra.mxu2 %vm3981_vm13, %v3936_v38 }
 0x672   : > { %4159 = vrot.lane.b32.xlu1 %v7770_v62, %s4791_s18  ;;  %4155 = vrot.lane.b32.xlu2 %v7771_v11, %s4791_s18  ;;  %v7794_v11 = vld [vmem:[#allocation28_spill] sm:$0xff] }
 0x673   : > { %4163 = vrot.lane.b32.xlu0 %v7772_v0, %s4791_s18  ;;  %v7795_v0 = vld [vmem:[#allocation24_spill] sm:$0xff] }
 0x674   : > { %v3779_v16 = vpop.permute.xlu1 %3778  ;;  %v3590_v55 = vpop.permute.xlu2 %3589 }
 0x675   : > { %3868 = vst.msk [vmem:[#allocation4 + $0x38] sm:$0xff] %vm3860_vm12, %v3779_v16  ;;  %v3620_v7 = vpop.permute.xlu0 %3619  ;;  %v3899_v46 = vld [vmem:[#allocation4 + $0x30] sm:$0xff]  ;;  %v7796_v16 = vld [vmem:[#allocation32_spill] sm:$0xff] }
 0x676   : > { %3677 = vst.msk [vmem:[#allocation4 + $0x48] sm:$0xff] %vm3667_vm8, %v3590_v55 }
 0x677   : > { %3692 = vst.msk [vmem:[#allocation4 + $0xc0] sm:$0xff] %vm3667_vm8, %v3620_v7 }
 0x678   : > { %3885 = vst.msk [vmem:[#allocation4 + $0xc0] sm:$0xff] %vm3860_vm12, %v3813_v41 }
 0x67a   : > { %4165 = vrot.lane.b32.xlu1 %v7773_v25, %s4791_s18  ;;  %4161 = vrot.lane.b32.xlu2 %v7774_v34, %s4791_s18  ;;  %v7797_v34 = vld [vmem:[#allocation34_spill] sm:$0xff] }
 0x67b   : > { %4169 = vrot.lane.b32.xlu0 %v7775_v5, %s4791_s18  ;;  %v7798_v5 = vld [vmem:[#allocation30_spill] sm:$0xff] }
 0x67c   : > { %v3622_v53 = vpop.permute.xlu1 %3621  ;;  %v3431_v19 = vpop.permute.xlu2 %3430  ;;  %v3900_v14 = vld [vmem:[#allocation4 + $0x38] sm:$0xff] }
 0x67d   : > { %3693 = vst.msk [vmem:[#allocation4 + $0xc8] sm:$0xff] %vm3667_vm8, %v3622_v53  ;;  %v3815_v36 = vpop.permute.xlu0 %3814  ;;  %v3928_v33 = vpack.c.bf16 %v3900_v14, %v3899_v46 }
 0x67e   : > { %3501 = vst.msk [vmem:[#allocation4 + $0xd0] sm:$0xff] %vm3474_vm6, %v3431_v19 }
 0x67f   : > { %3886 = vst.msk [vmem:[#allocation4 + $0xc8] sm:$0xff] %vm3860_vm12, %v3815_v36  ;;  %4713 = vmatmul.msk.bf16.gmra.mxu1 %vm3981_vm13, %v3928_v33  ;;  %v3917_v30 = vld [vmem:[#allocation4 + $0xc0] sm:$0xff] }
 0x682   : > { %4171 = vrot.lane.b32.xlu1 %v7776_v27, %s4791_s18  ;;  %4167 = vrot.lane.b32.xlu2 %v7777_v48, %s4791_s18 }
 0x683   : > { %4175 = vrot.lane.b32.xlu0 %v7778_v63, %s4791_s18 }
 0x684   : > { %v3588_v52 = vpop.permute.xlu1 %3587  ;;  %v3626_v43 = vpop.permute.xlu2 %3625 }
 0x685   : > { %3676 = vst.msk [vmem:[#allocation4 + $0x40] sm:$0xff] %vm3667_vm8, %v3588_v52  ;;  %v3781_v2 = vpop.permute.xlu0 %3780 }
 0x686   : > { %3869 = vst.msk [vmem:[#allocation4 + $0x40] sm:$0xff] %vm3860_vm12, %v3781_v2  ;;  %v3918_v12 = vld [vmem:[#allocation4 + $0xc8] sm:$0xff] }
 0x687   : > { %v3937_v51 = vpack.c.bf16 %v3918_v12, %v3917_v30 }
 0x689   : > { %4722 = vmatmul.msk.bf16.gmra.mxu2 %vm3981_vm13, %v3937_v51 }
 0x68a   : > { %4177 = vrot.lane.b32.xlu1 %v7779_v24, %s4791_s18  ;;  %4173 = vrot.lane.b32.xlu2 %v7780_v20, %s4791_s18 }
 0x68b   : > { %4181 = vrot.lane.b32.xlu0 %v7781_v47, %s4791_s18  ;;  %v7362_v47 = vld [vmem:[%s7554_s6] ss:$0 sm:$0xff] }
 0x68c   : > { %v3783_v40 = vpop.permute.xlu1 %3782  ;;  %v3592_v28 = vpop.permute.xlu2 %3591 }
 0x68d   : > { %3870 = vst.msk [vmem:[#allocation4 + $0x48] sm:$0xff] %vm3860_vm12, %v3783_v40  ;;  %v3433_v3 = vpop.permute.xlu0 %3432  ;;  %v3901_v42 = vld [vmem:[#allocation4 + $0x40] sm:$0xff] }
 0x68e   : > { %3678 = vst.msk [vmem:[#allocation4 + $0x50] sm:$0xff] %vm3667_vm8, %v3592_v28 }
 0x68f   : > { %3502 = vst.msk [vmem:[#allocation4 + $0xd8] sm:$0xff] %vm3474_vm6, %v3433_v3 }
 0x690   : > { %3695 = vst.msk [vmem:[#allocation4 + $0xd8] sm:$0xff] %vm3667_vm8, %v3626_v43 }
 0x692   : > { %4183 = vrot.lane.b32.xlu1 %v7782_v44, %s4791_s18  ;;  %4179 = vrot.lane.b32.xlu2 %v7783_v32, %s4791_s18 }
 0x693   : > { %4187 = vrot.lane.b32.xlu0 %v7784_v6, %s4791_s18 }
 0x694   : > { %v3624_v10 = vpop.permute.xlu1 %3623  ;;  %v3787_v50 = vpop.permute.xlu2 %3786  ;;  %v3902_v61 = vld [vmem:[#allocation4 + $0x48] sm:$0xff] }
 0x695   : > { %3694 = vst.msk [vmem:[#allocation4 + $0xd0] sm:$0xff] %vm3667_vm8, %v3624_v10  ;;  %v3817_v29 = vpop.permute.xlu0 %3816  ;;  %v3929_v15 = vpack.c.bf16 %v3902_v61, %v3901_v42 }
 0x696   : > { %3887 = vst.msk [vmem:[#allocation4 + $0xd0] sm:$0xff] %vm3860_vm12, %v3817_v29 }
 0x697   : > { %4714 = vmatmul.msk.bf16.gmra.mxu1 %vm3981_vm13, %v3929_v15 }
 0x69a   : > { %4189 = vrot.lane.b32.xlu1 %v7785_v39, %s4791_s18  ;;  %4185 = vrot.lane.b32.xlu2 %v7786_v57, %s4791_s18 }
 0x69b   : > { %4193 = vrot.lane.b32.xlu0 %v7787_v4, %s4791_s18 }
 0x69c   : > { %v3819_v8 = vpop.permute.xlu1 %3818  ;;  %v3628_v37 = vpop.permute.xlu2 %3627 }
 0x69d   : > { %3888 = vst.msk [vmem:[#allocation4 + $0xd8] sm:$0xff] %vm3860_vm12, %v3819_v8  ;;  %v3594_v22 = vpop.permute.xlu0 %3593  ;;  %v3919_v17 = vld [vmem:[#allocation4 + $0xd0] sm:$0xff] }
 0x69e   : > { %3679 = vst.msk [vmem:[#allocation4 + $0x58] sm:$0xff] %vm3667_vm8, %v3594_v22 }
 0x69f   : > { %3872 = vst.msk [vmem:[#allocation4 + $0x58] sm:$0xff] %vm3860_vm12, %v3787_v50 }
 0x6a2   : > { %4195 = vrot.lane.b32.xlu1 %v7788_v45, %s4791_s18  ;;  %4191 = vrot.lane.b32.xlu2 %v7789_v35, %s4791_s18 }
 0x6a3   : > { %4199 = vrot.lane.b32.xlu0 %v7790_v9, %s4791_s18 }
 0x6a4   : > { %v3785_v1 = vpop.permute.xlu1 %3784  ;;  %v3823_v60 = vpop.permute.xlu2 %3822  ;;  %v3920_v49 = vld [vmem:[#allocation4 + $0xd8] sm:$0xff] }
 0x6a5   : > { %3871 = vst.msk [vmem:[#allocation4 + $0x50] sm:$0xff] %vm3860_vm12, %v3785_v1  ;;  %v3435_v31 = vpop.permute.xlu0 %3434  ;;  %v3938_v18 = vpack.c.bf16 %v3920_v49, %v3919_v17 }
 0x6a6   : > { %3503 = vst.msk [vmem:[#allocation4 + $0xe0] sm:$0xff] %vm3474_vm6, %v3435_v31  ;;  %v3904_v23 = vld [vmem:[#allocation4 + $0x58] sm:$0xff] }
 0x6a7   : > { %3696 = vst.msk [vmem:[#allocation4 + $0xe0] sm:$0xff] %vm3667_vm8, %v3628_v37  ;;  %4723 = vmatmul.msk.bf16.gmra.mxu2 %vm3981_vm13, %v3938_v18 }
 0x6aa   : > { %4201 = vrot.lane.b32.xlu1 %v7791_v58, %s4791_s18  ;;  %4197 = vrot.lane.b32.xlu2 %v7792_v13, %s4791_s18 }
 0x6ab   : > { %4205 = vrot.lane.b32.xlu0 %v7793_v59, %s4791_s18 }
 0x6ac   : > { %v3437_v41 = vpop.permute.xlu1 %3436  ;;  %v3789_v54 = vpop.permute.xlu2 %3788  ;;  %v3903_v26 = vld [vmem:[#allocation4 + $0x50] sm:$0xff] }
 0x6ad   : > { %3504 = vst.msk [vmem:[#allocation4 + $0xe8] sm:$0xff] %vm3474_vm6, %v3437_v41  ;;  %v3630_v38 = vpop.permute.xlu0 %3629  ;;  %v3930_v62 = vpack.c.bf16 %v3904_v23, %v3903_v26 }
 0x6ae   : > { %3697 = vst.msk [vmem:[#allocation4 + $0xe8] sm:$0xff] %vm3667_vm8, %v3630_v38 }
 0x6af   : > { %3890 = vst.msk [vmem:[#allocation4 + $0xe8] sm:$0xff] %vm3860_vm12, %v3823_v60  ;;  %4715 = vmatmul.msk.bf16.gmra.mxu1 %vm3981_vm13, %v3930_v62 }
 0x6b2   : > { %4207 = vrot.lane.b32.xlu1 %v7794_v11, %s4791_s18  ;;  %4203 = vrot.lane.b32.xlu2 %v7795_v0, %s4791_s18 }
 0x6b3   : > { %4211 = vrot.lane.b32.xlu0 %v7796_v16, %s4791_s18 }
 0x6b4   : > { %v3821_v55 = vpop.permute.xlu1 %3820  ;;  %v3441_v7 = vpop.permute.xlu2 %3440 }
 0x6b5   : > { %3889 = vst.msk [vmem:[#allocation4 + $0xe0] sm:$0xff] %vm3860_vm12, %v3821_v55  ;;  %v3596_v25 = vpop.permute.xlu0 %3595  ;;  %v7342_v48 = vpop.f32.mrf.mxu2 }
 0x6b6   : > { %3506 = vst.msk [vmem:[#allocation4 + $0xf8] sm:$0xff] %vm3474_vm6, %v3441_v7  ;;  %v3922_v46 = vld [vmem:[#allocation4 + $0xe8] sm:$0xff] }
 0x6b7   : > { %3680 = vst.msk [vmem:[#allocation4 + $0x60] sm:$0xff] %vm3667_vm8, %v3596_v25 }
 0x6b8   : > { %3873 = vst.msk [vmem:[#allocation4 + $0x60] sm:$0xff] %vm3860_vm12, %v3789_v54 }
 0x6ba   : > { %4213 = vrot.lane.b32.xlu1 %v7797_v34, %s4791_s18  ;;  %4209 = vrot.lane.b32.xlu2 %v7798_v5, %s4791_s18 }
 0x6bb   : > { %4217 = vrot.lane.b32.xlu0 %v6728_v56, %s4791_s18 }
 0x6bc   : > { %v3598_v53 = vpop.permute.xlu1 %3597  ;;  %v3921_v19 = vld [vmem:[#allocation4 + $0xe0] sm:$0xff]  ;;  %v3825_v14 = vpop.permute.xlu2 %3824 }
 0x6bd   : > { %3681 = vst.msk [vmem:[#allocation4 + $0x68] sm:$0xff] %vm3667_vm8, %v3598_v53  ;;  %v4043_v36 = vpop.f32.mrf.mxu1  ;;  %v3939_v33 = vpack.c.bf16 %v3922_v46, %v3921_v19  ;;  %v3791_v27 = vpop.permute.xlu0 %3790 }
 0x6be   : > { %3874 = vst.msk [vmem:[#allocation4 + $0x68] sm:$0xff] %vm3860_vm12, %v3791_v27  ;;  %v7356_v51 = vpop.f32.mrf.mxu2 }
 0x6bf   : > { %4724 = vmatmul.msk.bf16.gmra.mxu2 %vm3981_vm13, %v3939_v33  ;;  %v3905_v2 = vld [vmem:[#allocation4 + $0x60] sm:$0xff] }
 0x6c2   : > { %4215 = vrot.lane.b32.xlu2 %v6711_v21, %s4791_s18  ;;  %v7354_v21 = vld [vmem:[%s7553_s5] ss:$0 sm:$0xff] }
 0x6c3   : > { %v4044_v24 = vadd.f32 %v7354_v21, %v4043_v36 }
 0x6c4   : > { %v3439_v63 = vpop.permute.xlu1 %3438  ;;  %v3602_v56 = vpop.permute.xlu2 %3601 }
 0x6c5   : > { %3505 = vst.msk [vmem:[#allocation4 + $0xf0] sm:$0xff] %vm3474_vm6, %v3439_v63  ;;  %v4045_v52 = vpop.f32.mrf.mxu1  ;;  %v3632_v43 = vpop.permute.xlu0 %3631  ;;  %v3906_v30 = vld [vmem:[#allocation4 + $0x68] sm:$0xff] }
 0x6c6   : > { %3683 = vst.msk [vmem:[#allocation4 + $0x78] sm:$0xff] %vm3667_vm8, %v3602_v56  ;;  %v3931_v12 = vpack.c.bf16 %v3906_v30, %v3905_v2  ;;  %v4046_v45 = vadd.f32 %v7354_v21, %v4045_v52 }
 0x6c7   : > { %3698 = vst.msk [vmem:[#allocation4 + $0xf0] sm:$0xff] %vm3667_vm8, %v3632_v43 }
 0x6c8   : > { %3891 = vst.msk [vmem:[#allocation4 + $0xf0] sm:$0xff] %vm3860_vm12, %v3825_v14  ;;  %4716 = vmatmul.msk.bf16.gmra.mxu1 %vm3981_vm13, %v3931_v12 }
 0x6ca   : > { %v7375_v10 = vpop.f32.mrf.mxu2 }
 0x6cb   : > { %v4089_v2 = vadd.f32 %v7354_v21, %v7375_v10 }
 0x6cc   : > { %v3634_v20 = vpop.permute.xlu1 %3633  ;;  %v4156_v40 = vpop.permute.xlu2 %4155 }
 0x6cd   : > { %3699 = vst.msk [vmem:[#allocation4 + $0xf8] sm:$0xff] %vm3667_vm8, %v3634_v20  ;;  %v4251_v28 = vadd.f32 %v4156_v40, %v4044_v24  ;;  %v3827_v3 = vpop.permute.xlu0 %3826 }
 0x6ce   : > { %v4048_v44 = vpop.f32.mrf.mxu1  ;;  %3892 = vst.msk [vmem:[#allocation4 + $0xf8] sm:$0xff] %vm3860_vm12, %v3827_v3 }
 0x6cf   : > { %vm4283_vm15 = vcmp.gt.f32.partialorder %v4251_v28, 0.0  ;;  %v4319_v32 = vmul.f32 %v7362_v47, %v4251_v28  ;;  %v3923_v42 = vld [vmem:[#allocation4 + $0xf0] sm:$0xff]  ;;  %v4049_v31 = vadd.f32 %v7354_v21, %v4048_v44 }
 0x6d1   : > { %v4351_v6 = vsel %vm4283_vm15, %v4251_v28, %v4319_v32 }
 0x6d2   : > { %4383 = vst.msk [vmem:[%s7370_s28] sm:$0xff] %vm2205_vm11, %v4351_v6  ;;  %v7384_v1 = vpop.f32.mrf.mxu2 }
 0x6d4   : > { %v3600_v50 = vpop.permute.xlu1 %3599  ;;  %v4162_v61 = vpop.permute.xlu2 %4161 }
 0x6d5   : > { %3682 = vst.msk [vmem:[#allocation4 + $0x70] sm:$0xff] %vm3667_vm8, %v3600_v50  ;;  %v3793_v29 = vpop.permute.xlu0 %3792  ;;  %v3924_v39 = vld [vmem:[#allocation4 + $0xf8] sm:$0xff] }
 0x6d6   : > { %v4050_v15 = vpop.f32.mrf.mxu1  ;;  %3875 = vst.msk [vmem:[#allocation4 + $0x70] sm:$0xff] %vm3860_vm12, %v3793_v29  ;;  %v3940_v4 = vpack.c.bf16 %v3924_v39, %v3923_v42  ;;  %v4084_v29 = vadd.f32 %v7354_v21, %v7342_v48 }
 0x6d7   : > { %v4051_v57 = vadd.f32 %v7354_v21, %v4050_v15 }
 0x6d8   : > { %4725 = vmatmul.msk.bf16.gmra.mxu2 %vm3981_vm13, %v3940_v4 }
 0x6d9   : > { %v4254_v8 = vadd.f32 %v4162_v61, %v4051_v57 }
 0x6db   : > { %vm4286_vm0 = vcmp.gt.f32.partialorder %v4254_v8, 0.0  ;;  %v4322_v37 = vmul.f32 %v7362_v47, %v4254_v8 }
 0x6dc   : > { %v3795_v22 = vpop.permute.xlu1 %3794  ;;  %v4168_v9 = vpop.permute.xlu2 %4167 }
 0x6dd   : > { %v4354_v35 = vsel %vm4286_vm0, %v4254_v8, %v4322_v37  ;;  %3876 = vst.msk [vmem:[#allocation4 + $0x78] sm:$0xff] %vm3860_vm12, %v3795_v22  ;;  %v4158_v60 = vpop.permute.xlu0 %4157  ;;  %v3907_v59 = vld [vmem:[#allocation4 + $0x70] sm:$0xff] }
 0x6de   : > { %4386 = vst.msk [vmem:[%s7370_s28 + $0x18] sm:$0xff] %vm2205_vm11, %v4354_v35  ;;  %v4252_v17 = vadd.f32 %v4158_v60, %v4046_v45  ;;  %v4086_v60 = vadd.f32 %v7354_v21, %v7356_v51 }
 0x6e0   : > { %vm4284_vm1 = vcmp.gt.f32.partialorder %v4252_v17, 0.0  ;;  %v4320_v49 = vmul.f32 %v7362_v47, %v4252_v17 }
 0x6e2   : > { %v4352_v18 = vsel %vm4284_vm1, %v4252_v17, %v4320_v49  ;;  %v7395_v62 = vpop.f32.mrf.mxu2 }
 0x6e3   : > { %4384 = vst.msk [vmem:[%s7370_s28 + $0x8] sm:$0xff] %vm2205_vm11, %v4352_v18 }
 0x6e4   : > { %v4160_v58 = vpop.permute.xlu1 %4159  ;;  %v4053_v13 = vpop.f32.mrf.mxu1  ;;  %v3908_v41 = vld [vmem:[#allocation4 + $0x78] sm:$0xff] }
 0x6e5   : > { %v4253_v54 = vadd.f32 %v4160_v58, %v4049_v31  ;;  %v7392_v26 = vpop.permute.xlu2 %4173  ;;  %v4054_v23 = vadd.f32 %v7354_v21, %v4053_v13  ;;  %v3932_v38 = vpack.c.bf16 %v3908_v41, %v3907_v59  ;;  %v4164_v11 = vpop.permute.xlu0 %4163  ;;  %v4091_v58 = vadd.f32 %v7354_v21, %v7384_v1 }
 0x6e7   : > { %vm4285_vm2 = vcmp.gt.f32.partialorder %v4253_v54, 0.0  ;;  %v4321_v0 = vmul.f32 %v7362_v47, %v4253_v54  ;;  %v4255_v16 = vadd.f32 %v4164_v11, %v4054_v23  ;;  %4717 = vmatmul.msk.bf16.gmra.mxu1 %vm3981_vm13, %v3932_v38 }
 0x6e9   : > { %v4353_v55 = vsel %vm4285_vm2, %v4253_v54, %v4321_v0  ;;  %vm4287_vm10 = vcmp.gt.f32.partialorder %v4255_v16, 0.0  ;;  %v4323_v7 = vmul.f32 %v7362_v47, %v4255_v16 }
 0x6ea   : > { %4385 = vst.msk [vmem:[%s7370_s28 + $0x10] sm:$0xff] %vm2205_vm11, %v4353_v55  ;;  %v4095_v36 = vpop.f32.mrf.mxu2 }
 0x6eb   : > { %v4355_v25 = vsel %vm4287_vm10, %v4255_v16, %v4323_v7  ;;  %v4096_v10 = vadd.f32 %v7354_v21, %v4095_v36  ;;  %v4094_v16 = vadd.f32 %v7354_v21, %v7395_v62 }
 0x6ec   : > { %4387 = vst.msk [vmem:[%s7370_s28 + $0x20] sm:$0xff] %vm2205_vm11, %v4355_v25  ;;  %v4166_v34 = vpop.permute.xlu1 %4165  ;;  %v4055_v5 = vpop.f32.mrf.mxu1 }
 0x6ed   : > { %v7404_v53 = vpop.permute.xlu2 %4179  ;;  %v4056_v19 = vadd.f32 %v7354_v21, %v4055_v5  ;;  %v4170_v46 = vpop.permute.xlu0 %4169 }
 0x6ef   : > { %v4256_v14 = vadd.f32 %v4166_v34, %v4056_v19 }
 0x6f1   : > { %vm4288_vm9 = vcmp.gt.f32.partialorder %v4256_v14, 0.0  ;;  %v4324_v33 = vmul.f32 %v7362_v47, %v4256_v14 }
 0x6f3   : > { %v4356_v27 = vsel %vm4288_vm9, %v4256_v14, %v4324_v33 }
 0x6f4   : > { %4388 = vst.msk [vmem:[%s7370_s28 + $0x28] sm:$0xff] %vm2205_vm11, %v4356_v27  ;;  %v7410_v63 = vpop.permute.xlu1 %4171  ;;  %v7416_v43 = vpop.f32.mrf.mxu2 }
 0x6f5   : > { %v7412_v56 = vpop.permute.xlu2 %4185  ;;  %v7414_v52 = vpop.permute.xlu0 %4175  ;;  %v4099_v34 = vadd.f32 %v7354_v21, %v7416_v43 }
 0x6fc   : > { %v7420_v30 = vpop.permute.xlu1 %4177  ;;  %v4058_v24 = vpop.f32.mrf.mxu1 }
 0x6fd   : > { %v4192_v12 = vpop.permute.xlu2 %4191  ;;  %v7422_v40 = vpop.permute.xlu0 %4181  ;;  %v4059_v28 = vadd.f32 %v7354_v21, %v4058_v24 }
 0x6fe   : > { %v4269_v20 = vadd.f32 %v4192_v12, %v4089_v2  ;;  %v7430_v50 = vpop.f32.mrf.mxu2 }
 0x6ff   : > { %v4257_v44 = vadd.f32 %v4168_v9, %v4059_v28  ;;  %v4101_v24 = vadd.f32 %v7354_v21, %v7430_v50 }
 0x700   : > { %vm4301_vm14 = vcmp.gt.f32.partialorder %v4269_v20, 0.0  ;;  %v4337_v3 = vmul.f32 %v7362_v47, %v4269_v20 }
 0x701   : > { %vm4289_vm3 = vcmp.gt.f32.partialorder %v4257_v44, 0.0  ;;  %v4325_v6 = vmul.f32 %v7362_v47, %v4257_v44 }
 0x702   : > { %v4369_v32 = vsel %vm4301_vm14, %v4269_v20, %v4337_v3 }
 0x703   : > { %4401 = vst.msk [vmem:[%s7370_s28 + $0x90] sm:$0xff] %vm2205_vm11, %v4369_v32  ;;  %v4357_v42 = vsel %vm4289_vm3, %v4257_v44, %v4325_v6 }
 0x704   : > { %v7432_v61 = vpop.permute.xlu1 %4183  ;;  %4389 = vst.msk [vmem:[%s7370_s28 + $0x30] sm:$0xff] %vm2205_vm11, %v4357_v42  ;;  %v4060_v39 = vpop.f32.mrf.mxu1 }
 0x705   : > { %v4198_v15 = vpop.permute.xlu2 %4197  ;;  %v4188_v4 = vpop.permute.xlu0 %4187  ;;  %v4061_v8 = vadd.f32 %v7354_v21, %v4060_v39 }
 0x706   : > { %v4272_v57 = vadd.f32 %v4198_v15, %v4096_v10  ;;  %v4267_v37 = vadd.f32 %v4188_v4, %v4084_v29 }
 0x707   : > { %v4258_v45 = vadd.f32 %v4170_v46, %v4061_v8 }
 0x708   : > { %vm4304_vm4 = vcmp.gt.f32.partialorder %v4272_v57, 0.0  ;;  %v4340_v22 = vmul.f32 %v7362_v47, %v4272_v57  ;;  %vm4299_vm5 = vcmp.gt.f32.partialorder %v4267_v37, 0.0  ;;  %v4335_v35 = vmul.f32 %v7362_v47, %v4267_v37 }
 0x709   : > { %vm4290_vm6 = vcmp.gt.f32.partialorder %v4258_v45, 0.0  ;;  %v4326_v9 = vmul.f32 %v7362_v47, %v4258_v45 }
 0x70a   : > { %v4372_v48 = vsel %vm4304_vm4, %v4272_v57, %v4340_v22  ;;  %v4367_v17 = vsel %vm4299_vm5, %v4267_v37, %v4335_v35 }
 0x70b   : > { %4404 = vst.msk [vmem:[%s7370_s28 + $0xa8] sm:$0xff] %vm2205_vm11, %v4372_v48  ;;  %v4358_v49 = vsel %vm4290_vm6, %v4258_v45, %v4326_v9 }
 0x70c   : > { %4399 = vst.msk [vmem:[%s7370_s28 + $0x80] sm:$0xff] %vm2205_vm11, %v4367_v17  ;;  %v4103_v31 = vpop.f32.mrf.mxu2  ;;  %v4190_v18 = vpop.permute.xlu1 %4189 }
 0x70d   : > { %4390 = vst.msk [vmem:[%s7370_s28 + $0x38] sm:$0xff] %vm2205_vm11, %v4358_v49  ;;  %v4104_v13 = vadd.f32 %v7354_v21, %v4103_v31  ;;  %v4268_v59 = vadd.f32 %v4190_v18, %v4086_v60  ;;  %v4204_v41 = vpop.permute.xlu2 %4203  ;;  %v4194_v51 = vpop.permute.xlu0 %4193 }
 0x70e   : > { %v4270_v38 = vadd.f32 %v4194_v51, %v4091_v58 }
 0x70f   : > { %vm4300_vm7 = vcmp.gt.f32.partialorder %v4268_v59, 0.0  ;;  %v4336_v54 = vmul.f32 %v7362_v47, %v4268_v59  ;;  %v4275_v23 = vadd.f32 %v4204_v41, %v4104_v13 }
 0x710   : > { %vm4302_vm12 = vcmp.gt.f32.partialorder %v4270_v38, 0.0  ;;  %v4338_v1 = vmul.f32 %v7362_v47, %v4270_v38 }
 0x711   : > { %v4368_v11 = vsel %vm4300_vm7, %v4268_v59, %v4336_v54  ;;  %vm4307_vm8 = vcmp.gt.f32.partialorder %v4275_v23, 0.0  ;;  %v4343_v0 = vmul.f32 %v7362_v47, %v4275_v23 }
 0x712   : > { %4400 = vst.msk [vmem:[%s7370_s28 + $0x88] sm:$0xff] %vm2205_vm11, %v4368_v11  ;;  %v4370_v7 = vsel %vm4302_vm12, %v4270_v38, %v4338_v1 }
 0x713   : > { %v4375_v55 = vsel %vm4307_vm8, %v4275_v23, %v4343_v0  ;;  %4402 = vst.msk [vmem:[%s7370_s28 + $0x98] sm:$0xff] %vm2205_vm11, %v4370_v7 }
 0x714   : > { %4407 = vst.msk [vmem:[%s7370_s28 + $0xc0] sm:$0xff] %vm2205_vm11, %v4375_v55  ;;  %v4196_v25 = vpop.permute.xlu1 %4195  ;;  %v4063_v19 = vpop.f32.mrf.mxu1 }
 0x715   : > { %v4271_v5 = vadd.f32 %v4196_v25, %v4094_v16  ;;  %v4200_v46 = vpop.permute.xlu0 %4199  ;;  %v4064_v14 = vadd.f32 %v7354_v21, %v4063_v19  ;;  %v4105_v43 = vpop.f32.mrf.mxu2 }
 0x716   : > { %v4273_v36 = vadd.f32 %v4200_v46, %v4099_v34  ;;  %v4210_v13 = vpop.permute.xlu2 %4209 }
 0x717   : > { %vm4303_vm13 = vcmp.gt.f32.partialorder %v4271_v5, 0.0  ;;  %v4339_v62 = vmul.f32 %v7362_v47, %v4271_v5  ;;  %v4259_v33 = vadd.f32 %v7410_v63, %v4064_v14  ;;  %v4106_v63 = vadd.f32 %v7354_v21, %v4105_v43 }
 0x718   : > { %vm4305_vm15 = vcmp.gt.f32.partialorder %v4273_v36, 0.0  ;;  %v4341_v2 = vmul.f32 %v7362_v47, %v4273_v36 }
 0x719   : > { %v4371_v27 = vsel %vm4303_vm13, %v4271_v5, %v4339_v62  ;;  %vm4291_vm0 = vcmp.gt.f32.partialorder %v4259_v33, 0.0  ;;  %v4327_v12 = vmul.f32 %v7362_v47, %v4259_v33 }
 0x71a   : > { %4403 = vst.msk [vmem:[%s7370_s28 + $0xa0] sm:$0xff] %vm2205_vm11, %v4371_v27  ;;  %v4373_v20 = vsel %vm4305_vm15, %v4273_v36, %v4341_v2 }
 0x71b   : > { %4405 = vst.msk [vmem:[%s7370_s28 + $0xb0] sm:$0xff] %vm2205_vm11, %v4373_v20  ;;  %v4359_v28 = vsel %vm4291_vm0, %v4259_v33, %v4327_v12 }
 0x71c   : > { %v4202_v3 = vpop.permute.xlu1 %4201  ;;  %4391 = vst.msk [vmem:[%s7370_s28 + $0x40] sm:$0xff] %vm2205_vm11, %v4359_v28  ;;  %v4065_v32 = vpop.f32.mrf.mxu1 }
 0x71d   : > { %v4274_v44 = vadd.f32 %v4202_v3, %v4101_v24  ;;  %v4206_v6 = vpop.permute.xlu0 %4205  ;;  %v4066_v10 = vadd.f32 %v7354_v21, %v4065_v32 }
 0x71e   : > { %v4276_v42 = vadd.f32 %v4206_v6, %v4106_v63  ;;  %v4216_v63 = vpop.permute.xlu2 %4215 }
 0x71f   : > { %vm4306_vm1 = vcmp.gt.f32.partialorder %v4274_v44, 0.0  ;;  %v4342_v50 = vmul.f32 %v7362_v47, %v4274_v44  ;;  %v4260_v29 = vadd.f32 %v7392_v26, %v4066_v10 }
 0x720   : > { %vm4308_vm2 = vcmp.gt.f32.partialorder %v4276_v42, 0.0  ;;  %v4344_v39 = vmul.f32 %v7362_v47, %v4276_v42 }
 0x721   : > { %v4374_v15 = vsel %vm4306_vm1, %v4274_v44, %v4342_v50  ;;  %vm4292_vm10 = vcmp.gt.f32.partialorder %v4260_v29, 0.0  ;;  %v4328_v57 = vmul.f32 %v7362_v47, %v4260_v29 }
 0x722   : > { %4406 = vst.msk [vmem:[%s7370_s28 + $0xb8] sm:$0xff] %vm2205_vm11, %v4374_v15  ;;  %v4376_v4 = vsel %vm4308_vm2, %v4276_v42, %v4344_v39 }
 0x723   : > { %4408 = vst.msk [vmem:[%s7370_s28 + $0xc8] sm:$0xff] %vm2205_vm11, %v4376_v4  ;;  %v4360_v8 = vsel %vm4292_vm10, %v4260_v29, %v4328_v57 }
 0x724   : > { %4392 = vst.msk [vmem:[%s7370_s28 + $0x48] sm:$0xff] %vm2205_vm11, %v4360_v8  ;;  %v4208_v26 = vpop.permute.xlu1 %4207 }
 0x725   : > { %v4212_v16 = vpop.permute.xlu0 %4211 }
 0x72a   : > { %v4108_v37 = vpop.f32.mrf.mxu2 }
 0x72b   : > { %v4109_v22 = vadd.f32 %v7354_v21, %v4108_v37 }
 0x72c   : > { %v4068_v45 = vpop.f32.mrf.mxu1  ;;  %v4214_v62 = vpop.permute.xlu1 %4213 }
 0x72d   : > { %v4277_v35 = vadd.f32 %v4208_v26, %v4109_v22  ;;  %v4069_v48 = vadd.f32 %v7354_v21, %v4068_v45  ;;  %v4218_v29 = vpop.permute.xlu0 %4217 }
 0x72f   : > { %vm4309_vm9 = vcmp.gt.f32.partialorder %v4277_v35, 0.0  ;;  %v4345_v9 = vmul.f32 %v7362_v47, %v4277_v35  ;;  %v4261_v60 = vadd.f32 %v7414_v52, %v4069_v48 }
 0x731   : > { %v4377_v17 = vsel %vm4309_vm9, %v4277_v35, %v4345_v9  ;;  %vm4293_vm14 = vcmp.gt.f32.partialorder %v4261_v60, 0.0  ;;  %v4329_v49 = vmul.f32 %v7362_v47, %v4261_v60 }
 0x732   : > { %4409 = vst.msk [vmem:[%s7370_s28 + $0xd0] sm:$0xff] %vm2205_vm11, %v4377_v17  ;;  %v4110_v31 = vpop.f32.mrf.mxu2 }
 0x733   : > { %v4361_v18 = vsel %vm4293_vm14, %v4261_v60, %v4329_v49  ;;  %v4111_v58 = vadd.f32 %v7354_v21, %v4110_v31 }
 0x734   : > { %4393 = vst.msk [vmem:[%s7370_s28 + $0x50] sm:$0xff] %vm2205_vm11, %v4361_v18  ;;  %v4070_v59 = vpop.f32.mrf.mxu1 }
 0x735   : > { %v4278_v41 = vadd.f32 %v4210_v13, %v4111_v58  ;;  %v4071_v51 = vadd.f32 %v7354_v21, %v4070_v59 }
 0x737   : > { %vm4310_vm3 = vcmp.gt.f32.partialorder %v4278_v41, 0.0  ;;  %v4346_v52 = vmul.f32 %v7362_v47, %v4278_v41  ;;  %v4262_v54 = vadd.f32 %v7420_v30, %v4071_v51 }
 0x739   : > { %v4378_v23 = vsel %vm4310_vm3, %v4278_v41, %v4346_v52  ;;  %vm4294_vm4 = vcmp.gt.f32.partialorder %v4262_v54, 0.0  ;;  %v4330_v38 = vmul.f32 %v7362_v47, %v4262_v54 }
 0x73a   : > { %4410 = vst.msk [vmem:[%s7370_s28 + $0xd8] sm:$0xff] %vm2205_vm11, %v4378_v23 }
 0x73b   : > { %v4362_v11 = vsel %vm4294_vm4, %v4262_v54, %v4330_v38 }
 0x73c   : > { %4394 = vst.msk [vmem:[%s7370_s28 + $0x58] sm:$0xff] %vm2205_vm11, %v4362_v11 }
 0x742   : > { %v4113_v0 = vpop.f32.mrf.mxu2 }
 0x743   : > { %v4114_v1 = vadd.f32 %v7354_v21, %v4113_v0 }
 0x745   : > { %v4279_v55 = vadd.f32 %v4212_v16, %v4114_v1  ;;  %v4073_v7 = vpop.f32.mrf.mxu1 }
 0x746   : > { %v4074_v25 = vadd.f32 %v7354_v21, %v4073_v7 }
 0x747   : > { %vm4311_vm5 = vcmp.gt.f32.partialorder %v4279_v55, 0.0  ;;  %v4347_v30 = vmul.f32 %v7362_v47, %v4279_v55 }
 0x748   : > { %v4263_v5 = vadd.f32 %v7404_v53, %v4074_v25 }
 0x749   : > { %v4379_v34 = vsel %vm4311_vm5, %v4279_v55, %v4347_v30 }
 0x74a   : > { %4411 = vst.msk [vmem:[%s7370_s28 + $0xe0] sm:$0xff] %vm2205_vm11, %v4379_v34  ;;  %v4115_v19 = vpop.f32.mrf.mxu2  ;;  %vm4295_vm6 = vcmp.gt.f32.partialorder %v4263_v5, 0.0  ;;  %v4331_v46 = vmul.f32 %v7362_v47, %v4263_v5 }
 0x74b   : > { %v4116_v14 = vadd.f32 %v7354_v21, %v4115_v19 }
 0x74c   : > { %v4363_v36 = vsel %vm4295_vm6, %v4263_v5, %v4331_v46 }
 0x74d   : > { %v4280_v33 = vadd.f32 %v4214_v62, %v4116_v14  ;;  %4395 = vst.msk [vmem:[%s7370_s28 + $0x60] sm:$0xff] %vm2205_vm11, %v4363_v36  ;;  %v4075_v27 = vpop.f32.mrf.mxu1 }
 0x74e   : > { %v4076_v53 = vadd.f32 %v7354_v21, %v4075_v27 }
 0x74f   : > { %vm4312_vm7 = vcmp.gt.f32.partialorder %v4280_v33, 0.0  ;;  %v4348_v2 = vmul.f32 %v7362_v47, %v4280_v33 }
 0x750   : > { %v4264_v12 = vadd.f32 %v7422_v40, %v4076_v53 }
 0x751   : > { %v4380_v43 = vsel %vm4312_vm7, %v4280_v33, %v4348_v2 }
 0x752   : > { %4412 = vst.msk [vmem:[%s7370_s28 + $0xe8] sm:$0xff] %vm2205_vm11, %v4380_v43  ;;  %vm4296_vm8 = vcmp.gt.f32.partialorder %v4264_v12, 0.0  ;;  %v4332_v24 = vmul.f32 %v7362_v47, %v4264_v12 }
 0x754   : > { %v4364_v20 = vsel %vm4296_vm8, %v4264_v12, %v4332_v24 }
 0x755   : > { %4396 = vst.msk [vmem:[%s7370_s28 + $0x68] sm:$0xff] %vm2205_vm11, %v4364_v20 }
 0x75b   : > { %v4118_v28 = vpop.f32.mrf.mxu2 }
 0x75c   : > { %v4119_v3 = vadd.f32 %v7354_v21, %v4118_v28 }
 0x75e   : > { %v4281_v44 = vadd.f32 %v4216_v63, %v4119_v3 }
 0x760   : > { %vm4313_vm12 = vcmp.gt.f32.partialorder %v4281_v44, 0.0  ;;  %v4349_v32 = vmul.f32 %v7362_v47, %v4281_v44 }
 0x762   : > { %v4381_v6 = vsel %vm4313_vm12, %v4281_v44, %v4349_v32 }
 0x763   : > { %4413 = vst.msk [vmem:[%s7370_s28 + $0xf0] sm:$0xff] %vm2205_vm11, %v4381_v6  ;;  %v4120_v40 = vpop.f32.mrf.mxu2 }
 0x764   : > { %v4078_v10 = vpop.f32.mrf.mxu1  ;;  %v4121_v50 = vadd.f32 %v7354_v21, %v4120_v40 }
 0x765   : > { %v4079_v42 = vadd.f32 %v7354_v21, %v4078_v10 }
 0x766   : > { %v4282_v15 = vadd.f32 %v4218_v29, %v4121_v50 }
 0x767   : > { %v4265_v39 = vadd.f32 %v7432_v61, %v4079_v42 }
 0x768   : > { %vm4314_vm13 = vcmp.gt.f32.partialorder %v4282_v15, 0.0  ;;  %v4350_v57 = vmul.f32 %v7362_v47, %v4282_v15 }
 0x769   : > { %vm4297_vm15 = vcmp.gt.f32.partialorder %v4265_v39, 0.0  ;;  %v4333_v4 = vmul.f32 %v7362_v47, %v4265_v39 }
 0x76a   : > { %v4382_v8 = vsel %vm4314_vm13, %v4282_v15, %v4350_v57 }
 0x76b   : > { %v4365_v37 = vsel %vm4297_vm15, %v4265_v39, %v4333_v4  ;;  %4414 = vst.msk [vmem:[%s7370_s28 + $0xf8] sm:$0xff] %vm2205_vm11, %v4382_v8 }
 0x76c   : > { %v4080_v22 = vpop.f32.mrf.mxu1  ;;  %4397 = vst.msk [vmem:[%s7370_s28 + $0x70] sm:$0xff] %vm2205_vm11, %v4365_v37 }
 0x76d   : > { %v4081_v26 = vadd.f32 %v7354_v21, %v4080_v22 }
 0x76f   : > { %v4266_v45 = vadd.f32 %v7412_v56, %v4081_v26 }
 0x771   : > { %vm4298_vm0 = vcmp.gt.f32.partialorder %v4266_v45, 0.0  ;;  %v4334_v61 = vmul.f32 %v7362_v47, %v4266_v45 }
 0x773   : > { %v4366_v35 = vsel %vm4298_vm0, %v4266_v45, %v4334_v61 }
 0x774   : > { %4398 = vst.msk [vmem:[%s7370_s28 + $0x78] sm:$0xff] %vm2205_vm11, %v4366_v35 }
 0x775 PF: > { %s17_s24 = sadd.s32 1, %s4776_s24  }
 0x776   : > { %p14_p4 = scmp.ge.s32.totalorder %s17_s24, 4  }
 0x778   :  { %16 = sbr.rel (!%p14_p4) target bundleno = 1 (0x1), region = 83 }

</bundles_post_ra>
